<compile_context>
chip_gen: v6e
topology: v6e:2x2x1
jax: 0.10.0
libtpu: 0.0.40
codegen_flags: <defaults>
</compile_context>

<pallas_src>
import functools

import jax
import jax.numpy as jnp
from jax.experimental import pallas as pl
from jax.experimental.pallas import tpu as pltpu

EXPANSION = 2
BN_EPS = 1e-5


def _vmem_config():
    """Generation-aware (tile_budget, scoped_vmem_limit) in bytes."""
    cap = 64 * 1024 * 1024
    try:
        cap = int(pltpu.get_tpu_info().vmem_capacity_bytes)
    except Exception:
        pass  # conservative default (v7x-sized)
    if cap >= 96 * 1024 * 1024:                       # v5e / v6e: 128 MiB per TC
        return 28 * 1024 * 1024, 96 * 1024 * 1024
    return 12 * 1024 * 1024, 52 * 1024 * 1024         # v7x: 64 MiB per TC


_TILE_VMEM_BUDGET, _VMEM_LIMIT_BYTES = _vmem_config()


def _compiler_params(dimension_semantics):
    return pltpu.CompilerParams(dimension_semantics=dimension_semantics,
                                vmem_limit_bytes=_VMEM_LIMIT_BYTES)


# ----------------------------------------------------------------------------
# Kernel 1: fused 1x1 conv (matmul over channels) + ReLU + BatchNorm (eval),
#           optionally fused residual add.
# ----------------------------------------------------------------------------
def _conv1x1_relu_bn_kernel(x_ref, w_ref, scale_ref, shift_ref, o_ref):
    y = jnp.dot(x_ref[...].astype(jnp.bfloat16), w_ref[...],
                preferred_element_type=jnp.float32)
    y = jnp.maximum(y, 0.0)                       # ReLU before BN (as in the ref)
    y = y * scale_ref[...] + shift_ref[...]       # folded BatchNorm2d (eval)
    o_ref[...] = y.astype(o_ref.dtype)


def _conv1x1_relu_bn_res_kernel(x_ref, w_ref, scale_ref, shift_ref, res_ref, o_ref):
    y = jnp.dot(x_ref[...].astype(jnp.bfloat16), w_ref[...],
                preferred_element_type=jnp.float32)
    y = jnp.maximum(y, 0.0)
    y = y * scale_ref[...] + shift_ref[...]
    o_ref[...] = (res_ref[...].astype(jnp.float32) + y).astype(o_ref.dtype)


def conv1x1_relu_bn(x2d, w, scale, shift, residual=None, out_dtype=None):
    """x2d: (R, Cin); w: (Cin, Cout) bf16; scale/shift: (Cout,); residual: (R, Cout)."""
    R, Cin = x2d.shape
    Cout = w.shape[1]
    if out_dtype is None:
        out_dtype = x2d.dtype

    in_b = x2d.dtype.itemsize
    out_b = jnp.dtype(out_dtype).itemsize
    res_b = residual.dtype.itemsize if residual is not None else 0
    # Per-row bytes incl. double-buffered input/output/residual streams.
    per_row = 2 * (Cin * in_b + Cout * out_b + Cout * res_b) + 4 * Cout
    tr = max(256, _TILE_VMEM_BUDGET // max(per_row, 1))
    tr = min(tr, 4096, R)
    if tr != R:
        tr = max(8, (tr // 8) * 8)
    grid = (pl.cdiv(R, tr),)

    in_specs = [
        pl.BlockSpec((tr, Cin), lambda i: (i, 0)),
        pl.BlockSpec((Cin, Cout), lambda i: (0, 0)),       # resident weights
        pl.BlockSpec((1, Cout), lambda i: (0, 0)),
        pl.BlockSpec((1, Cout), lambda i: (0, 0)),
    ]
    args = [x2d, w, scale.reshape(1, Cout), shift.reshape(1, Cout)]
    kernel = _conv1x1_relu_bn_kernel
    if residual is not None:
        in_specs.append(pl.BlockSpec((tr, Cout), lambda i: (i, 0)))
        args.append(residual)
        kernel = _conv1x1_relu_bn_res_kernel

    bytes_accessed = (R * Cin * in_b + Cin * Cout * w.dtype.itemsize
                      + 2 * Cout * 4 + R * Cout * (out_b + res_b))
    cost = pl.CostEstimate(flops=int(2 * R * Cin * Cout), transcendentals=0,
                           bytes_accessed=int(bytes_accessed))
    return pl.pallas_call(
        kernel,
        out_shape=jax.ShapeDtypeStruct((R, Cout), out_dtype),
        grid=grid,
        in_specs=in_specs,
        out_specs=pl.BlockSpec((tr, Cout), lambda i: (i, 0)),
        cost_estimate=cost,
        compiler_params=_compiler_params(("parallel",)),
    )(*args)


# ----------------------------------------------------------------------------
# Shared axial multi-head self-attention core (runs on one VMEM tile).
#   x_seq: (TS, L, C); pos: (L, C); wqkv: (C, 3C) bf16 [Q|K|V, head-major,
#   1/sqrt(d) pre-folded into Wq]; wo: (C, C) bf16.
#   Returns f32 (TS, L, C) = x + MHSA(x + pos).
# ----------------------------------------------------------------------------
def _attn_core(x_seq, pos, wqkv, wo, heads, head_dim):
    TS, L, C = x_seq.shape
    x32 = x_seq.astype(jnp.float32)
    xp = (x32 + pos.astype(jnp.float32)[None, :, :]).astype(jnp.bfloat16)

    # ONE full-width QKV projection for all heads: (TS*L, C) @ (C, 3C).
    qkv = jnp.dot(xp.reshape(TS * L, C), wqkv,
                  preferred_element_type=jnp.float32)            # (TS*L, 3C) f32
    q2, k2, v2 = qkv[:, :C], qkv[:, C:2 * C], qkv[:, 2 * C:]

    ctx_cols = []
    for h in range(heads):                                       # static unroll
        lo, hi = h * head_dim, (h + 1) * head_dim
        qh = q2[:, lo:hi].reshape(TS, L, head_dim).astype(jnp.bfloat16)
        kh = k2[:, lo:hi].reshape(TS, L, head_dim).astype(jnp.bfloat16)
        vh = v2[:, lo:hi].reshape(TS, L, head_dim).astype(jnp.bfloat16)
        s = jnp.einsum('sld,smd->slm', qh, kh,
                       preferred_element_type=jnp.float32)       # (TS, L, L) f32
        s = s - jnp.max(s, axis=-1, keepdims=True)               # stable softmax
        p = jnp.exp(s)
        # approx reciprocal is ~2^-12 accurate (<< bf16 rounding elsewhere);
        # use approx=False for bit-faithful row sums.
        p = p * pl.reciprocal(jnp.sum(p, axis=-1, keepdims=True), approx=True)
        ah = jnp.einsum('slm,smd->sld', p.astype(jnp.bfloat16), vh,
                        preferred_element_type=jnp.float32)      # (TS, L, d) f32
        ctx_cols.append(ah.reshape(TS * L, head_dim))

    ctx = jnp.concatenate(ctx_cols, axis=-1).astype(jnp.bfloat16)  # (TS*L, C)
    # ONE full-width output projection: (TS*L, C) @ (C, C).
    y = jnp.dot(ctx, wo, preferred_element_type=jnp.float32)
    return x32 + y.reshape(TS, L, C)


def _attn_cost(num_seq, L, C, io_bytes):
    T = num_seq * L
    flops = 2 * T * C * 3 * C + 4 * T * L * C + 2 * T * C * C
    bytes_accessed = 2 * T * C * io_bytes + 4 * C * C * 2 + L * C * 4
    return pl.CostEstimate(flops=int(flops), transcendentals=int(T * L),
                           bytes_accessed=int(bytes_accessed))


# ----------------------------------------------------------------------------
# Kernel 2a: attention along axis 1 of an (S, L, C) sequence-major tensor
#            (used for the W-axis attention; layout already sequence-major).
# ----------------------------------------------------------------------------
def _seq_attn_kernel(x_ref, pos_ref, wqkv_ref, wo_ref, o_ref, *, heads, head_dim):
    out = _attn_core(x_ref[...], pos_ref[...], wqkv_ref[...], wo_ref[...],
                     heads, head_dim)
    o_ref[...] = out.astype(o_ref.dtype)


def _pick_seq_tile(S, L, C):
    # Per-sequence working set: double-buffered bf16 in/out blocks plus the
    # in-kernel temporaries (x32, xp, qkv f32, per-head scores/probs, ctx, y).
    per_seq = L * C * 32 + L * L * 6
    ts = max(1, _TILE_VMEM_BUDGET // per_seq)
    if S > 8:
        ts = min(ts, pl.cdiv(S, 2))   # >= 2 grid steps -> both v7x TCs get work
    ts = min(ts, S)
    if ts < S:
        ts = max(8, (ts // 8) * 8)
    return min(ts, S)


def axial_attention_seq(x_slc, pos, wqkv, wo, *, heads, head_dim):
    """x_slc: (S, L, C); attention runs along L."""
    S, L, C = x_slc.shape
    ts = _pick_seq_tile(S, L, C)
    kernel = functools.partial(_seq_attn_kernel, heads=heads, head_dim=head_dim)
    return pl.pallas_call(
        kernel,
        out_shape=jax.ShapeDtypeStruct((S, L, C), x_slc.dtype),
        grid=(pl.cdiv(S, ts),),
        in_specs=[
            pl.BlockSpec((ts, L, C), lambda i: (i, 0, 0)),
            pl.BlockSpec((L, C), lambda i: (0, 0)),
            pl.BlockSpec((C, 3 * C), lambda i: (0, 0)),     # resident fused Wqkv
            pl.BlockSpec((C, C), lambda i: (0, 0)),          # resident Wo
        ],
        out_specs=pl.BlockSpec((ts, L, C), lambda i: (i, 0, 0)),
        cost_estimate=_attn_cost(S, L, C, x_slc.dtype.itemsize),
        compiler_params=_compiler_params(("parallel",)),
    )(x_slc, pos, wqkv, wo)


# ----------------------------------------------------------------------------
# Kernel 2b: attention along the H axis of an NHWC tensor, output in NHWC.
# The sequence gather/scatter (NHWC <-> sequence-major) happens inside the
# kernel with static strided sub-window loads/stores, so no XLA-level HBM
# transpose is needed on either side.
# ----------------------------------------------------------------------------
def _h_attn_kernel(x_ref, pos_ref, wqkv_ref, wo_ref, o_ref, *, heads, head_dim, tw):
    # x_ref block: (1, H, TW, C); sequences run along H.
    rows = [x_ref[0, :, w, :] for w in range(tw)]        # each (H, C)
    x_seq = jnp.stack(rows, axis=0)                      # (TW, H, C)
    out = _attn_core(x_seq, pos_ref[...], wqkv_ref[...], wo_ref[...],
                     heads, head_dim).astype(o_ref.dtype)
    for w in range(tw):                                  # scatter back NHWC
        o_ref[0, :, w, :] = out[w]


def _pick_w_tile(W, H, C):
    per_seq = H * C * 32 + H * H * 6
    cap = max(1, _TILE_VMEM_BUDGET // per_seq)
    for tw in (32, 16, 8):
        if tw <= min(cap, W) and W % tw == 0:
            return tw
    return W   # small / odd W: full-axis block (allowed: equals full dim)


def axial_attention_h(x_nhwc, pos, wqkv, wo, *, heads, head_dim):
    N, H, W, C = x_nhwc.shape
    tw = _pick_w_tile(W, H, C)
    kernel = functools.partial(_h_attn_kernel, heads=heads, head_dim=head_dim, tw=tw)
    return pl.pallas_call(
        kernel,
        out_shape=jax.ShapeDtypeStruct((N, H, W, C), x_nhwc.dtype),
        grid=(N, pl.cdiv(W, tw)),
        in_specs=[
            pl.BlockSpec((1, H, tw, C), lambda n, j: (n, 0, j, 0)),
            pl.BlockSpec((H, C), lambda n, j: (0, 0)),
            pl.BlockSpec((C, 3 * C), lambda n, j: (0, 0)),
            pl.BlockSpec((C, C), lambda n, j: (0, 0)),
        ],
        out_specs=pl.BlockSpec((1, H, tw, C), lambda n, j: (n, 0, j, 0)),
        cost_estimate=_attn_cost(N * W, H, C, x_nhwc.dtype.itemsize),
        compiler_params=_compiler_params(("parallel", "parallel")),
    )(x_nhwc, pos, wqkv, wo)


# ----------------------------------------------------------------------------
# Parameter init (deterministic, in-script) + full forward pass.
# ----------------------------------------------------------------------------
def _init_conv_bn(key, cin, cout):
    kw, kg, kb, km, kv = jax.random.split(key, 5)
    w = 0.1 * jax.random.normal(kw, (cout, cin), jnp.float32)     # Conv2d weight
    gamma = 1.0 + 0.1 * jax.random.normal(kg, (cout,), jnp.float32)
    beta = 0.1 * jax.random.normal(kb, (cout,), jnp.float32)
    mean = 0.1 * jax.random.normal(km, (cout,), jnp.float32)
    var = jnp.abs(jax.random.normal(kv, (cout,), jnp.float32)) + 0.5
    scale = gamma / jnp.sqrt(var + BN_EPS)
    shift = beta - mean * scale
    return dict(w=w.T.astype(jnp.bfloat16), scale=scale, shift=shift)


def _init_attn(key, planes, pos_dim, heads, head_dim):
    kq, kk, kv, ko, kp = jax.random.split(key, 5)
    sc = 1.0 / float(planes) ** 0.5
    wq = sc * jax.random.normal(kq, (planes, planes), jnp.float32)
    wk = sc * jax.random.normal(kk, (planes, planes), jnp.float32)
    wv = sc * jax.random.normal(kv, (planes, planes), jnp.float32)
    wo = sc * jax.random.normal(ko, (planes, planes), jnp.float32)
    pos = 0.1 * jax.random.normal(kp, (pos_dim, planes), jnp.float32)
    # Fused (C, 3C) projection, columns [Q | K | V] with head-major sub-blocks;
    # the 1/sqrt(head_dim) attention scale is folded into Wq.
    inv_sqrt_d = 1.0 / float(head_dim) ** 0.5
    wqkv = jnp.concatenate([wq * inv_sqrt_d, wk, wv], axis=1).astype(jnp.bfloat16)
    return dict(wqkv=wqkv, wo=wo.astype(jnp.bfloat16), pos=pos)


def init_params(key, in_planes, planes, head_dim, pos_dim):
    assert planes % head_dim == 0
    heads = planes // head_dim
    k1, k2, k3, k4 = jax.random.split(key, 4)
    return dict(
        in_conv=_init_conv_bn(k1, in_planes, planes),
        h_att=_init_attn(k2, planes, pos_dim, heads, head_dim),
        w_att=_init_attn(k3, planes, pos_dim, heads, head_dim),
        out_conv=_init_conv_bn(k4, planes, planes * EXPANSION),
    )


def residual_axial_attention_block(x_nchw, params, *, head_dim, stride=1):
    N, Cin, H, W = x_nchw.shape
    planes = params["in_conv"]["w"].shape[1]
    heads = planes // head_dim

    # NCHW -> NHWC boundary transpose with the f32->bf16 cast fused in; the
    # same bf16 copy feeds both the first conv and the residual add (which
    # accumulates in f32 inside the kernel).
    x_nhwc = jnp.transpose(x_nchw, (0, 2, 3, 1)).astype(jnp.bfloat16)
    x_flat = x_nhwc.reshape(N * H * W, Cin)

    # x1 = in_conv1x1(x)
    p = params["in_conv"]
    x1 = conv1x1_relu_bn(x_flat, p["w"], p["scale"], p["shift"],
                         out_dtype=jnp.bfloat16).reshape(N, H, W, planes)

    # x2 = h_att(x1): attention along H directly on the NHWC tensor.
    pa = params["h_att"]
    x2 = axial_attention_h(x1, pa["pos"], pa["wqkv"], pa["wo"],
                           heads=heads, head_dim=head_dim)

    # x3 = w_att(x2): attention along W, sequences (N*H, W, planes) (free reshape).
    pa = params["w_att"]
    x3 = axial_attention_seq(x2.reshape(N * H, W, planes), pa["pos"],
                             pa["wqkv"], pa["wo"],
                             heads=heads, head_dim=head_dim)
    x3_flat = x3.reshape(N * H * W, planes)

    # x4 = out_conv1x1(x3); out = x + x4 (residual fused into the conv kernel).
    p = params["out_conv"]
    if stride == 1:
        out = conv1x1_relu_bn(x3_flat, p["w"], p["scale"], p["shift"],
                              residual=x_flat, out_dtype=jnp.float32)
        out = out.reshape(N, H, W, planes * EXPANSION)
    else:
        x4 = conv1x1_relu_bn(x3_flat, p["w"], p["scale"], p["shift"],
                             out_dtype=jnp.float32)
        x4 = x4.reshape(N, H, W, planes * EXPANSION)
        # AvgPool2d(stride, stride) as XLA glue (non-hot-path).
        x4 = x4.reshape(N, H // stride, stride, W // stride, stride, -1).mean(axis=(2, 4))
        # TODO(synk): downsample module for the skip path not provided; assumed None.
        out = x_nhwc[:, ::stride, ::stride, :].astype(jnp.float32) + x4

    return jnp.transpose(out, (0, 3, 1, 2))                   # NHWC -> NCHW


# ----------------------------------------------------------------------------
if __name__ == "__main__":
    key = jax.random.PRNGKey(0)
    kx, kp = jax.random.split(key)

    # Small shapes consistent with the module: in_planes == planes * expansion
    # so the residual add is well-defined (stride=1, downsample=None).
    # (For peak MXU/lane efficiency, planes should be a multiple of 128.)
    N, in_planes, H, W = 2, 8, 8, 8
    planes, head_dim, pos_dim, stride = 4, 2, 8, 1
    assert pos_dim == H == W, "positional table length must match the axial length"
    assert in_planes == planes * EXPANSION

    x = jax.random.normal(kx, (N, in_planes, H, W), jnp.float32)
    params = init_params(kp, in_planes, planes, head_dim, pos_dim)

    fwd = jax.jit(functools.partial(residual_axial_attention_block,
                                    head_dim=head_dim, stride=stride))
    out = jax.block_until_ready(fwd(x, params))

    assert out.shape == (N, planes * EXPANSION, H, W), out.shape
    assert bool(jnp.all(jnp.isfinite(out)))
    print("KERNEL_OK")
</pallas_src>

<mosaic_0001>
module attributes {stable_mosaic.version = 11 : i64} {
  func.func @_h_attn_kernel(%arg0: i32, %arg1: i32, %arg2: memref<1x8x8x4xbf16, #tpu.memory_space<vmem>>, %arg3: memref<8x4xf32, #tpu.memory_space<vmem>>, %arg4: memref<4x12xbf16, #tpu.memory_space<vmem>>, %arg5: memref<4x4xbf16, #tpu.memory_space<vmem>>, %arg6: memref<1x8x8x4xbf16, #tpu.memory_space<vmem>>) attributes {dimension_semantics = [#tpu.dimension_semantics<parallel>, #tpu.dimension_semantics<parallel>], iteration_bounds = array<i64: 2, 1>, scalar_prefetch = 0 : i64, scratch_operands = 0 : i64, tpu.core_type = #tpu.core_type<tc>, window_params = [{transform_indices = @transform_0, window_bounds = array<i64: 1, 8, 8, 4>}, {pipeline_mode = #tpu.pipeline_mode<synchronous>, transform_indices = @transform_1, window_bounds = array<i64: 8, 4>}, {pipeline_mode = #tpu.pipeline_mode<synchronous>, transform_indices = @transform_2, window_bounds = array<i64: 4, 12>}, {pipeline_mode = #tpu.pipeline_mode<synchronous>, transform_indices = @transform_3, window_bounds = array<i64: 4, 4>}, {transform_indices = @transform_4, window_bounds = array<i64: 1, 8, 8, 4>}]} {
    %c0 = arith.constant 0 : index
    %c0_0 = arith.constant 0 : index
    %c0_1 = arith.constant 0 : index
    %c0_2 = arith.constant 0 : index
    %0 = vector.load %arg2[%c0, %c0_0, %c0_1, %c0_2] : memref<1x8x8x4xbf16, #tpu.memory_space<vmem>>, vector<1x8x1x4xbf16>
    %1 = vector.shape_cast %0 : vector<1x8x1x4xbf16> to vector<8x4xbf16>
    %c0_3 = arith.constant 0 : index
    %c0_4 = arith.constant 0 : index
    %c1 = arith.constant 1 : index
    %c0_5 = arith.constant 0 : index
    %2 = vector.load %arg2[%c0_3, %c0_4, %c1, %c0_5] : memref<1x8x8x4xbf16, #tpu.memory_space<vmem>>, vector<1x8x1x4xbf16>
    %3 = vector.shape_cast %2 : vector<1x8x1x4xbf16> to vector<8x4xbf16>
    %c0_6 = arith.constant 0 : index
    %c0_7 = arith.constant 0 : index
    %c2 = arith.constant 2 : index
    %c0_8 = arith.constant 0 : index
    %4 = vector.load %arg2[%c0_6, %c0_7, %c2, %c0_8] : memref<1x8x8x4xbf16, #tpu.memory_space<vmem>>, vector<1x8x1x4xbf16>
    %5 = vector.shape_cast %4 : vector<1x8x1x4xbf16> to vector<8x4xbf16>
    %c0_9 = arith.constant 0 : index
    %c0_10 = arith.constant 0 : index
    %c3 = arith.constant 3 : index
    %c0_11 = arith.constant 0 : index
    %6 = vector.load %arg2[%c0_9, %c0_10, %c3, %c0_11] : memref<1x8x8x4xbf16, #tpu.memory_space<vmem>>, vector<1x8x1x4xbf16>
    %7 = vector.shape_cast %6 : vector<1x8x1x4xbf16> to vector<8x4xbf16>
    %c0_12 = arith.constant 0 : index
    %c0_13 = arith.constant 0 : index
    %c4 = arith.constant 4 : index
    %c0_14 = arith.constant 0 : index
    %8 = vector.load %arg2[%c0_12, %c0_13, %c4, %c0_14] : memref<1x8x8x4xbf16, #tpu.memory_space<vmem>>, vector<1x8x1x4xbf16>
    %9 = vector.shape_cast %8 : vector<1x8x1x4xbf16> to vector<8x4xbf16>
    %c0_15 = arith.constant 0 : index
    %c0_16 = arith.constant 0 : index
    %c5 = arith.constant 5 : index
    %c0_17 = arith.constant 0 : index
    %10 = vector.load %arg2[%c0_15, %c0_16, %c5, %c0_17] : memref<1x8x8x4xbf16, #tpu.memory_space<vmem>>, vector<1x8x1x4xbf16>
    %11 = vector.shape_cast %10 : vector<1x8x1x4xbf16> to vector<8x4xbf16>
    %c0_18 = arith.constant 0 : index
    %c0_19 = arith.constant 0 : index
    %c6 = arith.constant 6 : index
    %c0_20 = arith.constant 0 : index
    %12 = vector.load %arg2[%c0_18, %c0_19, %c6, %c0_20] : memref<1x8x8x4xbf16, #tpu.memory_space<vmem>>, vector<1x8x1x4xbf16>
    %13 = vector.shape_cast %12 : vector<1x8x1x4xbf16> to vector<8x4xbf16>
    %c0_21 = arith.constant 0 : index
    %c0_22 = arith.constant 0 : index
    %c7 = arith.constant 7 : index
    %c0_23 = arith.constant 0 : index
    %14 = vector.load %arg2[%c0_21, %c0_22, %c7, %c0_23] : memref<1x8x8x4xbf16, #tpu.memory_space<vmem>>, vector<1x8x1x4xbf16>
    %15 = vector.shape_cast %14 : vector<1x8x1x4xbf16> to vector<8x4xbf16>
    %16 = vector.shape_cast %1 : vector<8x4xbf16> to vector<1x8x4xbf16>
    %17 = vector.shape_cast %3 : vector<8x4xbf16> to vector<1x8x4xbf16>
    %18 = vector.shape_cast %5 : vector<8x4xbf16> to vector<1x8x4xbf16>
    %19 = vector.shape_cast %7 : vector<8x4xbf16> to vector<1x8x4xbf16>
    %20 = vector.shape_cast %9 : vector<8x4xbf16> to vector<1x8x4xbf16>
    %21 = vector.shape_cast %11 : vector<8x4xbf16> to vector<1x8x4xbf16>
    %22 = vector.shape_cast %13 : vector<8x4xbf16> to vector<1x8x4xbf16>
    %23 = vector.shape_cast %15 : vector<8x4xbf16> to vector<1x8x4xbf16>
    %24 = tpu.concatenate %16, %17, %18, %19, %20, %21, %22, %23 in 0 : vector<1x8x4xbf16>, vector<1x8x4xbf16>, vector<1x8x4xbf16>, vector<1x8x4xbf16>, vector<1x8x4xbf16>, vector<1x8x4xbf16>, vector<1x8x4xbf16>, vector<1x8x4xbf16> -> vector<8x8x4xbf16>
    %c0_24 = arith.constant 0 : index
    %c0_25 = arith.constant 0 : index
    %25 = vector.load %arg3[%c0_24, %c0_25] : memref<8x4xf32, #tpu.memory_space<vmem>>, vector<8x4xf32>
    %c0_26 = arith.constant 0 : index
    %c0_27 = arith.constant 0 : index
    %26 = vector.load %arg4[%c0_26, %c0_27] : memref<4x12xbf16, #tpu.memory_space<vmem>>, vector<4x12xbf16>
    %c0_28 = arith.constant 0 : index
    %c0_29 = arith.constant 0 : index
    %27 = vector.load %arg5[%c0_28, %c0_29] : memref<4x4xbf16, #tpu.memory_space<vmem>>, vector<4x4xbf16>
    %28 = arith.extf %24 : vector<8x8x4xbf16> to vector<8x8x4xf32>
    %29 = vector.shape_cast %25 : vector<8x4xf32> to vector<1x8x4xf32>
    %30 = vector.broadcast %29 : vector<1x8x4xf32> to vector<8x8x4xf32>
    %31 = arith.addf %28, %30 : vector<8x8x4xf32>
    %32 = arith.truncf %31 : vector<8x8x4xf32> to vector<8x8x4xbf16>
    %33 = vector.shape_cast %32 : vector<8x8x4xbf16> to vector<64x4xbf16>
    %cst = arith.constant dense<0.000000e+00> : vector<64x12xf32>
    %34 = tpu.matmul %33, %26, %cst {dimension_numbers = #tpu.dot_dimension_numbers<[1], [0], [0], [1], [0, 0, 1, 1], [], []>} : vector<64x4xbf16>, vector<4x12xbf16>, vector<64x12xf32> -> vector<64x12xf32>
    %35 = vector.extract_strided_slice %34 {offsets = [0, 0], sizes = [64, 4], strides = [1, 1]} : vector<64x12xf32> to vector<64x4xf32>
    %36 = vector.extract_strided_slice %34 {offsets = [0, 4], sizes = [64, 4], strides = [1, 1]} : vector<64x12xf32> to vector<64x4xf32>
    %37 = vector.extract_strided_slice %34 {offsets = [0, 8], sizes = [64, 4], strides = [1, 1]} : vector<64x12xf32> to vector<64x4xf32>
    %38 = vector.extract_strided_slice %35 {offsets = [0, 0], sizes = [64, 2], strides = [1, 1]} : vector<64x4xf32> to vector<64x2xf32>
    %39 = vector.shape_cast %38 : vector<64x2xf32> to vector<8x8x2xf32>
    %40 = arith.truncf %39 : vector<8x8x2xf32> to vector<8x8x2xbf16>
    %41 = vector.extract_strided_slice %36 {offsets = [0, 0], sizes = [64, 2], strides = [1, 1]} : vector<64x4xf32> to vector<64x2xf32>
    %42 = vector.shape_cast %41 : vector<64x2xf32> to vector<8x8x2xf32>
    %43 = arith.truncf %42 : vector<8x8x2xf32> to vector<8x8x2xbf16>
    %44 = vector.extract_strided_slice %37 {offsets = [0, 0], sizes = [64, 2], strides = [1, 1]} : vector<64x4xf32> to vector<64x2xf32>
    %45 = vector.shape_cast %44 : vector<64x2xf32> to vector<8x8x2xf32>
    %46 = arith.truncf %45 : vector<8x8x2xf32> to vector<8x8x2xbf16>
    "tpu.trace_start"() <{level = 10 : i32, message = "sld,smd->slm"}> : () -> ()
    %cst_30 = arith.constant dense<0.000000e+00> : vector<8x8x8xf32>
    %47 = tpu.matmul %40, %43, %cst_30 {dimension_numbers = #tpu.dot_dimension_numbers<[2], [2], [1], [1], [0, 0, 0, 1, 1, 1], [0], [0]>} : vector<8x8x2xbf16>, vector<8x8x2xbf16>, vector<8x8x8xf32> -> vector<8x8x8xf32>
    "tpu.trace_stop"() : () -> ()
    %cst_31 = arith.constant dense<0xFF800000> : vector<8x8xf32>
    %48 = vector.multi_reduction <maximumf>, %47, %cst_31 [2] : vector<8x8x8xf32> to vector<8x8xf32>
    %49 = vector.shape_cast %48 : vector<8x8xf32> to vector<8x8x1xf32>
    %50 = vector.broadcast %49 : vector<8x8x1xf32> to vector<8x8x8xf32>
    %51 = arith.subf %47, %50 : vector<8x8x8xf32>
    %52 = math.exp %51 : vector<8x8x8xf32>
    %cst_32 = arith.constant dense<0.000000e+00> : vector<8x8xf32>
    %53 = vector.multi_reduction <add>, %52, %cst_32 [2] : vector<8x8x8xf32> to vector<8x8xf32>
    %54 = vector.shape_cast %53 : vector<8x8xf32> to vector<8x8x1xf32>
    %55 = tpu.reciprocal %54 {approx = true} : vector<8x8x1xf32> -> vector<8x8x1xf32>
    %56 = vector.broadcast %55 : vector<8x8x1xf32> to vector<8x8x8xf32>
    %57 = arith.mulf %52, %56 : vector<8x8x8xf32>
    %58 = arith.truncf %57 : vector<8x8x8xf32> to vector<8x8x8xbf16>
    "tpu.trace_start"() <{level = 10 : i32, message = "slm,smd->sld"}> : () -> ()
    %cst_33 = arith.constant dense<0.000000e+00> : vector<8x8x2xf32>
    %59 = tpu.matmul %58, %46, %cst_33 {dimension_numbers = #tpu.dot_dimension_numbers<[2], [1], [1], [2], [0, 0, 0, 1, 1, 2], [0], [0]>} : vector<8x8x8xbf16>, vector<8x8x2xbf16>, vector<8x8x2xf32> -> vector<8x8x2xf32>
    "tpu.trace_stop"() : () -> ()
    %60 = vector.shape_cast %59 : vector<8x8x2xf32> to vector<64x2xf32>
    %61 = vector.extract_strided_slice %35 {offsets = [0, 2], sizes = [64, 2], strides = [1, 1]} : vector<64x4xf32> to vector<64x2xf32>
    %62 = vector.shape_cast %61 : vector<64x2xf32> to vector<8x8x2xf32>
    %63 = arith.truncf %62 : vector<8x8x2xf32> to vector<8x8x2xbf16>
    %64 = vector.extract_strided_slice %36 {offsets = [0, 2], sizes = [64, 2], strides = [1, 1]} : vector<64x4xf32> to vector<64x2xf32>
    %65 = vector.shape_cast %64 : vector<64x2xf32> to vector<8x8x2xf32>
    %66 = arith.truncf %65 : vector<8x8x2xf32> to vector<8x8x2xbf16>
    %67 = vector.extract_strided_slice %37 {offsets = [0, 2], sizes = [64, 2], strides = [1, 1]} : vector<64x4xf32> to vector<64x2xf32>
    %68 = vector.shape_cast %67 : vector<64x2xf32> to vector<8x8x2xf32>
    %69 = arith.truncf %68 : vector<8x8x2xf32> to vector<8x8x2xbf16>
    "tpu.trace_start"() <{level = 10 : i32, message = "sld,smd->slm"}> : () -> ()
    %cst_34 = arith.constant dense<0.000000e+00> : vector<8x8x8xf32>
    %70 = tpu.matmul %63, %66, %cst_34 {dimension_numbers = #tpu.dot_dimension_numbers<[2], [2], [1], [1], [0, 0, 0, 1, 1, 1], [0], [0]>} : vector<8x8x2xbf16>, vector<8x8x2xbf16>, vector<8x8x8xf32> -> vector<8x8x8xf32>
    "tpu.trace_stop"() : () -> ()
    %cst_35 = arith.constant dense<0xFF800000> : vector<8x8xf32>
    %71 = vector.multi_reduction <maximumf>, %70, %cst_35 [2] : vector<8x8x8xf32> to vector<8x8xf32>
    %72 = vector.shape_cast %71 : vector<8x8xf32> to vector<8x8x1xf32>
    %73 = vector.broadcast %72 : vector<8x8x1xf32> to vector<8x8x8xf32>
    %74 = arith.subf %70, %73 : vector<8x8x8xf32>
    %75 = math.exp %74 : vector<8x8x8xf32>
    %cst_36 = arith.constant dense<0.000000e+00> : vector<8x8xf32>
    %76 = vector.multi_reduction <add>, %75, %cst_36 [2] : vector<8x8x8xf32> to vector<8x8xf32>
    %77 = vector.shape_cast %76 : vector<8x8xf32> to vector<8x8x1xf32>
    %78 = tpu.reciprocal %77 {approx = true} : vector<8x8x1xf32> -> vector<8x8x1xf32>
    %79 = vector.broadcast %78 : vector<8x8x1xf32> to vector<8x8x8xf32>
    %80 = arith.mulf %75, %79 : vector<8x8x8xf32>
    %81 = arith.truncf %80 : vector<8x8x8xf32> to vector<8x8x8xbf16>
    "tpu.trace_start"() <{level = 10 : i32, message = "slm,smd->sld"}> : () -> ()
    %cst_37 = arith.constant dense<0.000000e+00> : vector<8x8x2xf32>
    %82 = tpu.matmul %81, %69, %cst_37 {dimension_numbers = #tpu.dot_dimension_numbers<[2], [1], [1], [2], [0, 0, 0, 1, 1, 2], [0], [0]>} : vector<8x8x8xbf16>, vector<8x8x2xbf16>, vector<8x8x2xf32> -> vector<8x8x2xf32>
    "tpu.trace_stop"() : () -> ()
    %83 = vector.shape_cast %82 : vector<8x8x2xf32> to vector<64x2xf32>
    %84 = tpu.concatenate %60, %83 in 1 : vector<64x2xf32>, vector<64x2xf32> -> vector<64x4xf32>
    %85 = arith.truncf %84 : vector<64x4xf32> to vector<64x4xbf16>
    %cst_38 = arith.constant dense<0.000000e+00> : vector<64x4xf32>
    %86 = tpu.matmul %85, %27, %cst_38 {dimension_numbers = #tpu.dot_dimension_numbers<[1], [0], [0], [1], [0, 0, 1, 1], [], []>} : vector<64x4xbf16>, vector<4x4xbf16>, vector<64x4xf32> -> vector<64x4xf32>
    %87 = vector.shape_cast %86 : vector<64x4xf32> to vector<8x8x4xf32>
    %88 = arith.addf %28, %87 : vector<8x8x4xf32>
    %89 = arith.truncf %88 : vector<8x8x4xf32> to vector<8x8x4xbf16>
    %90 = vector.extract_strided_slice %89 {offsets = [0, 0, 0], sizes = [1, 8, 4], strides = [1, 1, 1]} : vector<8x8x4xbf16> to vector<1x8x4xbf16>
    %91 = vector.shape_cast %90 : vector<1x8x4xbf16> to vector<8x4xbf16>
    %c0_39 = arith.constant 0 : index
    %c0_40 = arith.constant 0 : index
    %c0_41 = arith.constant 0 : index
    %c0_42 = arith.constant 0 : index
    %92 = vector.load %arg6[%c0_39, %c0_40, %c0_41, %c0_42] : memref<1x8x8x4xbf16, #tpu.memory_space<vmem>>, vector<1x8x1x4xbf16>
    %93 = vector.shape_cast %92 : vector<1x8x1x4xbf16> to vector<8x4xbf16>
    %94 = vector.shape_cast %91 : vector<8x4xbf16> to vector<1x8x1x4xbf16>
    tpu.vector_store %arg6[%c0_39, %c0_40, %c0_41, %c0_42], %94 {strides = array<i32>} : memref<1x8x8x4xbf16, #tpu.memory_space<vmem>>, vector<1x8x1x4xbf16>,
    %95 = vector.extract_strided_slice %89 {offsets = [1, 0, 0], sizes = [1, 8, 4], strides = [1, 1, 1]} : vector<8x8x4xbf16> to vector<1x8x4xbf16>
    %96 = vector.shape_cast %95 : vector<1x8x4xbf16> to vector<8x4xbf16>
    %c0_43 = arith.constant 0 : index
    %c0_44 = arith.constant 0 : index
    %c1_45 = arith.constant 1 : index
    %c0_46 = arith.constant 0 : index
    %97 = vector.load %arg6[%c0_43, %c0_44, %c1_45, %c0_46] : memref<1x8x8x4xbf16, #tpu.memory_space<vmem>>, vector<1x8x1x4xbf16>
    %98 = vector.shape_cast %97 : vector<1x8x1x4xbf16> to vector<8x4xbf16>
    %99 = vector.shape_cast %96 : vector<8x4xbf16> to vector<1x8x1x4xbf16>
    tpu.vector_store %arg6[%c0_43, %c0_44, %c1_45, %c0_46], %99 {strides = array<i32>} : memref<1x8x8x4xbf16, #tpu.memory_space<vmem>>, vector<1x8x1x4xbf16>,
    %100 = vector.extract_strided_slice %89 {offsets = [2, 0, 0], sizes = [1, 8, 4], strides = [1, 1, 1]} : vector<8x8x4xbf16> to vector<1x8x4xbf16>
    %101 = vector.shape_cast %100 : vector<1x8x4xbf16> to vector<8x4xbf16>
    %c0_47 = arith.constant 0 : index
    %c0_48 = arith.constant 0 : index
    %c2_49 = arith.constant 2 : index
    %c0_50 = arith.constant 0 : index
    %102 = vector.load %arg6[%c0_47, %c0_48, %c2_49, %c0_50] : memref<1x8x8x4xbf16, #tpu.memory_space<vmem>>, vector<1x8x1x4xbf16>
    %103 = vector.shape_cast %102 : vector<1x8x1x4xbf16> to vector<8x4xbf16>
    %104 = vector.shape_cast %101 : vector<8x4xbf16> to vector<1x8x1x4xbf16>
    tpu.vector_store %arg6[%c0_47, %c0_48, %c2_49, %c0_50], %104 {strides = array<i32>} : memref<1x8x8x4xbf16, #tpu.memory_space<vmem>>, vector<1x8x1x4xbf16>,
    %105 = vector.extract_strided_slice %89 {offsets = [3, 0, 0], sizes = [1, 8, 4], strides = [1, 1, 1]} : vector<8x8x4xbf16> to vector<1x8x4xbf16>
    %106 = vector.shape_cast %105 : vector<1x8x4xbf16> to vector<8x4xbf16>
    %c0_51 = arith.constant 0 : index
    %c0_52 = arith.constant 0 : index
    %c3_53 = arith.constant 3 : index
    %c0_54 = arith.constant 0 : index
    %107 = vector.load %arg6[%c0_51, %c0_52, %c3_53, %c0_54] : memref<1x8x8x4xbf16, #tpu.memory_space<vmem>>, vector<1x8x1x4xbf16>
    %108 = vector.shape_cast %107 : vector<1x8x1x4xbf16> to vector<8x4xbf16>
    %109 = vector.shape_cast %106 : vector<8x4xbf16> to vector<1x8x1x4xbf16>
    tpu.vector_store %arg6[%c0_51, %c0_52, %c3_53, %c0_54], %109 {strides = array<i32>} : memref<1x8x8x4xbf16, #tpu.memory_space<vmem>>, vector<1x8x1x4xbf16>,
    %110 = vector.extract_strided_slice %89 {offsets = [4, 0, 0], sizes = [1, 8, 4], strides = [1, 1, 1]} : vector<8x8x4xbf16> to vector<1x8x4xbf16>
    %111 = vector.shape_cast %110 : vector<1x8x4xbf16> to vector<8x4xbf16>
    %c0_55 = arith.constant 0 : index
    %c0_56 = arith.constant 0 : index
    %c4_57 = arith.constant 4 : index
    %c0_58 = arith.constant 0 : index
    %112 = vector.load %arg6[%c0_55, %c0_56, %c4_57, %c0_58] : memref<1x8x8x4xbf16, #tpu.memory_space<vmem>>, vector<1x8x1x4xbf16>
    %113 = vector.shape_cast %112 : vector<1x8x1x4xbf16> to vector<8x4xbf16>
    %114 = vector.shape_cast %111 : vector<8x4xbf16> to vector<1x8x1x4xbf16>
    tpu.vector_store %arg6[%c0_55, %c0_56, %c4_57, %c0_58], %114 {strides = array<i32>} : memref<1x8x8x4xbf16, #tpu.memory_space<vmem>>, vector<1x8x1x4xbf16>,
    %115 = vector.extract_strided_slice %89 {offsets = [5, 0, 0], sizes = [1, 8, 4], strides = [1, 1, 1]} : vector<8x8x4xbf16> to vector<1x8x4xbf16>
    %116 = vector.shape_cast %115 : vector<1x8x4xbf16> to vector<8x4xbf16>
    %c0_59 = arith.constant 0 : index
    %c0_60 = arith.constant 0 : index
    %c5_61 = arith.constant 5 : index
    %c0_62 = arith.constant 0 : index
    %117 = vector.load %arg6[%c0_59, %c0_60, %c5_61, %c0_62] : memref<1x8x8x4xbf16, #tpu.memory_space<vmem>>, vector<1x8x1x4xbf16>
    %118 = vector.shape_cast %117 : vector<1x8x1x4xbf16> to vector<8x4xbf16>
    %119 = vector.shape_cast %116 : vector<8x4xbf16> to vector<1x8x1x4xbf16>
    tpu.vector_store %arg6[%c0_59, %c0_60, %c5_61, %c0_62], %119 {strides = array<i32>} : memref<1x8x8x4xbf16, #tpu.memory_space<vmem>>, vector<1x8x1x4xbf16>,
    %120 = vector.extract_strided_slice %89 {offsets = [6, 0, 0], sizes = [1, 8, 4], strides = [1, 1, 1]} : vector<8x8x4xbf16> to vector<1x8x4xbf16>
    %121 = vector.shape_cast %120 : vector<1x8x4xbf16> to vector<8x4xbf16>
    %c0_63 = arith.constant 0 : index
    %c0_64 = arith.constant 0 : index
    %c6_65 = arith.constant 6 : index
    %c0_66 = arith.constant 0 : index
    %122 = vector.load %arg6[%c0_63, %c0_64, %c6_65, %c0_66] : memref<1x8x8x4xbf16, #tpu.memory_space<vmem>>, vector<1x8x1x4xbf16>
    %123 = vector.shape_cast %122 : vector<1x8x1x4xbf16> to vector<8x4xbf16>
    %124 = vector.shape_cast %121 : vector<8x4xbf16> to vector<1x8x1x4xbf16>
    tpu.vector_store %arg6[%c0_63, %c0_64, %c6_65, %c0_66], %124 {strides = array<i32>} : memref<1x8x8x4xbf16, #tpu.memory_space<vmem>>, vector<1x8x1x4xbf16>,
    %125 = vector.extract_strided_slice %89 {offsets = [7, 0, 0], sizes = [1, 8, 4], strides = [1, 1, 1]} : vector<8x8x4xbf16> to vector<1x8x4xbf16>
    %126 = vector.shape_cast %125 : vector<1x8x4xbf16> to vector<8x4xbf16>
    %c0_67 = arith.constant 0 : index
    %c0_68 = arith.constant 0 : index
    %c7_69 = arith.constant 7 : index
    %c0_70 = arith.constant 0 : index
    %127 = vector.load %arg6[%c0_67, %c0_68, %c7_69, %c0_70] : memref<1x8x8x4xbf16, #tpu.memory_space<vmem>>, vector<1x8x1x4xbf16>
    %128 = vector.shape_cast %127 : vector<1x8x1x4xbf16> to vector<8x4xbf16>
    %129 = vector.shape_cast %126 : vector<8x4xbf16> to vector<1x8x1x4xbf16>
    tpu.vector_store %arg6[%c0_67, %c0_68, %c7_69, %c0_70], %129 {strides = array<i32>} : memref<1x8x8x4xbf16, #tpu.memory_space<vmem>>, vector<1x8x1x4xbf16>,
    return
  }
  func.func @transform_0(%arg0: i32, %arg1: i32) -> (i32, i32, i32, i32) {
    %c0_i32 = arith.constant 0 : i32
    %c0_i32_0 = arith.constant 0 : i32
    %c0_i32_1 = arith.constant 0 : i32
    return %arg0, %c0_i32, %arg1, %c0_i32_0 : i32, i32, i32, i32
  }
  func.func @transform_1(%arg0: i32, %arg1: i32) -> (i32, i32) {
    %c0_i32 = arith.constant 0 : i32
    %c0_i32_0 = arith.constant 0 : i32
    %c0_i32_1 = arith.constant 0 : i32
    return %c0_i32, %c0_i32_0 : i32, i32
  }
  func.func @transform_2(%arg0: i32, %arg1: i32) -> (i32, i32) {
    %c0_i32 = arith.constant 0 : i32
    %c0_i32_0 = arith.constant 0 : i32
    %c0_i32_1 = arith.constant 0 : i32
    return %c0_i32, %c0_i32_0 : i32, i32
  }
  func.func @transform_3(%arg0: i32, %arg1: i32) -> (i32, i32) {
    %c0_i32 = arith.constant 0 : i32
    %c0_i32_0 = arith.constant 0 : i32
    %c0_i32_1 = arith.constant 0 : i32
    return %c0_i32, %c0_i32_0 : i32, i32
  }
  func.func @transform_4(%arg0: i32, %arg1: i32) -> (i32, i32, i32, i32) {
    %c0_i32 = arith.constant 0 : i32
    %c0_i32_0 = arith.constant 0 : i32
    %c0_i32_1 = arith.constant 0 : i32
    return %arg0, %c0_i32, %arg1, %c0_i32_0 : i32, i32, i32, i32
  }
}

module attributes {stable_mosaic.version = 11 : i64} {
  func.func @_conv1x1_relu_bn_res_kernel(%arg0: i32, %arg1: memref<128x4xbf16, #tpu.memory_space<vmem>>, %arg2: memref<4x8xbf16, #tpu.memory_space<vmem>>, %arg3: memref<1x8xf32, #tpu.memory_space<vmem>>, %arg4: memref<1x8xf32, #tpu.memory_space<vmem>>, %arg5: memref<128x8xbf16, #tpu.memory_space<vmem>>, %arg6: memref<128x8xf32, #tpu.memory_space<vmem>>) attributes {dimension_semantics = [#tpu.dimension_semantics<parallel>], iteration_bounds = array<i64: 1>, scalar_prefetch = 0 : i64, scratch_operands = 0 : i64, tpu.core_type = #tpu.core_type<tc>, window_params = [{transform_indices = @transform_0, window_bounds = array<i64: 128, 4>}, {pipeline_mode = #tpu.pipeline_mode<synchronous>, transform_indices = @transform_1, window_bounds = array<i64: 4, 8>}, {pipeline_mode = #tpu.pipeline_mode<synchronous>, transform_indices = @transform_2, window_bounds = array<i64: 1, 8>}, {pipeline_mode = #tpu.pipeline_mode<synchronous>, transform_indices = @transform_3, window_bounds = array<i64: 1, 8>}, {transform_indices = @transform_4, window_bounds = array<i64: 128, 8>}, {transform_indices = @transform_5, window_bounds = array<i64: 128, 8>}]} {
    %c0 = arith.constant 0 : index
    %c0_0 = arith.constant 0 : index
    %0 = vector.load %arg1[%c0, %c0_0] : memref<128x4xbf16, #tpu.memory_space<vmem>>, vector<128x4xbf16>
    %c0_1 = arith.constant 0 : index
    %c0_2 = arith.constant 0 : index
    %1 = vector.load %arg2[%c0_1, %c0_2] : memref<4x8xbf16, #tpu.memory_space<vmem>>, vector<4x8xbf16>
    %cst = arith.constant dense<0.000000e+00> : vector<128x8xf32>
    %2 = tpu.matmul %0, %1, %cst {dimension_numbers = #tpu.dot_dimension_numbers<[1], [0], [0], [1], [0, 0, 1, 1], [], []>} : vector<128x4xbf16>, vector<4x8xbf16>, vector<128x8xf32> -> vector<128x8xf32>
    %cst_3 = arith.constant 0.000000e+00 : f32
    %3 = vector.broadcast %cst_3 : f32 to vector<128x8xf32>
    %4 = arith.maximumf %2, %3 : vector<128x8xf32>
    %c0_4 = arith.constant 0 : index
    %c0_5 = arith.constant 0 : index
    %5 = vector.load %arg3[%c0_4, %c0_5] : memref<1x8xf32, #tpu.memory_space<vmem>>, vector<1x8xf32>
    %6 = vector.broadcast %5 : vector<1x8xf32> to vector<128x8xf32>
    %7 = arith.mulf %4, %6 : vector<128x8xf32>
    %c0_6 = arith.constant 0 : index
    %c0_7 = arith.constant 0 : index
    %8 = vector.load %arg4[%c0_6, %c0_7] : memref<1x8xf32, #tpu.memory_space<vmem>>, vector<1x8xf32>
    %9 = vector.broadcast %8 : vector<1x8xf32> to vector<128x8xf32>
    %10 = arith.addf %7, %9 : vector<128x8xf32>
    %c0_8 = arith.constant 0 : index
    %c0_9 = arith.constant 0 : index
    %11 = vector.load %arg5[%c0_8, %c0_9] : memref<128x8xbf16, #tpu.memory_space<vmem>>, vector<128x8xbf16>
    %12 = arith.extf %11 : vector<128x8xbf16> to vector<128x8xf32>
    %13 = arith.addf %12, %10 : vector<128x8xf32>
    %c0_10 = arith.constant 0 : index
    %c0_11 = arith.constant 0 : index
    %14 = vector.load %arg6[%c0_10, %c0_11] : memref<128x8xf32, #tpu.memory_space<vmem>>, vector<128x8xf32>
    tpu.vector_store %arg6[%c0_10, %c0_11], %13 {strides = array<i32>} : memref<128x8xf32, #tpu.memory_space<vmem>>, vector<128x8xf32>,
    return
  }
  func.func @transform_0(%arg0: i32) -> (i32, i32) {
    %c0_i32 = arith.constant 0 : i32
    %c0_i32_0 = arith.constant 0 : i32
    return %arg0, %c0_i32 : i32, i32
  }
  func.func @transform_1(%arg0: i32) -> (i32, i32) {
    %c0_i32 = arith.constant 0 : i32
    %c0_i32_0 = arith.constant 0 : i32
    %c0_i32_1 = arith.constant 0 : i32
    return %c0_i32, %c0_i32_0 : i32, i32
  }
  func.func @transform_2(%arg0: i32) -> (i32, i32) {
    %c0_i32 = arith.constant 0 : i32
    %c0_i32_0 = arith.constant 0 : i32
    %c0_i32_1 = arith.constant 0 : i32
    return %c0_i32, %c0_i32_0 : i32, i32
  }
  func.func @transform_3(%arg0: i32) -> (i32, i32) {
    %c0_i32 = arith.constant 0 : i32
    %c0_i32_0 = arith.constant 0 : i32
    %c0_i32_1 = arith.constant 0 : i32
    return %c0_i32, %c0_i32_0 : i32, i32
  }
  func.func @transform_4(%arg0: i32) -> (i32, i32) {
    %c0_i32 = arith.constant 0 : i32
    %c0_i32_0 = arith.constant 0 : i32
    return %arg0, %c0_i32 : i32, i32
  }
  func.func @transform_5(%arg0: i32) -> (i32, i32) {
    %c0_i32 = arith.constant 0 : i32
    %c0_i32_0 = arith.constant 0 : i32
    return %arg0, %c0_i32 : i32, i32
  }
}

module attributes {stable_mosaic.version = 11 : i64} {
  func.func @_conv1x1_relu_bn_kernel(%arg0: i32, %arg1: memref<128x8xbf16, #tpu.memory_space<vmem>>, %arg2: memref<8x4xbf16, #tpu.memory_space<vmem>>, %arg3: memref<1x4xf32, #tpu.memory_space<vmem>>, %arg4: memref<1x4xf32, #tpu.memory_space<vmem>>, %arg5: memref<128x4xbf16, #tpu.memory_space<vmem>>) attributes {dimension_semantics = [#tpu.dimension_semantics<parallel>], iteration_bounds = array<i64: 1>, scalar_prefetch = 0 : i64, scratch_operands = 0 : i64, tpu.core_type = #tpu.core_type<tc>, window_params = [{transform_indices = @transform_0, window_bounds = array<i64: 128, 8>}, {pipeline_mode = #tpu.pipeline_mode<synchronous>, transform_indices = @transform_1, window_bounds = array<i64: 8, 4>}, {pipeline_mode = #tpu.pipeline_mode<synchronous>, transform_indices = @transform_2, window_bounds = array<i64: 1, 4>}, {pipeline_mode = #tpu.pipeline_mode<synchronous>, transform_indices = @transform_3, window_bounds = array<i64: 1, 4>}, {transform_indices = @transform_4, window_bounds = array<i64: 128, 4>}]} {
    %c0 = arith.constant 0 : index
    %c0_0 = arith.constant 0 : index
    %0 = vector.load %arg1[%c0, %c0_0] : memref<128x8xbf16, #tpu.memory_space<vmem>>, vector<128x8xbf16>
    %c0_1 = arith.constant 0 : index
    %c0_2 = arith.constant 0 : index
    %1 = vector.load %arg2[%c0_1, %c0_2] : memref<8x4xbf16, #tpu.memory_space<vmem>>, vector<8x4xbf16>
    %cst = arith.constant dense<0.000000e+00> : vector<128x4xf32>
    %2 = tpu.matmul %0, %1, %cst {dimension_numbers = #tpu.dot_dimension_numbers<[1], [0], [0], [1], [0, 0, 1, 1], [], []>} : vector<128x8xbf16>, vector<8x4xbf16>, vector<128x4xf32> -> vector<128x4xf32>
    %cst_3 = arith.constant 0.000000e+00 : f32
    %3 = vector.broadcast %cst_3 : f32 to vector<128x4xf32>
    %4 = arith.maximumf %2, %3 : vector<128x4xf32>
    %c0_4 = arith.constant 0 : index
    %c0_5 = arith.constant 0 : index
    %5 = vector.load %arg3[%c0_4, %c0_5] : memref<1x4xf32, #tpu.memory_space<vmem>>, vector<1x4xf32>
    %6 = vector.broadcast %5 : vector<1x4xf32> to vector<128x4xf32>
    %7 = arith.mulf %4, %6 : vector<128x4xf32>
    %c0_6 = arith.constant 0 : index
    %c0_7 = arith.constant 0 : index
    %8 = vector.load %arg4[%c0_6, %c0_7] : memref<1x4xf32, #tpu.memory_space<vmem>>, vector<1x4xf32>
    %9 = vector.broadcast %8 : vector<1x4xf32> to vector<128x4xf32>
    %10 = arith.addf %7, %9 : vector<128x4xf32>
    %11 = arith.truncf %10 : vector<128x4xf32> to vector<128x4xbf16>
    %c0_8 = arith.constant 0 : index
    %c0_9 = arith.constant 0 : index
    %12 = vector.load %arg5[%c0_8, %c0_9] : memref<128x4xbf16, #tpu.memory_space<vmem>>, vector<128x4xbf16>
    tpu.vector_store %arg5[%c0_8, %c0_9], %11 {strides = array<i32>} : memref<128x4xbf16, #tpu.memory_space<vmem>>, vector<128x4xbf16>,
    return
  }
  func.func @transform_0(%arg0: i32) -> (i32, i32) {
    %c0_i32 = arith.constant 0 : i32
    %c0_i32_0 = arith.constant 0 : i32
    return %arg0, %c0_i32 : i32, i32
  }
  func.func @transform_1(%arg0: i32) -> (i32, i32) {
    %c0_i32 = arith.constant 0 : i32
    %c0_i32_0 = arith.constant 0 : i32
    %c0_i32_1 = arith.constant 0 : i32
    return %c0_i32, %c0_i32_0 : i32, i32
  }
  func.func @transform_2(%arg0: i32) -> (i32, i32) {
    %c0_i32 = arith.constant 0 : i32
    %c0_i32_0 = arith.constant 0 : i32
    %c0_i32_1 = arith.constant 0 : i32
    return %c0_i32, %c0_i32_0 : i32, i32
  }
  func.func @transform_3(%arg0: i32) -> (i32, i32) {
    %c0_i32 = arith.constant 0 : i32
    %c0_i32_0 = arith.constant 0 : i32
    %c0_i32_1 = arith.constant 0 : i32
    return %c0_i32, %c0_i32_0 : i32, i32
  }
  func.func @transform_4(%arg0: i32) -> (i32, i32) {
    %c0_i32 = arith.constant 0 : i32
    %c0_i32_0 = arith.constant 0 : i32
    return %arg0, %c0_i32 : i32, i32
  }
}

module attributes {stable_mosaic.version = 11 : i64} {
  func.func @_seq_attn_kernel(%arg0: i32, %arg1: memref<8x8x4xbf16, #tpu.memory_space<vmem>>, %arg2: memref<8x4xf32, #tpu.memory_space<vmem>>, %arg3: memref<4x12xbf16, #tpu.memory_space<vmem>>, %arg4: memref<4x4xbf16, #tpu.memory_space<vmem>>, %arg5: memref<8x8x4xbf16, #tpu.memory_space<vmem>>) attributes {dimension_semantics = [#tpu.dimension_semantics<parallel>], iteration_bounds = array<i64: 2>, scalar_prefetch = 0 : i64, scratch_operands = 0 : i64, tpu.core_type = #tpu.core_type<tc>, window_params = [{transform_indices = @transform_0, window_bounds = array<i64: 8, 8, 4>}, {pipeline_mode = #tpu.pipeline_mode<synchronous>, transform_indices = @transform_1, window_bounds = array<i64: 8, 4>}, {pipeline_mode = #tpu.pipeline_mode<synchronous>, transform_indices = @transform_2, window_bounds = array<i64: 4, 12>}, {pipeline_mode = #tpu.pipeline_mode<synchronous>, transform_indices = @transform_3, window_bounds = array<i64: 4, 4>}, {transform_indices = @transform_4, window_bounds = array<i64: 8, 8, 4>}]} {
    %c0 = arith.constant 0 : index
    %c0_0 = arith.constant 0 : index
    %c0_1 = arith.constant 0 : index
    %0 = vector.load %arg1[%c0, %c0_0, %c0_1] : memref<8x8x4xbf16, #tpu.memory_space<vmem>>, vector<8x8x4xbf16>
    %c0_2 = arith.constant 0 : index
    %c0_3 = arith.constant 0 : index
    %1 = vector.load %arg2[%c0_2, %c0_3] : memref<8x4xf32, #tpu.memory_space<vmem>>, vector<8x4xf32>
    %c0_4 = arith.constant 0 : index
    %c0_5 = arith.constant 0 : index
    %2 = vector.load %arg3[%c0_4, %c0_5] : memref<4x12xbf16, #tpu.memory_space<vmem>>, vector<4x12xbf16>
    %c0_6 = arith.constant 0 : index
    %c0_7 = arith.constant 0 : index
    %3 = vector.load %arg4[%c0_6, %c0_7] : memref<4x4xbf16, #tpu.memory_space<vmem>>, vector<4x4xbf16>
    %4 = arith.extf %0 : vector<8x8x4xbf16> to vector<8x8x4xf32>
    %5 = vector.shape_cast %1 : vector<8x4xf32> to vector<1x8x4xf32>
    %6 = vector.broadcast %5 : vector<1x8x4xf32> to vector<8x8x4xf32>
    %7 = arith.addf %4, %6 : vector<8x8x4xf32>
    %8 = arith.truncf %7 : vector<8x8x4xf32> to vector<8x8x4xbf16>
    %9 = vector.shape_cast %8 : vector<8x8x4xbf16> to vector<64x4xbf16>
    %cst = arith.constant dense<0.000000e+00> : vector<64x12xf32>
    %10 = tpu.matmul %9, %2, %cst {dimension_numbers = #tpu.dot_dimension_numbers<[1], [0], [0], [1], [0, 0, 1, 1], [], []>} : vector<64x4xbf16>, vector<4x12xbf16>, vector<64x12xf32> -> vector<64x12xf32>
    %11 = vector.extract_strided_slice %10 {offsets = [0, 0], sizes = [64, 4], strides = [1, 1]} : vector<64x12xf32> to vector<64x4xf32>
    %12 = vector.extract_strided_slice %10 {offsets = [0, 4], sizes = [64, 4], strides = [1, 1]} : vector<64x12xf32> to vector<64x4xf32>
    %13 = vector.extract_strided_slice %10 {offsets = [0, 8], sizes = [64, 4], strides = [1, 1]} : vector<64x12xf32> to vector<64x4xf32>
    %14 = vector.extract_strided_slice %11 {offsets = [0, 0], sizes = [64, 2], strides = [1, 1]} : vector<64x4xf32> to vector<64x2xf32>
    %15 = vector.shape_cast %14 : vector<64x2xf32> to vector<8x8x2xf32>
    %16 = arith.truncf %15 : vector<8x8x2xf32> to vector<8x8x2xbf16>
    %17 = vector.extract_strided_slice %12 {offsets = [0, 0], sizes = [64, 2], strides = [1, 1]} : vector<64x4xf32> to vector<64x2xf32>
    %18 = vector.shape_cast %17 : vector<64x2xf32> to vector<8x8x2xf32>
    %19 = arith.truncf %18 : vector<8x8x2xf32> to vector<8x8x2xbf16>
    %20 = vector.extract_strided_slice %13 {offsets = [0, 0], sizes = [64, 2], strides = [1, 1]} : vector<64x4xf32> to vector<64x2xf32>
    %21 = vector.shape_cast %20 : vector<64x2xf32> to vector<8x8x2xf32>
    %22 = arith.truncf %21 : vector<8x8x2xf32> to vector<8x8x2xbf16>
    "tpu.trace_start"() <{level = 10 : i32, message = "sld,smd->slm"}> : () -> ()
    %cst_8 = arith.constant dense<0.000000e+00> : vector<8x8x8xf32>
    %23 = tpu.matmul %16, %19, %cst_8 {dimension_numbers = #tpu.dot_dimension_numbers<[2], [2], [1], [1], [0, 0, 0, 1, 1, 1], [0], [0]>} : vector<8x8x2xbf16>, vector<8x8x2xbf16>, vector<8x8x8xf32> -> vector<8x8x8xf32>
    "tpu.trace_stop"() : () -> ()
    %cst_9 = arith.constant dense<0xFF800000> : vector<8x8xf32>
    %24 = vector.multi_reduction <maximumf>, %23, %cst_9 [2] : vector<8x8x8xf32> to vector<8x8xf32>
    %25 = vector.shape_cast %24 : vector<8x8xf32> to vector<8x8x1xf32>
    %26 = vector.broadcast %25 : vector<8x8x1xf32> to vector<8x8x8xf32>
    %27 = arith.subf %23, %26 : vector<8x8x8xf32>
    %28 = math.exp %27 : vector<8x8x8xf32>
    %cst_10 = arith.constant dense<0.000000e+00> : vector<8x8xf32>
    %29 = vector.multi_reduction <add>, %28, %cst_10 [2] : vector<8x8x8xf32> to vector<8x8xf32>
    %30 = vector.shape_cast %29 : vector<8x8xf32> to vector<8x8x1xf32>
    %31 = tpu.reciprocal %30 {approx = true} : vector<8x8x1xf32> -> vector<8x8x1xf32>
    %32 = vector.broadcast %31 : vector<8x8x1xf32> to vector<8x8x8xf32>
    %33 = arith.mulf %28, %32 : vector<8x8x8xf32>
    %34 = arith.truncf %33 : vector<8x8x8xf32> to vector<8x8x8xbf16>
    "tpu.trace_start"() <{level = 10 : i32, message = "slm,smd->sld"}> : () -> ()
    %cst_11 = arith.constant dense<0.000000e+00> : vector<8x8x2xf32>
    %35 = tpu.matmul %34, %22, %cst_11 {dimension_numbers = #tpu.dot_dimension_numbers<[2], [1], [1], [2], [0, 0, 0, 1, 1, 2], [0], [0]>} : vector<8x8x8xbf16>, vector<8x8x2xbf16>, vector<8x8x2xf32> -> vector<8x8x2xf32>
    "tpu.trace_stop"() : () -> ()
    %36 = vector.shape_cast %35 : vector<8x8x2xf32> to vector<64x2xf32>
    %37 = vector.extract_strided_slice %11 {offsets = [0, 2], sizes = [64, 2], strides = [1, 1]} : vector<64x4xf32> to vector<64x2xf32>
    %38 = vector.shape_cast %37 : vector<64x2xf32> to vector<8x8x2xf32>
    %39 = arith.truncf %38 : vector<8x8x2xf32> to vector<8x8x2xbf16>
    %40 = vector.extract_strided_slice %12 {offsets = [0, 2], sizes = [64, 2], strides = [1, 1]} : vector<64x4xf32> to vector<64x2xf32>
    %41 = vector.shape_cast %40 : vector<64x2xf32> to vector<8x8x2xf32>
    %42 = arith.truncf %41 : vector<8x8x2xf32> to vector<8x8x2xbf16>
    %43 = vector.extract_strided_slice %13 {offsets = [0, 2], sizes = [64, 2], strides = [1, 1]} : vector<64x4xf32> to vector<64x2xf32>
    %44 = vector.shape_cast %43 : vector<64x2xf32> to vector<8x8x2xf32>
    %45 = arith.truncf %44 : vector<8x8x2xf32> to vector<8x8x2xbf16>
    "tpu.trace_start"() <{level = 10 : i32, message = "sld,smd->slm"}> : () -> ()
    %cst_12 = arith.constant dense<0.000000e+00> : vector<8x8x8xf32>
    %46 = tpu.matmul %39, %42, %cst_12 {dimension_numbers = #tpu.dot_dimension_numbers<[2], [2], [1], [1], [0, 0, 0, 1, 1, 1], [0], [0]>} : vector<8x8x2xbf16>, vector<8x8x2xbf16>, vector<8x8x8xf32> -> vector<8x8x8xf32>
    "tpu.trace_stop"() : () -> ()
    %cst_13 = arith.constant dense<0xFF800000> : vector<8x8xf32>
    %47 = vector.multi_reduction <maximumf>, %46, %cst_13 [2] : vector<8x8x8xf32> to vector<8x8xf32>
    %48 = vector.shape_cast %47 : vector<8x8xf32> to vector<8x8x1xf32>
    %49 = vector.broadcast %48 : vector<8x8x1xf32> to vector<8x8x8xf32>
    %50 = arith.subf %46, %49 : vector<8x8x8xf32>
    %51 = math.exp %50 : vector<8x8x8xf32>
    %cst_14 = arith.constant dense<0.000000e+00> : vector<8x8xf32>
    %52 = vector.multi_reduction <add>, %51, %cst_14 [2] : vector<8x8x8xf32> to vector<8x8xf32>
    %53 = vector.shape_cast %52 : vector<8x8xf32> to vector<8x8x1xf32>
    %54 = tpu.reciprocal %53 {approx = true} : vector<8x8x1xf32> -> vector<8x8x1xf32>
    %55 = vector.broadcast %54 : vector<8x8x1xf32> to vector<8x8x8xf32>
    %56 = arith.mulf %51, %55 : vector<8x8x8xf32>
    %57 = arith.truncf %56 : vector<8x8x8xf32> to vector<8x8x8xbf16>
    "tpu.trace_start"() <{level = 10 : i32, message = "slm,smd->sld"}> : () -> ()
    %cst_15 = arith.constant dense<0.000000e+00> : vector<8x8x2xf32>
    %58 = tpu.matmul %57, %45, %cst_15 {dimension_numbers = #tpu.dot_dimension_numbers<[2], [1], [1], [2], [0, 0, 0, 1, 1, 2], [0], [0]>} : vector<8x8x8xbf16>, vector<8x8x2xbf16>, vector<8x8x2xf32> -> vector<8x8x2xf32>
    "tpu.trace_stop"() : () -> ()
    %59 = vector.shape_cast %58 : vector<8x8x2xf32> to vector<64x2xf32>
    %60 = tpu.concatenate %36, %59 in 1 : vector<64x2xf32>, vector<64x2xf32> -> vector<64x4xf32>
    %61 = arith.truncf %60 : vector<64x4xf32> to vector<64x4xbf16>
    %cst_16 = arith.constant dense<0.000000e+00> : vector<64x4xf32>
    %62 = tpu.matmul %61, %3, %cst_16 {dimension_numbers = #tpu.dot_dimension_numbers<[1], [0], [0], [1], [0, 0, 1, 1], [], []>} : vector<64x4xbf16>, vector<4x4xbf16>, vector<64x4xf32> -> vector<64x4xf32>
    %63 = vector.shape_cast %62 : vector<64x4xf32> to vector<8x8x4xf32>
    %64 = arith.addf %4, %63 : vector<8x8x4xf32>
    %65 = arith.truncf %64 : vector<8x8x4xf32> to vector<8x8x4xbf16>
    %c0_17 = arith.constant 0 : index
    %c0_18 = arith.constant 0 : index
    %c0_19 = arith.constant 0 : index
    %66 = vector.load %arg5[%c0_17, %c0_18, %c0_19] : memref<8x8x4xbf16, #tpu.memory_space<vmem>>, vector<8x8x4xbf16>
    tpu.vector_store %arg5[%c0_17, %c0_18, %c0_19], %65 {strides = array<i32>} : memref<8x8x4xbf16, #tpu.memory_space<vmem>>, vector<8x8x4xbf16>,
    return
  }
  func.func @transform_0(%arg0: i32) -> (i32, i32, i32) {
    %c0_i32 = arith.constant 0 : i32
    %c0_i32_0 = arith.constant 0 : i32
    %c0_i32_1 = arith.constant 0 : i32
    return %arg0, %c0_i32, %c0_i32_0 : i32, i32, i32
  }
  func.func @transform_1(%arg0: i32) -> (i32, i32) {
    %c0_i32 = arith.constant 0 : i32
    %c0_i32_0 = arith.constant 0 : i32
    %c0_i32_1 = arith.constant 0 : i32
    return %c0_i32, %c0_i32_0 : i32, i32
  }
  func.func @transform_2(%arg0: i32) -> (i32, i32) {
    %c0_i32 = arith.constant 0 : i32
    %c0_i32_0 = arith.constant 0 : i32
    %c0_i32_1 = arith.constant 0 : i32
    return %c0_i32, %c0_i32_0 : i32, i32
  }
  func.func @transform_3(%arg0: i32) -> (i32, i32) {
    %c0_i32 = arith.constant 0 : i32
    %c0_i32_0 = arith.constant 0 : i32
    %c0_i32_1 = arith.constant 0 : i32
    return %c0_i32, %c0_i32_0 : i32, i32
  }
  func.func @transform_4(%arg0: i32) -> (i32, i32, i32) {
    %c0_i32 = arith.constant 0 : i32
    %c0_i32_0 = arith.constant 0 : i32
    %c0_i32_1 = arith.constant 0 : i32
    return %arg0, %c0_i32, %c0_i32_0 : i32, i32, i32
  }
}

</mosaic_0001>

<bundles_post_ra>
// kernel: residual_axial_attention_block.4
= control target key start
LH: loop header
LB: loop body
LE: loop exit
PB: predicated region body
PF: predicated region fallthrough
CT: control target
= control target key end

     0   :  { %vm100_vm0 = vcmask 1043456   ;;  %vm75_vm1 = vcmask 64512   ;;  %vm327_vm2 = vcmask 27648   ;;  %s603_s1 = inlined_call_operand.vmem [shape: bf16[8,4], index: 1, kind: input, shape index: {}]   ;;  %s604_s0 = inlined_call_operand.vmem [shape: bf16[128,8], index: 0, kind: input, shape index: {}]   ;;  %s605_s2 = inlined_call_operand.vmem [shape: f32[1,4], index: 2, kind: input, shape index: {}]   ;;  %s606_s3 = inlined_call_operand.vmem [shape: f32[1,4], index: 3, kind: input, shape index: {}]   ;;  %s607_s4 = inlined_call_operand.vmem [shape: bf16[128,4], index: 4, kind: output, shape index: {}]  }
   0x1   :  { %v34_v0 = vld [vmem:[%s603_s1] sm:$0xf]  ;;  %v431_v4 = vld [vmem:[%s604_s0 + $0x8] sm:$0xff]   ;;  %v433_v6 = vld [vmem:[%s604_s0 + $0x10] sm:$0xff]  }
   0x2   :  { %427 = vmatprep.subr.msk.bf16.mxu0 %vm100_vm0, %v34_v0  ;;  %428 = vmatprep.subr.msk.bf16.mxu1 %vm100_vm0, %v34_v0  ;;  %v102_v1 = vsel %vm100_vm0, %v34_v0, 0  ;;  %v429_v2 = vld [vmem:[%s604_s0] sm:$0xff]   ;;  %v432_v5 = vld [vmem:[%s604_s0 + $0x28] sm:$0xff]   ;;  %v434_v7 = vld [vmem:[%s604_s0 + $0x30] sm:$0xff]  }
   0x3   :  { %408 = vmatpush3.bf16.msra.mxu0 %v102_v1  ;;  %426 = vmatpush3.bf16.msra.mxu1 %v102_v1  ;;  %v430_v3 = vld [vmem:[%s604_s0 + $0x20] sm:$0xff]   ;;  %v435_v8 = vld [vmem:[%s604_s0 + $0x18] sm:$0xff]  }
   0x4   :  { %409 = vmatprep.mubr.msk.bf16.mxu0 %vm75_vm1, %v429_v2  ;;  %417 = vmatprep.mubr.msk.bf16.mxu1 %vm75_vm1, %v430_v3  ;;  %v436_v9 = vld [vmem:[%s604_s0 + $0x38] sm:$0xff]   ;;  %v500_v11 = vld [vmem:[%s605_s2] ss:$0 sm:$0xff] }
   0x5   :  { %v505_v14 = vld [vmem:[%s606_s3] ss:$0 sm:$0xff] }
   0x6   :  { %410 = vmatmul.mubr.msk.bf16.vlgmr.msra.gmra.mxu0 %vm75_vm1, %v431_v4  ;;  %418 = vmatmul.mubr.msk.bf16.vlgmr.msra.gmra.mxu1 %vm75_vm1, %v432_v5 }
   0x7   :  { %413 = vmatprep.mubr.msk.bf16.mxu0 %vm75_vm1, %v433_v6  ;;  %421 = vmatprep.mubr.msk.bf16.mxu1 %vm75_vm1, %v434_v7 }
   0xe   :  { %414 = vmatmul.mubr.msk.bf16.gmra.mxu0 %vm75_vm1, %v435_v8  ;;  %422 = vmatmul.mubr.msk.bf16.gmra.mxu1 %vm75_vm1, %v436_v9 }
  0xc6   :  { %v411_v10 = vpop.f32.mrf.mxu0  ;;  %v419_v13 = vpop.f32.mrf.mxu1 }
  0xc7   :  { %v203_v12 = vmax.f32 %v411_v10, 0.0  ;;  %v211_v15 = vmax.f32 %v419_v13, 0.0 }
  0xc8   :  { %v138_v16 = vpop.f32.mrf.mxu0  ;;  %v170_v19 = vpop.f32.mrf.mxu1 }
  0xc9   :  { %v226_v17 = vmul.f32 %v500_v11, %v203_v12  ;;  %v201_v18 = vmax.f32 %v138_v16, 0.0  ;;  %v234_v20 = vmul.f32 %v500_v11, %v211_v15  ;;  %v209_v21 = vmax.f32 %v170_v19, 0.0 }
  0xca   :  { %v412_v22 = vpop.f32.mrf.mxu0  ;;  %v420_v26 = vpop.f32.mrf.mxu1 }
  0xcb   :  { %v249_v23 = vadd.f32 %v505_v14, %v226_v17  ;;  %v224_v24 = vmul.f32 %v500_v11, %v201_v18  ;;  %v204_v25 = vmax.f32 %v412_v22, 0.0  ;;  %v257_v27 = vadd.f32 %v505_v14, %v234_v20 }
  0xcc   :  { %v232_v28 = vmul.f32 %v500_v11, %v209_v21  ;;  %v212_v29 = vmax.f32 %v420_v26, 0.0  ;;  %v141_v30 = vpop.f32.mrf.mxu0  ;;  %v173_v35 = vpop.f32.mrf.mxu1 }
  0xcd   :  { %v384_v31 = vpack.c.bf16 %v249_v23, %v249_v23  ;;  %v247_v32 = vadd.f32 %v505_v14, %v224_v24  ;;  %v227_v33 = vmul.f32 %v500_v11, %v204_v25  ;;  %v202_v34 = vmax.f32 %v141_v30, 0.0 }
  0xce   :  { %v392_v36 = vpack.c.bf16 %v257_v27, %v257_v27  ;;  %v255_v37 = vadd.f32 %v505_v14, %v232_v28  ;;  %v235_v38 = vmul.f32 %v500_v11, %v212_v29  ;;  %v210_v39 = vmax.f32 %v173_v35, 0.0  ;;  %v415_v40 = vpop.f32.mrf.mxu0  ;;  %v423_v45 = vpop.f32.mrf.mxu1 }
  0xcf   :  { %330 = vst.msk [vmem:[%s607_s4 + $0x8] sm:$0xf] %vm327_vm2, %v384_v31  ;;  %v382_v41 = vpack.c.bf16 %v247_v32, %v247_v32  ;;  %v250_v42 = vadd.f32 %v505_v14, %v227_v33  ;;  %v225_v43 = vmul.f32 %v500_v11, %v202_v34  ;;  %v207_v44 = vmax.f32 %v415_v40, 0.0 }
  0xd0   :  { %338 = vst.msk [vmem:[%s607_s4 + $0x28] sm:$0xf] %vm327_vm2, %v392_v36  ;;  %v390_v46 = vpack.c.bf16 %v255_v37, %v255_v37  ;;  %v258_v47 = vadd.f32 %v505_v14, %v235_v38  ;;  %v233_v48 = vmul.f32 %v500_v11, %v210_v39  ;;  %v215_v49 = vmax.f32 %v423_v45, 0.0  ;;  %v154_v50 = vpop.f32.mrf.mxu0  ;;  %v186_v55 = vpop.f32.mrf.mxu1 }
  0xd1   :  { %328 = vst.msk [vmem:[%s607_s4] sm:$0xf] %vm327_vm2, %v382_v41  ;;  %v385_v51 = vpack.c.bf16 %v250_v42, %v250_v42  ;;  %v248_v52 = vadd.f32 %v505_v14, %v225_v43  ;;  %v230_v53 = vmul.f32 %v500_v11, %v207_v44  ;;  %v205_v54 = vmax.f32 %v154_v50, 0.0 }
  0xd2   :  { %336 = vst.msk [vmem:[%s607_s4 + $0x20] sm:$0xf] %vm327_vm2, %v390_v46  ;;  %v393_v56 = vpack.c.bf16 %v258_v47, %v258_v47  ;;  %v256_v57 = vadd.f32 %v505_v14, %v233_v48  ;;  %v238_v58 = vmul.f32 %v500_v11, %v215_v49  ;;  %v213_v59 = vmax.f32 %v186_v55, 0.0  ;;  %v416_v60 = vpop.f32.mrf.mxu0  ;;  %v424_v1 = vpop.f32.mrf.mxu1 }
  0xd3   :  { %331 = vst.msk [vmem:[%s607_s4 + $0xc] sm:$0xf] %vm327_vm2, %v385_v51  ;;  %v383_v61 = vpack.c.bf16 %v248_v52, %v248_v52  ;;  %v253_v62 = vadd.f32 %v505_v14, %v230_v53  ;;  %v228_v63 = vmul.f32 %v500_v11, %v205_v54  ;;  %v208_v0 = vmax.f32 %v416_v60, 0.0 }
  0xd4   :  { %339 = vst.msk [vmem:[%s607_s4 + $0x2c] sm:$0xf] %vm327_vm2, %v393_v56  ;;  %v391_v2 = vpack.c.bf16 %v256_v57, %v256_v57  ;;  %v261_v3 = vadd.f32 %v505_v14, %v238_v58  ;;  %v236_v4 = vmul.f32 %v500_v11, %v213_v59  ;;  %v216_v5 = vmax.f32 %v424_v1, 0.0  ;;  %v157_v6 = vpop.f32.mrf.mxu0  ;;  %v189_v12 = vpop.f32.mrf.mxu1 }
  0xd5   :  { %329 = vst.msk [vmem:[%s607_s4 + $0x4] sm:$0xf] %vm327_vm2, %v383_v61  ;;  %v388_v7 = vpack.c.bf16 %v253_v62, %v253_v62  ;;  %v251_v8 = vadd.f32 %v505_v14, %v228_v63  ;;  %v231_v9 = vmul.f32 %v500_v11, %v208_v0  ;;  %v206_v10 = vmax.f32 %v157_v6, 0.0 }
  0xd6   :  { %337 = vst.msk [vmem:[%s607_s4 + $0x24] sm:$0xf] %vm327_vm2, %v391_v2  ;;  %v396_v13 = vpack.c.bf16 %v261_v3, %v261_v3  ;;  %v259_v15 = vadd.f32 %v505_v14, %v236_v4  ;;  %v239_v16 = vmul.f32 %v500_v11, %v216_v5  ;;  %v214_v17 = vmax.f32 %v189_v12, 0.0 }
  0xd7   :  { %334 = vst.msk [vmem:[%s607_s4 + $0x18] sm:$0xf] %vm327_vm2, %v388_v7  ;;  %v386_v18 = vpack.c.bf16 %v251_v8, %v251_v8  ;;  %v254_v19 = vadd.f32 %v505_v14, %v231_v9  ;;  %v229_v20 = vmul.f32 %v500_v11, %v206_v10 }
  0xd8   :  { %342 = vst.msk [vmem:[%s607_s4 + $0x38] sm:$0xf] %vm327_vm2, %v396_v13  ;;  %v394_v21 = vpack.c.bf16 %v259_v15, %v259_v15  ;;  %v262_v22 = vadd.f32 %v505_v14, %v239_v16  ;;  %v237_v23 = vmul.f32 %v500_v11, %v214_v17 }
  0xd9   :  { %332 = vst.msk [vmem:[%s607_s4 + $0x10] sm:$0xf] %vm327_vm2, %v386_v18  ;;  %v389_v24 = vpack.c.bf16 %v254_v19, %v254_v19  ;;  %v252_v25 = vadd.f32 %v505_v14, %v229_v20 }
  0xda   :  { %340 = vst.msk [vmem:[%s607_s4 + $0x30] sm:$0xf] %vm327_vm2, %v394_v21  ;;  %v397_v26 = vpack.c.bf16 %v262_v22, %v262_v22  ;;  %v260_v27 = vadd.f32 %v505_v14, %v237_v23 }
  0xdb   :  { %335 = vst.msk [vmem:[%s607_s4 + $0x1c] sm:$0xf] %vm327_vm2, %v389_v24  ;;  %v387_v11 = vpack.c.bf16 %v252_v25, %v252_v25 }
  0xdc   :  { %343 = vst.msk [vmem:[%s607_s4 + $0x3c] sm:$0xf] %vm327_vm2, %v397_v26  ;;  %v395_v28 = vpack.c.bf16 %v260_v27, %v260_v27 }
  0xdd   :  { %333 = vst.msk [vmem:[%s607_s4 + $0x14] sm:$0xf] %vm327_vm2, %v387_v11 }
  0xde   :  { %341 = vst.msk [vmem:[%s607_s4 + $0x34] sm:$0xf] %vm327_vm2, %v395_v28 }

// kernel: residual_axial_attention_block.7
= control target key start
LH: loop header
LB: loop body
LE: loop exit
PB: predicated region body
PF: predicated region fallthrough
CT: control target
= control target key end

     0   :  { %vm103_vm0 = vcmask 1041408   ;;  %vm78_vm1 = vcmask 31744   ;;  %vm314_vm2 = vcmask 64512   ;;  %s672_s1 = inlined_call_operand.vmem [shape: bf16[4,8], index: 1, kind: input, shape index: {}]   ;;  %s673_s0 = inlined_call_operand.vmem [shape: bf16[128,4], index: 0, kind: input, shape index: {}]   ;;  %s674_s4 = inlined_call_operand.vmem [shape: bf16[128,8], index: 4, kind: input, shape index: {}]   ;;  %s675_s2 = inlined_call_operand.vmem [shape: f32[1,8], index: 2, kind: input, shape index: {}]   ;;  %s676_s3 = inlined_call_operand.vmem [shape: f32[1,8], index: 3, kind: input, shape index: {}]   ;;  %s677_s5 = inlined_call_operand.vmem [shape: f32[128,8], index: 5, kind: output, shape index: {}]  }
   0x1   :  { %v37_v0 = vld [vmem:[%s672_s1] sm:$0x3]  ;;  %v425_v4 = vld [vmem:[%s673_s0 + $0x8] sm:$0xff]   ;;  %v427_v6 = vld [vmem:[%s673_s0 + $0x10] sm:$0xff]  }
   0x2   :  { %421 = vmatprep.subr.msk.bf16.mxu0 %vm103_vm0, %v37_v0  ;;  %422 = vmatprep.subr.msk.bf16.mxu1 %vm103_vm0, %v37_v0  ;;  %v105_v1 = vsel %vm103_vm0, %v37_v0, 0  ;;  %v423_v2 = vld [vmem:[%s673_s0] sm:$0xff]   ;;  %v426_v5 = vld [vmem:[%s673_s0 + $0x28] sm:$0xff]   ;;  %v428_v7 = vld [vmem:[%s673_s0 + $0x30] sm:$0xff]  }
   0x3   :  { %402 = vmatpush3.bf16.msra.mxu0 %v105_v1  ;;  %420 = vmatpush3.bf16.msra.mxu1 %v105_v1  ;;  %v424_v3 = vld [vmem:[%s673_s0 + $0x20] sm:$0xff]   ;;  %v429_v8 = vld [vmem:[%s673_s0 + $0x18] sm:$0xff]   ;;  %v499_v10 = vld [vmem:[%s674_s4 + $0x8] sm:$0xff]  }
   0x4   :  { %403 = vmatprep.mubr.msk.bf16.mxu0 %vm78_vm1, %v423_v2  ;;  %411 = vmatprep.mubr.msk.bf16.mxu1 %vm78_vm1, %v424_v3  ;;  %v430_v9 = vld [vmem:[%s673_s0 + $0x38] sm:$0xff]   ;;  %v504_v11 = vld [vmem:[%s674_s4 + $0x28] sm:$0xff]   ;;  %v509_v12 = vld [vmem:[%s674_s4] sm:$0xff]   ;;  %v359_v16 = vunpack.c.l.bf16 %v499_v10  ;;  %v360_v24 = vunpack.c.h.bf16 %v499_v10 }
   0x5   :  { %v514_v13 = vld [vmem:[%s674_s4 + $0x20] sm:$0xff]   ;;  %v375_v17 = vunpack.c.l.bf16 %v504_v11  ;;  %v526_v18 = vld [vmem:[%s674_s4 + $0x18] sm:$0xff]   ;;  %v355_v22 = vunpack.c.l.bf16 %v509_v12  ;;  %v539_v25 = vld [vmem:[%s674_s4 + $0x10] sm:$0xff]   ;;  %v376_v30 = vunpack.c.h.bf16 %v504_v11  ;;  %v356_v31 = vunpack.c.h.bf16 %v509_v12 }
   0x6   :  { %404 = vmatmul.mubr.msk.bf16.vlgmr.msra.gmra.mxu0 %vm78_vm1, %v425_v4  ;;  %412 = vmatmul.mubr.msk.bf16.vlgmr.msra.gmra.mxu1 %vm78_vm1, %v426_v5  ;;  %v519_v15 = vld [vmem:[%s675_s2] ss:$0 sm:$0xff]  ;;  %v531_v19 = vld [vmem:[%s674_s4 + $0x38] sm:$0xff]   ;;  %v371_v23 = vunpack.c.l.bf16 %v514_v13  ;;  %v544_v26 = vld [vmem:[%s674_s4 + $0x30] sm:$0xff]   ;;  %v372_v32 = vunpack.c.h.bf16 %v514_v13  ;;  %v367_v36 = vunpack.c.l.bf16 %v526_v18  ;;  %v363_v41 = vunpack.c.l.bf16 %v539_v25 }
   0x7   :  { %407 = vmatprep.mubr.msk.bf16.mxu0 %vm78_vm1, %v427_v6  ;;  %415 = vmatprep.mubr.msk.bf16.mxu1 %vm78_vm1, %v428_v7  ;;  %v549_v27 = vld [vmem:[%s676_s3] ss:$0 sm:$0xff]  ;;  %v383_v37 = vunpack.c.l.bf16 %v531_v19  ;;  %v379_v42 = vunpack.c.l.bf16 %v544_v26  ;;  %v368_v47 = vunpack.c.h.bf16 %v526_v18  ;;  %v384_v52 = vunpack.c.h.bf16 %v531_v19 }
   0xe   :  { %408 = vmatmul.mubr.msk.bf16.gmra.mxu0 %vm78_vm1, %v429_v8  ;;  %416 = vmatmul.mubr.msk.bf16.gmra.mxu1 %vm78_vm1, %v430_v9 }
  0xc6   :  { %v405_v14 = vpop.f32.mrf.mxu0  ;;  %v413_v21 = vpop.f32.mrf.mxu1 }
  0xc7   :  { %v206_v20 = vmax.f32 %v405_v14, 0.0  ;;  %v214_v28 = vmax.f32 %v413_v21, 0.0 }
  0xc8   :  { %v141_v29 = vpop.f32.mrf.mxu0  ;;  %v173_v35 = vpop.f32.mrf.mxu1 }
  0xc9   :  { %v229_v33 = vmul.f32 %v519_v15, %v206_v20  ;;  %v204_v34 = vmax.f32 %v141_v29, 0.0  ;;  %v237_v38 = vmul.f32 %v519_v15, %v214_v28  ;;  %v212_v39 = vmax.f32 %v173_v35, 0.0 }
  0xca   :  { %v406_v40 = vpop.f32.mrf.mxu0  ;;  %v414_v46 = vpop.f32.mrf.mxu1 }
  0xcb   :  { %v252_v43 = vadd.f32 %v549_v27, %v229_v33  ;;  %v227_v44 = vmul.f32 %v519_v15, %v204_v34  ;;  %v207_v45 = vmax.f32 %v406_v40, 0.0  ;;  %v260_v48 = vadd.f32 %v549_v27, %v237_v38 }
  0xcc   :  { %v235_v49 = vmul.f32 %v519_v15, %v212_v39  ;;  %v215_v50 = vmax.f32 %v414_v46, 0.0  ;;  %v144_v51 = vpop.f32.mrf.mxu0  ;;  %v176_v57 = vpop.f32.mrf.mxu1 }
  0xcd   :  { %v300_v53 = vadd.f32 %v359_v16, %v252_v43  ;;  %v250_v54 = vadd.f32 %v549_v27, %v227_v44  ;;  %v230_v55 = vmul.f32 %v519_v15, %v207_v45  ;;  %v205_v56 = vmax.f32 %v144_v51, 0.0 }
  0xce   :  { %v308_v58 = vadd.f32 %v375_v17, %v260_v48  ;;  %v258_v59 = vadd.f32 %v549_v27, %v235_v49  ;;  %v238_v60 = vmul.f32 %v519_v15, %v215_v50  ;;  %v213_v61 = vmax.f32 %v176_v57, 0.0  ;;  %v409_v62 = vpop.f32.mrf.mxu0  ;;  %v417_v3 = vpop.f32.mrf.mxu1 }
  0xcf   :  { %317 = vst.msk [vmem:[%s677_s5 + $0x10] sm:$0xff] %vm314_vm2, %v300_v53  ;;  %v298_v63 = vadd.f32 %v355_v22, %v250_v54  ;;  %v253_v0 = vadd.f32 %v549_v27, %v230_v55  ;;  %v228_v1 = vmul.f32 %v519_v15, %v205_v56  ;;  %v210_v2 = vmax.f32 %v409_v62, 0.0 }
  0xd0   :  { %325 = vst.msk [vmem:[%s677_s5 + $0x50] sm:$0xff] %vm314_vm2, %v308_v58  ;;  %v306_v4 = vadd.f32 %v371_v23, %v258_v59  ;;  %v261_v5 = vadd.f32 %v549_v27, %v238_v60  ;;  %v236_v6 = vmul.f32 %v519_v15, %v213_v61  ;;  %v218_v7 = vmax.f32 %v417_v3, 0.0  ;;  %v157_v8 = vpop.f32.mrf.mxu0  ;;  %v189_v14 = vpop.f32.mrf.mxu1 }
  0xd1   :  { %315 = vst.msk [vmem:[%s677_s5] sm:$0xff] %vm314_vm2, %v298_v63  ;;  %v301_v9 = vadd.f32 %v360_v24, %v253_v0  ;;  %v251_v10 = vadd.f32 %v549_v27, %v228_v1  ;;  %v233_v11 = vmul.f32 %v519_v15, %v210_v2  ;;  %v208_v12 = vmax.f32 %v157_v8, 0.0 }
  0xd2   :  { %323 = vst.msk [vmem:[%s677_s5 + $0x40] sm:$0xff] %vm314_vm2, %v306_v4  ;;  %v309_v16 = vadd.f32 %v376_v30, %v261_v5  ;;  %v259_v17 = vadd.f32 %v549_v27, %v236_v6  ;;  %v241_v20 = vmul.f32 %v519_v15, %v218_v7  ;;  %v216_v21 = vmax.f32 %v189_v14, 0.0  ;;  %v410_v22 = vpop.f32.mrf.mxu0  ;;  %v418_v33 = vpop.f32.mrf.mxu1 }
  0xd3   :  { %318 = vst.msk [vmem:[%s677_s5 + $0x18] sm:$0xff] %vm314_vm2, %v301_v9  ;;  %v299_v23 = vadd.f32 %v356_v31, %v251_v10  ;;  %v256_v24 = vadd.f32 %v549_v27, %v233_v11  ;;  %v231_v28 = vmul.f32 %v519_v15, %v208_v12  ;;  %v211_v29 = vmax.f32 %v410_v22, 0.0 }
  0xd4   :  { %326 = vst.msk [vmem:[%s677_s5 + $0x58] sm:$0xff] %vm314_vm2, %v309_v16  ;;  %v307_v30 = vadd.f32 %v372_v32, %v259_v17  ;;  %v264_v34 = vadd.f32 %v549_v27, %v241_v20  ;;  %v239_v35 = vmul.f32 %v519_v15, %v216_v21  ;;  %v219_v38 = vmax.f32 %v418_v33, 0.0  ;;  %v160_v31 = vpop.f32.mrf.mxu0  ;;  %v192_v32 = vpop.f32.mrf.mxu1 }
  0xd5   :  { %316 = vst.msk [vmem:[%s677_s5 + $0x8] sm:$0xff] %vm314_vm2, %v299_v23  ;;  %v304_v39 = vadd.f32 %v367_v36, %v256_v24  ;;  %v254_v40 = vadd.f32 %v549_v27, %v231_v28  ;;  %v234_v43 = vmul.f32 %v519_v15, %v211_v29  ;;  %v209_v13 = vmax.f32 %v160_v31, 0.0 }
  0xd6   :  { %324 = vst.msk [vmem:[%s677_s5 + $0x48] sm:$0xff] %vm314_vm2, %v307_v30  ;;  %v312_v44 = vadd.f32 %v383_v37, %v264_v34  ;;  %v262_v45 = vadd.f32 %v549_v27, %v239_v35  ;;  %v242_v46 = vmul.f32 %v519_v15, %v219_v38  ;;  %v217_v48 = vmax.f32 %v192_v32, 0.0 }
  0xd7   :  { %321 = vst.msk [vmem:[%s677_s5 + $0x30] sm:$0xff] %vm314_vm2, %v304_v39  ;;  %v302_v36 = vadd.f32 %v363_v41, %v254_v40  ;;  %v257_v49 = vadd.f32 %v549_v27, %v234_v43  ;;  %v232_v50 = vmul.f32 %v519_v15, %v209_v13  ;;  %v364_v51 = vunpack.c.h.bf16 %v539_v25 }
  0xd8   :  { %329 = vst.msk [vmem:[%s677_s5 + $0x70] sm:$0xff] %vm314_vm2, %v312_v44  ;;  %v310_v37 = vadd.f32 %v379_v42, %v262_v45  ;;  %v265_v53 = vadd.f32 %v549_v27, %v242_v46  ;;  %v240_v54 = vmul.f32 %v519_v15, %v217_v48  ;;  %v380_v41 = vunpack.c.h.bf16 %v544_v26 }
  0xd9   :  { %319 = vst.msk [vmem:[%s677_s5 + $0x20] sm:$0xff] %vm314_vm2, %v302_v36  ;;  %v305_v25 = vadd.f32 %v368_v47, %v257_v49  ;;  %v255_v55 = vadd.f32 %v549_v27, %v232_v50 }
  0xda   :  { %327 = vst.msk [vmem:[%s677_s5 + $0x60] sm:$0xff] %vm314_vm2, %v310_v37  ;;  %v313_v15 = vadd.f32 %v384_v52, %v265_v53  ;;  %v263_v26 = vadd.f32 %v549_v27, %v240_v54 }
  0xdb   :  { %322 = vst.msk [vmem:[%s677_s5 + $0x38] sm:$0xff] %vm314_vm2, %v305_v25  ;;  %v303_v42 = vadd.f32 %v364_v51, %v255_v55 }
  0xdc   :  { %330 = vst.msk [vmem:[%s677_s5 + $0x78] sm:$0xff] %vm314_vm2, %v313_v15  ;;  %v311_v18 = vadd.f32 %v380_v41, %v263_v26 }
  0xdd   :  { %320 = vst.msk [vmem:[%s677_s5 + $0x28] sm:$0xff] %vm314_vm2, %v303_v42 }
  0xde   :  { %328 = vst.msk [vmem:[%s677_s5 + $0x68] sm:$0xff] %vm314_vm2, %v311_v18 }

// kernel: residual_axial_attention_block.6
= control target key start
LH: loop header
LB: loop body
LE: loop exit
PB: predicated region body
PF: predicated region fallthrough
CT: control target
= control target key end

     0   :  { %s2817_s15 = smov 0   ;;  %s3312_s0 = inlined_call_operand.vmem [shape: bf16[16,8,4], index: 0, kind: input, shape index: {}]   ;;  %s3313_s1 = inlined_call_operand.vmem [shape: f32[8,4], index: 1, kind: input, shape index: {}]   ;;  %s3314_s2 = inlined_call_operand.vmem [shape: bf16[4,12], index: 2, kind: input, shape index: {}]   ;;  %s3315_s3 = inlined_call_operand.vmem [shape: bf16[4,4], index: 3, kind: input, shape index: {}]   ;;  %s3316_s4 = inlined_call_operand.vmem [shape: bf16[16,8,4], index: 4, kind: output, shape index: {}]  }
   0x1 LB: > { %s2307_s16 = sadd.s32 4294967295, %s2782_s15   ;;  %p2311_p0 = scmp.ge.s32.totalorder %s2782_s15, 1  ;;  %s2782_s15 = sphi %s2817_s15, %s14_s15  }
   0x2   : > { %p163_p1 = scmp.lt.s32.totalorder %s2782_s15, 3 }
   0x4   : > { %p164_p2 = pnand %p2311_p0, %p163_p1 }
   0x5   : > { %s2312_s19 = sshll.u32 (!%p164_p2), %s2307_s16, 3  ;;  %s2786_s26 = smov (!%p164_p2), 124  }
   0x6   : > { %167 = sbr.rel (%p164_p2) target bundleno = 2029 (0x7ed), region = 36  ;;  %p190_p3 = scmp.lt.s32.totalorder (!%p164_p2), %s2312_s19, 15 }
   0x7   : > { %s2787_s27 = smov (!%p164_p2), 120   ;;  %s2788_s28 = smov (!%p164_p2), 122  }
   0x8   : > { %s2789_s29 = smov (!%p164_p2), 126   ;;  %s2790_s30 = smov (!%p164_p2), 118  }
   0x9   : > { %s2791_s7 = smov (!%p164_p2), 2  }
   0xb   : > { %v211_v0 = vld [vmem:[%s3314_s2] sm:$0x3]  ;;  %vm270_vm0 = vcmask 1041408   ;;  %s3318_s19 = smov (!%p190_p3, %s2312_s19), 15  ;;  %vm257_vm1 = vcmask 31744   ;;  %v2784_v27 = vmov 0.0  }
   0xc   : > { %2673 = vmatprep.subr.msk.bf16.mxu0 %vm270_vm0, %v211_v0  ;;  %v272_v1 = vsel %vm270_vm0, %v211_v0, 0  ;;  %2674 = vmatprep.subr.msk.bf16.mxu1 %vm270_vm0, %v211_v0  ;;  %s2313_s20 = sshll.u32 %s3318_s19, 2  ;;  %v210_v2 = vld [vmem:[%s3313_s1] sm:$0xff]  ;;  %vm2785_vm2 = vmmov 0   ;;  %vm350_vm3 = vcmask 15360   ;;  %vm842_vm4 = vcmask 1043456  }
   0xd   : > { %2460 = vmatpush3.bf16.msra.mxu0 %v272_v1  ;;  %2672 = vmatpush3.bf16.msra.mxu1 %v272_v1  ;;  %s193_s23 = scalar_lea.vmem %s3312_s0, %s2313_s20  ;;  %vm740_vm5 = vcmask 64512   ;;  %s3277_s10 = scalar_lea.vmem %s3316_s4, %s2313_s20  ;;  %vm2242_vm6 = vcmask 27648  }
   0xe   : > { %v2842_v3 = vld [vmem:[%s193_s23] sm:$0xff]   ;;  %v2844_v4 = vld [vmem:[%s193_s23 + $0x8] sm:$0xff]   ;;  %v2846_v5 = vld [vmem:[%s193_s23 + $0x10] sm:$0xff]   ;;  %2481 = vmatprep.subr.bf16.mxu0 %v2784_v27  ;;  %2469 = vmatprep.subr.bf16.mxu1 %v2784_v27 }
   0xf   : > { %v2368_v6 = vunpack.c.l.bf16 %v2842_v3  ;;  %v2369_v7 = vunpack.c.h.bf16 %v2842_v3  ;;  %v2372_v8 = vunpack.c.l.bf16 %v2844_v4  ;;  %v2373_v9 = vunpack.c.h.bf16 %v2844_v4  ;;  %v2852_v10 = vld [vmem:[%s193_s23 + $0x18] sm:$0xff]  }
  0x10   : > { %v2376_v11 = vunpack.c.l.bf16 %v2846_v5  ;;  %v2377_v12 = vunpack.c.h.bf16 %v2846_v5  ;;  %v2380_v13 = vunpack.c.l.bf16 %v2852_v10  ;;  %v2381_v14 = vunpack.c.h.bf16 %v2852_v10 }
  0x11   : > { %v221_v15 = vadd.f32 %v2368_v6, %v210_v2  ;;  %v222_v16 = vadd.f32 %v2369_v7, %v210_v2  ;;  %v223_v17 = vadd.f32 %v2372_v8, %v210_v2  ;;  %v224_v18 = vadd.f32 %v2373_v9, %v210_v2 }
  0x12   : > { %v225_v19 = vadd.f32 %v2376_v11, %v210_v2  ;;  %v226_v20 = vadd.f32 %v2377_v12, %v210_v2  ;;  %v227_v21 = vadd.f32 %v2380_v13, %v210_v2  ;;  %v228_v22 = vadd.f32 %v2381_v14, %v210_v2 }
  0x13   : > { %v2362_v23 = vpack.c.bf16 %v222_v16, %v221_v15  ;;  %v2363_v24 = vpack.c.bf16 %v224_v18, %v223_v17 }
  0x14   : > { %v2364_v25 = vpack.c.bf16 %v226_v20, %v225_v19  ;;  %v2365_v26 = vpack.c.bf16 %v228_v22, %v227_v21 }
  0x15   : > { %2461 = vmatprep.mubr.msk.bf16.mxu0 %vm257_vm1, %v2362_v23 }
  0x16   : > { %2462 = vmatmul.mubr.msk.bf16.vlgmr.msra.gmra.mxu0 %vm257_vm1, %v2363_v24  ;;  %2465 = vmatprep.mubr.msk.bf16.mxu1 %vm257_vm1, %v2364_v25 }
  0x17   : > { %2466 = vmatmul.mubr.msk.bf16.vlgmr.msra.gmra.mxu1 %vm257_vm1, %v2365_v26  ;;  %2483 = vmatprep.mubr.msk.bf16.mxu0 %vm2785_vm2, %v2784_v27 }
  0x18   : > { %2471 = vmatprep.mubr.msk.bf16.mxu1 %vm2785_vm2, %v2784_v27 }
  0xd6   : > { %v2463_v28 = vpop.f32.mrf.mxu0 }
  0xd7   : > { %v2884_v29 = vpack.c.bf16 %v2463_v28, %v2463_v28  ;;  %v2467_v30 = vpop.f32.mrf.mxu1 }
  0xd8   : > { %v308_v31 = vpop.f32.mrf.mxu0  ;;  %v2904_v43 = vpack.c.bf16 %v2467_v30, %v2467_v30 }
  0xd9   : > { %v2886_v32 = vpack.c.bf16 %v308_v31, %v308_v31  ;;  %447 = vrot.lane.b32.xlu1 %v2884_v29, %s2786_s26  ;;  %v324_v33 = vpop.f32.mrf.mxu1 }
  0xda   : > { %v2464_v34 = vpop.f32.mrf.mxu0  ;;  %v2897_v41 = vpack.c.bf16 %v324_v33, %v324_v33 }
  0xdb   : > { %v2889_v35 = vpack.c.bf16 %v2464_v34, %v2464_v34  ;;  %348 = vrot.lane.b32.xlu0 %v2886_v32, %s2786_s26  ;;  %v2468_v36 = vpop.f32.mrf.mxu1 }
  0xdc   : > { %v311_v37 = vpop.f32.mrf.mxu0  ;;  %v2900_v42 = vpack.c.bf16 %v2468_v36, %v2468_v36 }
  0xdd   : > { %v2892_v38 = vpack.c.bf16 %v311_v37, %v311_v37  ;;  %496 = vrot.lane.b32.xlu1 %v2889_v35, %s2786_s26  ;;  %v327_v39 = vpop.f32.mrf.mxu1 }
  0xde   : > { %v2895_v40 = vpack.c.bf16 %v327_v39, %v327_v39 }
  0xdf   : > { %398 = vrot.lane.b32.xlu0 %v2892_v38, %s2786_s26 }
  0xe1   : > { %594 = vrot.lane.b32.xlu1 %v2895_v40, %s2786_s26 }
  0xe3   : > { %545 = vrot.lane.b32.xlu0 %v2897_v41, %s2786_s26 }
  0xe5   : > { %692 = vrot.lane.b32.xlu1 %v2900_v42, %s2786_s26 }
  0xe7   : > { %643 = vrot.lane.b32.xlu0 %v2904_v43, %s2786_s26 }
  0xe9   : > { %837 = vrot.lane.b32.xlu1 %v2886_v32, %s2787_s27 }
  0xeb   : > { %886 = vrot.lane.b32.xlu0 %v2892_v38, %s2787_s27 }
  0xed   : > { %934 = vrot.lane.b32.xlu1 %v2884_v29, %s2787_s27 }
 0x14b   : > { %v448_v44 = vpop.permute.xlu1 %447 }
 0x14c   : > { %v453_v45 = vsel %vm350_vm3, %v448_v44, 0 }
 0x14d   : > { %2482 = vmatpush3.bf16.xpose.msra.mxu0 %v453_v45  ;;  %v349_v46 = vpop.permute.xlu0 %348 }
 0x14e   : > { %v355_v47 = vsel %vm350_vm3, %v349_v46, 0  ;;  %2493 = vmatprep.subr.bf16.mxu0 %v2784_v27 }
 0x14f   : > { %2470 = vmatpush3.bf16.xpose.msra.mxu1 %v355_v47  ;;  %v497_v48 = vpop.permute.xlu1 %496 }
 0x150   : > { %2475 = vmatprep.subr.bf16.mxu1 %v2784_v27  ;;  %v502_v56 = vsel %vm350_vm3, %v497_v48, 0 }
 0x151   : > { %v399_v49 = vpop.permute.xlu0 %398 }
 0x152   : > { %v404_v51 = vsel %vm350_vm3, %v399_v49, 0 }
 0x153   : > { %v595_v53 = vpop.permute.xlu1 %594 }
 0x154   : > { %2484 = vmatmul.mubr.msk.bf16.vlgmr.msra.gmra.mxu0 %vm350_vm3, %v2884_v29  ;;  %v600_v59 = vsel %vm350_vm3, %v595_v53, 0 }
 0x155   : > { %v546_v50 = vpop.permute.xlu0 %545  ;;  %2495 = vmatprep.mubr.msk.bf16.mxu0 %vm2785_vm2, %v2784_v27 }
 0x156   : > { %v551_v52 = vsel %vm350_vm3, %v546_v50, 0  ;;  %2472 = vmatmul.mubr.msk.bf16.vlgmr.msra.gmra.mxu1 %vm350_vm3, %v2886_v32 }
 0x157   : > { %2476 = vmatpush3.bf16.xpose.msra.mxu1 %v404_v51  ;;  %2494 = vmatpush3.bf16.xpose.msra.mxu0 %v551_v52  ;;  %v693_v55 = vpop.permute.xlu1 %692 }
 0x158   : > { %2477 = vmatprep.mubr.msk.bf16.mxu1 %vm2785_vm2, %v2784_v27  ;;  %2487 = vmatprep.subr.bf16.mxu1 %v2784_v27  ;;  %v698_v61 = vsel %vm350_vm3, %v693_v55, 0 }
 0x159   : > { %2505 = vmatprep.subr.bf16.mxu0 %v2784_v27  ;;  %v644_v54 = vpop.permute.xlu0 %643 }
 0x15a   : > { %v649_v57 = vsel %vm350_vm3, %v644_v54, 0 }
 0x15b   : > { %v838_v58 = vpop.permute.xlu1 %837 }
 0x15c   : > { %v844_v60 = vsel %vm842_vm4, %v838_v58, 0 }
 0x15d   : > { %v887_v62 = vpop.permute.xlu0 %886 }
 0x15e   : > { %2478 = vmatmul.mubr.msk.bf16.vlgmr.msra.gmra.mxu1 %vm350_vm3, %v2892_v38  ;;  %2496 = vmatmul.mubr.msk.bf16.vlgmr.msra.gmra.mxu0 %vm350_vm3, %v2897_v41  ;;  %v892_v63 = vsel %vm842_vm4, %v887_v62, 0 }
 0x15f   : > { %2488 = vmatpush3.bf16.xpose.msra.mxu1 %v502_v56  ;;  %2506 = vmatpush3.bf16.xpose.msra.mxu0 %v649_v57 }
 0x160   : > { %2489 = vmatprep.mubr.msk.bf16.mxu1 %vm2785_vm2, %v2784_v27  ;;  %2507 = vmatprep.mubr.msk.bf16.mxu0 %vm2785_vm2, %v2784_v27 }
 0x161   : > { %2499 = vmatprep.subr.bf16.mxu1 %v2784_v27  ;;  %2517 = vmatprep.subr.bf16.mxu0 %v2784_v27 }
 0x166   : > { %2490 = vmatmul.mubr.msk.bf16.vlgmr.msra.gmra.mxu1 %vm350_vm3, %v2889_v35  ;;  %2508 = vmatmul.mubr.msk.bf16.vlgmr.msra.gmra.mxu0 %vm350_vm3, %v2904_v43 }
 0x167   : > { %2500 = vmatpush3.bf16.xpose.msra.mxu1 %v600_v59  ;;  %2518 = vmatpush3.bf16.msra.mxu0 %v844_v60 }
 0x168   : > { %2501 = vmatprep.mubr.msk.bf16.mxu1 %vm2785_vm2, %v2784_v27  ;;  %2511 = vmatprep.subr.bf16.mxu1 %v2784_v27 }
 0x169   : > { %2519 = vmatprep.mubr.msk.bf16.mxu0 %vm2785_vm2, %v2784_v27  ;;  %2529 = vmatprep.subr.bf16.mxu0 %v2784_v27 }
 0x16e   : > { %2502 = vmatmul.mubr.msk.bf16.vlgmr.msra.gmra.mxu1 %vm350_vm3, %v2895_v40 }
 0x16f   : > { %2512 = vmatpush3.bf16.xpose.msra.mxu1 %v698_v61  ;;  %2513 = vmatprep.mubr.msk.bf16.mxu1 %vm2785_vm2, %v2784_v27 }
 0x170   : > { %2523 = vmatprep.subr.bf16.mxu1 %v2784_v27 }
 0x176   : > { %2514 = vmatmul.mubr.msk.bf16.vlgmr.msra.gmra.mxu1 %vm350_vm3, %v2900_v42 }
 0x177   : > { %2524 = vmatpush3.bf16.msra.mxu1 %v892_v63  ;;  %2525 = vmatprep.mubr.msk.bf16.mxu1 %vm2785_vm2, %v2784_v27 }
 0x178   : > { %2535 = vmatprep.subr.bf16.mxu1 %v2784_v27 }
 0x214   : > { %v489_v0 = vpop.f32.mrf.mxu0 }
 0x215   : > { %v747_v1 = vsel %vm740_vm5, %v489_v0, -inf }
 0x216   : > { %v391_v2 = vpop.f32.mrf.mxu1  ;;  %v2485_v15 = vpop.f32.mrf.mxu0  ;;  %748 = vmax.xlane.f32.xlu0 %v747_v1 }
 0x217   : > { %v741_v18 = vsel %vm740_vm5, %v391_v2, -inf }
 0x218   : > { %v2473_v16 = vpop.f32.mrf.mxu1  ;;  %v492_v17 = vpop.f32.mrf.mxu0 }
 0x219   : > { %v2984_v16 = vpop.permute.xlu1 %934 }
 0x21a   : > { %v394_v19 = vpop.f32.mrf.mxu1  ;;  %v2486_v20 = vpop.f32.mrf.mxu0  ;;  %742 = vmax.xlane.f32.xlu0 %v741_v18 }
 0x21c   : > { %v2474_v21 = vpop.f32.mrf.mxu1 }
 0x21e   : > { %v440_v22 = vpop.f32.mrf.mxu1  ;;  %v2968_v23 = vpop.f32.mrf.mxu0 }
 0x21f   : > { %v753_v24 = vsel %vm740_vm5, %v2968_v23, -inf  ;;  %v744_v31 = vsel %vm740_vm5, %v440_v22, -inf }
 0x220   : > { %v2479_v25 = vpop.f32.mrf.mxu1  ;;  %754 = vmax.xlane.f32.xlu1 %v753_v24  ;;  %v2497_v26 = vpop.f32.mrf.mxu0 }
 0x222   : > { %v443_v28 = vpop.f32.mrf.mxu1  ;;  %v590_v30 = vpop.f32.mrf.mxu0 }
 0x224   : > { %v2480_v33 = vpop.f32.mrf.mxu1  ;;  %745 = vmax.xlane.f32.xlu1 %v744_v31  ;;  %v2498_v34 = vpop.f32.mrf.mxu0 }
 0x226   : > { %v538_v36 = vpop.f32.mrf.mxu1  ;;  %v2973_v37 = vpop.f32.mrf.mxu0 }
 0x227   : > { %v750_v39 = vsel %vm740_vm5, %v538_v36, -inf  ;;  %v759_v44 = vsel %vm740_vm5, %v2973_v37, -inf }
 0x228   : > { %751 = vmax.xlane.f32.xlu0 %v750_v39  ;;  %v2491_v45 = vpop.f32.mrf.mxu1  ;;  %760 = vmax.xlane.f32.xlu1 %v759_v44  ;;  %v2509_v46 = vpop.f32.mrf.mxu0 }
 0x22a   : > { %v541_v47 = vpop.f32.mrf.mxu1  ;;  %v688_v48 = vpop.f32.mrf.mxu0 }
 0x22c   : > { %v2492_v49 = vpop.f32.mrf.mxu1  ;;  %v2510_v50 = vpop.f32.mrf.mxu0 }
 0x22e   : > { %v636_v51 = vpop.f32.mrf.mxu1 }
 0x22f   : > { %v756_v52 = vsel %vm740_vm5, %v636_v51, -inf }
 0x230   : > { %757 = vmax.xlane.f32.xlu0 %v756_v52  ;;  %v2503_v53 = vpop.f32.mrf.mxu1 }
 0x232   : > { %v639_v54 = vpop.f32.mrf.mxu1 }
 0x234   : > { %v2504_v55 = vpop.f32.mrf.mxu1 }
 0x236   : > { %v734_v56 = vpop.f32.mrf.mxu1 }
 0x237   : > { %v762_v57 = vsel %vm740_vm5, %v734_v56, -inf }
 0x238   : > { %763 = vmax.xlane.f32.xlu0 %v762_v57  ;;  %v2515_v58 = vpop.f32.mrf.mxu1 }
 0x239   : > { %982 = vrot.lane.b32.xlu1 %v2889_v35, %s2787_s27 }
 0x23a   : > { %v737_v59 = vpop.f32.mrf.mxu1 }
 0x23c   : > { %v2516_v60 = vpop.f32.mrf.mxu1 }
 0x24e   : > { %1030 = vrot.lane.b32.xlu0 %v2897_v41, %s2787_s27 }
 0x29f   : > { %v749_v61 = vpop.xlane.xlu0 %748 }
 0x2a0   : > { %v767_v62 = vsub.f32 %v489_v0, %v749_v61 }
 0x2a2   : > { %v777_v63 = vmul.f32 1.442695, %v767_v62 }
 0x2a3   : > { %v743_v1 = vpop.xlane.xlu0 %742 }
 0x2a4   : > { %2712 = vpow2.f32 %v777_v63  ;;  %v765_v15 = vsub.f32 %v391_v2, %v743_v1 }
 0x2a6   : > { %v773_v17 = vmul.f32 1.442695, %v765_v15 }
 0x2a8   : > { %2714 = vpow2.f32 %v773_v17 }
 0x2a9   : > { %v755_v18 = vpop.xlane.xlu1 %754 }
 0x2aa   : > { %v769_v47 = vsub.f32 %v2968_v23, %v755_v18 }
 0x2ac   : > { %v781_v49 = vmul.f32 1.442695, %v769_v47 }
 0x2ad   : > { %v746_v19 = vpop.xlane.xlu1 %745 }
 0x2ae   : > { %v766_v20 = vsub.f32 %v440_v22, %v746_v19  ;;  %v940_v19 = vsel %vm842_vm4, %v2984_v16, 0 }
 0x2b0   : > { %v775_v21 = vmul.f32 1.442695, %v766_v20 }
 0x2b1   : > { %v2986_v24 = vpop.eup %2712  ;;  %v752_v25 = vpop.xlane.xlu0 %751 }
 0x2b2   : > { %2716 = vpow2.f32 %v775_v21  ;;  %v768_v26 = vsub.f32 %v538_v36, %v752_v25  ;;  %v795_v0 = vsel %vm740_vm5, %v2986_v24, 0.0  ;;  %v761_v48 = vpop.xlane.xlu1 %760 }
 0x2b3   : > { %796 = vadd.xlane.f32.xlu1 %v795_v0  ;;  %v771_v50 = vsub.f32 %v2973_v37, %v761_v48 }
 0x2b4   : > { %v779_v28 = vmul.f32 1.442695, %v768_v26 }
 0x2b5   : > { %v2990_v30 = vpop.eup %2714 }
 0x2b6   : > { %v789_v2 = vsel %vm740_vm5, %v2990_v30, 0.0  ;;  %2718 = vpow2.f32 %v779_v28  ;;  %v983_v59 = vpop.permute.xlu1 %982 }
 0x2b7   : > { %790 = vadd.xlane.f32.xlu1 %v789_v2  ;;  %v988_v2 = vsel %vm842_vm4, %v983_v59, 0 }
 0x2b9   : > { %v758_v31 = vpop.xlane.xlu0 %757 }
 0x2ba   : > { %v770_v22 = vsub.f32 %v636_v51, %v758_v31  ;;  %v785_v51 = vmul.f32 1.442695, %v771_v50 }
 0x2bc   : > { %v783_v33 = vmul.f32 1.442695, %v770_v22 }
 0x2be   : > { %2720 = vpow2.f32 %v783_v33 }
 0x2bf   : > { %v2994_v34 = vpop.eup %2716  ;;  %2722 = vpow2.f32 %v781_v49 }
 0x2c0   : > { %v792_v36 = vsel %vm740_vm5, %v2994_v34, 0.0  ;;  %2724 = vpow2.f32 %v785_v51 }
 0x2c1   : > { %793 = vadd.xlane.f32.xlu0 %v792_v36  ;;  %v764_v52 = vpop.xlane.xlu0 %763 }
 0x2c2   : > { %v772_v54 = vsub.f32 %v734_v56, %v764_v52 }
 0x2c3   : > { %v2998_v39 = vpop.eup %2718 }
 0x2c4   : > { %v798_v44 = vsel %vm740_vm5, %v2998_v39, 0.0  ;;  %v787_v23 = vmul.f32 1.442695, %v772_v54 }
 0x2c5   : > { %799 = vadd.xlane.f32.xlu0 %v798_v44  ;;  %v1031_v62 = vpop.permute.xlu0 %1030 }
 0x2c6   : > { %2726 = vpow2.f32 %v787_v23  ;;  %v1036_v28 = vsel %vm842_vm4, %v1031_v62, 0 }
 0x2c8   : > { %1078 = vrot.lane.b32.xlu1 %v2895_v40, %s2787_s27 }
 0x2cb   : > { %v3004_v45 = vpop.eup %2720 }
 0x2cc   : > { %v804_v46 = vsel %vm740_vm5, %v3004_v45, 0.0  ;;  %v3012_v53 = vpop.eup %2722 }
 0x2cd   : > { %805 = vadd.xlane.f32.xlu0 %v804_v46  ;;  %v801_v55 = vsel %vm740_vm5, %v3012_v53, 0.0  ;;  %v3016_v57 = vpop.eup %2724 }
 0x2ce   : > { %v807_v37 = vsel %vm740_vm5, %v3016_v57, 0.0 }
 0x2d3   : > { %v3020_v58 = vpop.eup %2726 }
 0x2d4   : > { %v810_v56 = vsel %vm740_vm5, %v3020_v58, 0.0 }
 0x2e3   : > { %1126 = vrot.lane.b32.xlu0 %v2904_v43, %s2787_s27 }
 0x2ec   : > { %802 = vadd.xlane.f32.xlu1 %v801_v55 }
 0x2f0   : > { %808 = vadd.xlane.f32.xlu1 %v807_v37 }
 0x301   : > { %1174 = vrot.lane.b32.xlu1 %v2900_v42, %s2787_s27 }
 0x302   : > { %811 = vadd.xlane.f32.xlu0 %v810_v56 }
 0x305   : > { %1274 = vrot.lane.b32.xlu1 %v2892_v38, %s2788_s28 }
 0x309   : > { %1272 = vrot.lane.b32.xlu1 %v2892_v38, %s2789_s29 }
 0x30d   : > { %1374 = vrot.lane.b32.xlu1 %v2889_v35, %s2788_s28 }
 0x311   : > { %1372 = vrot.lane.b32.xlu1 %v2889_v35, %s2789_s29 }
 0x315   : > { %1474 = vrot.lane.b32.xlu1 %v2895_v40, %s2788_s28 }
 0x318   : > { %1224 = vrot.lane.b32.xlu0 %v2886_v32, %s2788_s28 }
 0x319   : > { %1472 = vrot.lane.b32.xlu1 %v2895_v40, %s2789_s29 }
 0x31c   : > { %1222 = vrot.lane.b32.xlu0 %v2886_v32, %s2789_s29 }
 0x31d   : > { %1574 = vrot.lane.b32.xlu1 %v2900_v42, %s2788_s28 }
 0x320   : > { %1324 = vrot.lane.b32.xlu0 %v2884_v29, %s2788_s28 }
 0x321   : > { %1572 = vrot.lane.b32.xlu1 %v2900_v42, %s2789_s29 }
 0x324   : > { %1322 = vrot.lane.b32.xlu0 %v2884_v29, %s2789_s29 }
 0x325   : > { %1718 = vrot.lane.b32.xlu1 %v2886_v32, %s2790_s30 }
 0x328   : > { %1424 = vrot.lane.b32.xlu0 %v2897_v41, %s2788_s28 }
 0x32c   : > { %1422 = vrot.lane.b32.xlu0 %v2897_v41, %s2789_s29 }
 0x330   : > { %1524 = vrot.lane.b32.xlu0 %v2904_v43, %s2788_s28 }
 0x334   : > { %1522 = vrot.lane.b32.xlu0 %v2904_v43, %s2789_s29 }
 0x33c   : > { %v797_v60 = vpop.xlane.xlu1 %796 }
 0x340   : > { %v791_v61 = vpop.xlane.xlu1 %790 }
 0x341   : > { %2728 = vrcp.f32 %v791_v61 }
 0x342   : > { %2730 = vrcp.f32 %v797_v60 }
 0x344   : > { %v1079_v31 = vpop.permute.xlu1 %1078 }
 0x34a   : > { %v794_v63 = vpop.xlane.xlu0 %793 }
 0x34b   : > { %2732 = vrcp.f32 %v794_v63 }
 0x34e   : > { %v2729_v1 = vpop.eup %2728  ;;  %v800_v15 = vpop.xlane.xlu0 %799 }
 0x34f   : > { %v821_v32 = vmul.f32 %v2729_v1, %v2990_v30  ;;  %2734 = vrcp.f32 %v800_v15  ;;  %v2731_v18 = vpop.eup %2730 }
 0x350   : > { %v823_v20 = vmul.f32 %v2731_v18, %v2986_v24 }
 0x351   : > { %v829_v17 = vpack.c.bf16 %v821_v32, %v821_v32 }
 0x352   : > { %v831_v26 = vpack.c.bf16 %v823_v20, %v823_v20 }
 0x353   : > { %2520 = vmatmul.mubr.msk.bf16.vlgmr.msra.gmra.mxu0 %vm740_vm5, %v829_v17 }
 0x354   : > { %2530 = vmatpush3.bf16.msra.mxu0 %v940_v19  ;;  %2531 = vmatprep.mubr.msk.bf16.mxu0 %vm2785_vm2, %v2784_v27 }
 0x355   : > { %2541 = vmatprep.subr.bf16.mxu0 %v2784_v27 }
 0x356   : > { %v806_v21 = vpop.xlane.xlu0 %805 }
 0x357   : > { %2736 = vrcp.f32 %v806_v21 }
 0x358   : > { %v2733_v25 = vpop.eup %2732 }
 0x359   : > { %v822_v0 = vmul.f32 %v2733_v25, %v2994_v34  ;;  %v1084_v34 = vsel %vm842_vm4, %v1079_v31, 0 }
 0x35a   : > { %v1127_v51 = vpop.permute.xlu0 %1126 }
 0x35b   : > { %2532 = vmatmul.mubr.msk.bf16.vlgmr.msra.gmra.mxu0 %vm740_vm5, %v831_v26  ;;  %v830_v16 = vpack.c.bf16 %v822_v0, %v822_v0  ;;  %v1132_v23 = vsel %vm842_vm4, %v1127_v51, 0 }
 0x35c   : > { %2542 = vmatpush3.bf16.msra.mxu0 %v1036_v28  ;;  %2543 = vmatprep.mubr.msk.bf16.mxu0 %vm2785_vm2, %v2784_v27  ;;  %v2735_v30 = vpop.eup %2734 }
 0x35d   : > { %2526 = vmatmul.mubr.msk.bf16.vlgmr.msra.gmra.mxu1 %vm740_vm5, %v830_v16  ;;  %2553 = vmatprep.subr.bf16.mxu0 %v2784_v27  ;;  %v824_v24 = vmul.f32 %v2735_v30, %v2998_v39 }
 0x35e   : > { %2536 = vmatpush3.bf16.msra.mxu1 %v988_v2  ;;  %2537 = vmatprep.mubr.msk.bf16.mxu1 %vm2785_vm2, %v2784_v27 }
 0x35f   : > { %2547 = vmatprep.subr.bf16.mxu1 %v2784_v27  ;;  %v832_v22 = vpack.c.bf16 %v824_v24, %v824_v24 }
 0x364   : > { %v2737_v33 = vpop.eup %2736 }
 0x365   : > { %2538 = vmatmul.mubr.msk.bf16.vlgmr.msra.gmra.mxu1 %vm740_vm5, %v832_v22  ;;  %v826_v36 = vmul.f32 %v2737_v33, %v3004_v45 }
 0x366   : > { %2548 = vmatpush3.bf16.msra.mxu1 %v1084_v34  ;;  %2549 = vmatprep.mubr.msk.bf16.mxu1 %vm2785_vm2, %v2784_v27 }
 0x367   : > { %2559 = vmatprep.subr.bf16.mxu1 %v2784_v27  ;;  %v834_v44 = vpack.c.bf16 %v826_v36, %v826_v36 }
 0x36d   : > { %2550 = vmatmul.mubr.msk.bf16.vlgmr.msra.gmra.mxu1 %vm740_vm5, %v834_v44 }
 0x36e   : > { %2561 = vmatprep.mubr.msk.bf16.mxu1 %vm2785_vm2, %v2784_v27 }
 0x375   : > { %v803_v39 = vpop.xlane.xlu1 %802 }
 0x376   : > { %2738 = vrcp.f32 %v803_v39 }
 0x379   : > { %v809_v46 = vpop.xlane.xlu1 %808 }
 0x37a   : > { %2740 = vrcp.f32 %v809_v46 }
 0x37d   : > { %v1175_v47 = vpop.permute.xlu1 %1174 }
 0x37e   : > { %v1180_v48 = vsel %vm842_vm4, %v1175_v47, 0 }
 0x37f   : > { %2560 = vmatpush3.bf16.msra.mxu1 %v1180_v48 }
 0x380   : > { %2571 = vmatprep.subr.bf16.mxu1 %v2784_v27 }
 0x381   : > { %v1275_v49 = vpop.permute.xlu1 %1274 }
 0x382   : > { %v1280_v21 = vsel %vm350_vm3, %v1275_v49, 0 }
 0x383   : > { %v2739_v45 = vpop.eup %2738 }
 0x384   : > { %v825_v50 = vmul.f32 %v2739_v45, %v3012_v53 }
 0x385   : > { %v1273_v52 = vpop.permute.xlu1 %1272 }
 0x386   : > { %v833_v54 = vpack.c.bf16 %v825_v50, %v825_v50 }
 0x387   : > { %v2741_v55 = vpop.eup %2740 }
 0x388   : > { %2544 = vmatmul.mubr.msk.bf16.vlgmr.msra.gmra.mxu0 %vm740_vm5, %v833_v54  ;;  %v827_v56 = vmul.f32 %v2741_v55, %v3016_v57 }
 0x389   : > { %2554 = vmatpush3.bf16.msra.mxu0 %v1132_v23  ;;  %v1375_v37 = vpop.permute.xlu1 %1374  ;;  %2555 = vmatprep.mubr.msk.bf16.mxu0 %vm2785_vm2, %v2784_v27 }
 0x38a   : > { %2565 = vmatprep.subr.bf16.mxu0 %v2784_v27  ;;  %v835_v53 = vpack.c.bf16 %v827_v56, %v827_v56  ;;  %v1380_v28 = vsel %vm350_vm3, %v1375_v37, 0 }
 0x38b   : > { %v812_v59 = vpop.xlane.xlu0 %811 }
 0x38c   : > { %2742 = vrcp.f32 %v812_v59 }
 0x38d   : > { %v1373_v60 = vpop.permute.xlu1 %1372 }
 0x38f   : > { %v1225_v61 = vpop.permute.xlu0 %1224 }
 0x390   : > { %v1230_v62 = vsel %vm350_vm3, %v1225_v61, 0  ;;  %2556 = vmatmul.mubr.msk.bf16.vlgmr.msra.gmra.mxu0 %vm740_vm5, %v835_v53 }
 0x391   : > { %2566 = vmatpush3.bf16.xpose.msra.mxu0 %v1230_v62  ;;  %2567 = vmatprep.mubr.msk.bf16.mxu0 %vm2785_vm2, %v2784_v27  ;;  %v1475_v1 = vpop.permute.xlu1 %1474 }
 0x392   : > { %2577 = vmatprep.subr.bf16.mxu0 %v2784_v27  ;;  %v1480_v31 = vsel %vm350_vm3, %v1475_v1, 0 }
 0x393   : > { %v1223_v63 = vpop.permute.xlu0 %1222 }
 0x395   : > { %v1473_v18 = vpop.permute.xlu1 %1472 }
 0x397   : > { %v1325_v57 = vpop.permute.xlu0 %1324 }
 0x398   : > { %v1330_v15 = vsel %vm350_vm3, %v1325_v57, 0  ;;  %2568 = vmatmul.mubr.msk.bf16.vlgmr.msra.gmra.mxu0 %vm350_vm3, %v1223_v63 }
 0x399   : > { %v2743_v32 = vpop.eup %2742  ;;  %2578 = vmatpush3.bf16.xpose.msra.mxu0 %v1330_v15  ;;  %2579 = vmatprep.mubr.msk.bf16.mxu0 %vm2785_vm2, %v2784_v27 }
 0x39a   : > { %v828_v17 = vmul.f32 %v2743_v32, %v3020_v58  ;;  %2589 = vmatprep.subr.bf16.mxu0 %v2784_v27  ;;  %v1575_v58 = vpop.permute.xlu1 %1574 }
 0x39b   : > { %v1323_v19 = vpop.permute.xlu0 %1322  ;;  %v1580_v34 = vsel %vm350_vm3, %v1575_v58, 0 }
 0x39c   : > { %v836_v20 = vpack.c.bf16 %v828_v17, %v828_v17 }
 0x39e   : > { %2562 = vmatmul.mubr.msk.bf16.vlgmr.msra.gmra.mxu1 %vm740_vm5, %v836_v20  ;;  %v1573_v16 = vpop.permute.xlu1 %1572 }
 0x39f   : > { %2572 = vmatpush3.bf16.xpose.msra.mxu1 %v1280_v21  ;;  %v1425_v25 = vpop.permute.xlu0 %1424  ;;  %2573 = vmatprep.mubr.msk.bf16.mxu1 %vm2785_vm2, %v2784_v27 }
 0x3a0   : > { %v1430_v26 = vsel %vm350_vm3, %v1425_v25, 0  ;;  %2580 = vmatmul.mubr.msk.bf16.vlgmr.msra.gmra.mxu0 %vm350_vm3, %v1323_v19  ;;  %2583 = vmatprep.subr.bf16.mxu1 %v2784_v27 }
 0x3a1   : > { %2590 = vmatpush3.bf16.xpose.msra.mxu0 %v1430_v26  ;;  %2591 = vmatprep.mubr.msk.bf16.mxu0 %vm2785_vm2, %v2784_v27 }
 0x3a2   : > { %2601 = vmatprep.subr.bf16.mxu0 %v2784_v27  ;;  %v1719_v24 = vpop.permute.xlu1 %1718 }
 0x3a3   : > { %v1423_v0 = vpop.permute.xlu0 %1422  ;;  %v1724_v33 = vsel %vm842_vm4, %v1719_v24, 0 }
 0x3a6   : > { %2574 = vmatmul.mubr.msk.bf16.vlgmr.msra.gmra.mxu1 %vm350_vm3, %v1273_v52 }
 0x3a7   : > { %2584 = vmatpush3.bf16.xpose.msra.mxu1 %v1380_v28  ;;  %v1525_v30 = vpop.permute.xlu0 %1524  ;;  %2585 = vmatprep.mubr.msk.bf16.mxu1 %vm2785_vm2, %v2784_v27 }
 0x3a8   : > { %v1530_v2 = vsel %vm350_vm3, %v1525_v30, 0  ;;  %2592 = vmatmul.mubr.msk.bf16.vlgmr.msra.gmra.mxu0 %vm350_vm3, %v1423_v0  ;;  %2595 = vmatprep.subr.bf16.mxu1 %v2784_v27 }
 0x3a9   : > { %2602 = vmatpush3.bf16.xpose.msra.mxu0 %v1530_v2  ;;  %2603 = vmatprep.mubr.msk.bf16.mxu0 %vm2785_vm2, %v2784_v27 }
 0x3aa   : > { %2613 = vmatprep.subr.bf16.mxu0 %v2784_v27 }
 0x3ab   : > { %v1523_v22 = vpop.permute.xlu0 %1522 }
 0x3ae   : > { %2586 = vmatmul.mubr.msk.bf16.vlgmr.msra.gmra.mxu1 %vm350_vm3, %v1373_v60 }
 0x3af   : > { %2596 = vmatpush3.bf16.xpose.msra.mxu1 %v1480_v31  ;;  %2597 = vmatprep.mubr.msk.bf16.mxu1 %vm2785_vm2, %v2784_v27 }
 0x3b0   : > { %2604 = vmatmul.mubr.msk.bf16.vlgmr.msra.gmra.mxu0 %vm350_vm3, %v1523_v22  ;;  %2607 = vmatprep.subr.bf16.mxu1 %v2784_v27 }
 0x3b1   : > { %2614 = vmatpush3.bf16.msra.mxu0 %v1724_v33  ;;  %2615 = vmatprep.mubr.msk.bf16.mxu0 %vm2785_vm2, %v2784_v27 }
 0x3b2   : > { %2625 = vmatprep.subr.bf16.mxu0 %v2784_v27 }
 0x3b6   : > { %2598 = vmatmul.mubr.msk.bf16.vlgmr.msra.gmra.mxu1 %vm350_vm3, %v1473_v18 }
 0x3b7   : > { %2608 = vmatpush3.bf16.xpose.msra.mxu1 %v1580_v34  ;;  %2609 = vmatprep.mubr.msk.bf16.mxu1 %vm2785_vm2, %v2784_v27 }
 0x3b8   : > { %2619 = vmatprep.subr.bf16.mxu1 %v2784_v27 }
 0x3be   : > { %2610 = vmatmul.mubr.msk.bf16.vlgmr.msra.gmra.mxu1 %vm350_vm3, %v1573_v16 }
 0x3bf   : > { %2621 = vmatprep.mubr.msk.bf16.mxu1 %vm2785_vm2, %v2784_v27 }
 0x413   : > { %v3131_v36 = vpop.f32.mrf.mxu0 }
 0x415   : > { %v2521_v44 = vpop.f32.mrf.mxu0 }
 0x417   : > { %v883_v39 = vpop.f32.mrf.mxu0 }
 0x419   : > { %v2522_v46 = vpop.f32.mrf.mxu0 }
 0x41b   : > { %v3133_v47 = vpop.f32.mrf.mxu0 }
 0x41d   : > { %v3135_v48 = vpop.f32.mrf.mxu1  ;;  %v2533_v49 = vpop.f32.mrf.mxu0 }
 0x41f   : > { %v2527_v45 = vpop.f32.mrf.mxu1  ;;  %v979_v50 = vpop.f32.mrf.mxu0 }
 0x421   : > { %v931_v51 = vpop.f32.mrf.mxu1  ;;  %v2534_v52 = vpop.f32.mrf.mxu0 }
 0x423   : > { %v2528_v54 = vpop.f32.mrf.mxu1 }
 0x425   : > { %v3137_v55 = vpop.f32.mrf.mxu1 }
 0x427   : > { %v2539_v23 = vpop.f32.mrf.mxu1 }
 0x429   : > { %v1027_v37 = vpop.f32.mrf.mxu1 }
 0x42b   : > { %v2540_v56 = vpop.f32.mrf.mxu1 }
 0x42d   : > { %v3139_v59 = vpop.f32.mrf.mxu1 }
 0x42f   : > { %v2551_v53 = vpop.f32.mrf.mxu1 }
 0x431   : > { %v1123_v60 = vpop.f32.mrf.mxu1 }
 0x433   : > { %v2552_v61 = vpop.f32.mrf.mxu1 }
 0x448   : > { %v3141_v62 = vpop.f32.mrf.mxu0 }
 0x44a   : > { %v2545_v63 = vpop.f32.mrf.mxu0 }
 0x44c   : > { %v1075_v1 = vpop.f32.mrf.mxu0 }
 0x44e   : > { %v2546_v57 = vpop.f32.mrf.mxu0 }
 0x450   : > { %v3143_v15 = vpop.f32.mrf.mxu0 }
 0x452   : > { %v2557_v32 = vpop.f32.mrf.mxu0 }
 0x454   : > { %v1171_v17 = vpop.f32.mrf.mxu0 }
 0x456   : > { %v2558_v18 = vpop.f32.mrf.mxu0 }
 0x458   : > { %v1266_v19 = vpop.f32.mrf.mxu0 }
 0x459   : > { %v1622_v20 = vsel %vm740_vm5, %v1266_v19, -inf }
 0x45a   : > { %1623 = vmax.xlane.f32.xlu0 %v1622_v20  ;;  %v2569_v21 = vpop.f32.mrf.mxu0 }
 0x45c   : > { %v1269_v25 = vpop.f32.mrf.mxu0 }
 0x45e   : > { %v3146_v26 = vpop.f32.mrf.mxu1  ;;  %v2570_v58 = vpop.f32.mrf.mxu0 }
 0x460   : > { %v2563_v0 = vpop.f32.mrf.mxu1  ;;  %v1366_v28 = vpop.f32.mrf.mxu0 }
 0x461   : > { %v1628_v16 = vsel %vm740_vm5, %v1366_v28, -inf }
 0x462   : > { %v1219_v30 = vpop.f32.mrf.mxu1  ;;  %1629 = vmax.xlane.f32.xlu0 %v1628_v16  ;;  %v2581_v2 = vpop.f32.mrf.mxu0 }
 0x464   : > { %v2564_v24 = vpop.f32.mrf.mxu1  ;;  %v1369_v31 = vpop.f32.mrf.mxu0 }
 0x466   : > { %v1316_v22 = vpop.f32.mrf.mxu1  ;;  %v2582_v33 = vpop.f32.mrf.mxu0 }
 0x467   : > { %v1625_v34 = vsel %vm740_vm5, %v1316_v22, -inf }
 0x468   : > { %1626 = vmax.xlane.f32.xlu1 %v1625_v34  ;;  %v2575_v44 = vpop.f32.mrf.mxu1  ;;  %v3150_v39 = vpop.f32.mrf.mxu0 }
 0x469   : > { %v1634_v45 = vsel %vm740_vm5, %v3150_v39, -inf }
 0x46a   : > { %v1319_v46 = vpop.f32.mrf.mxu1  ;;  %v2593_v49 = vpop.f32.mrf.mxu0 }
 0x46c   : > { %v2576_v50 = vpop.f32.mrf.mxu1  ;;  %1635 = vmax.xlane.f32.xlu1 %v1634_v45  ;;  %v1469_v51 = vpop.f32.mrf.mxu0 }
 0x46e   : > { %v1416_v52 = vpop.f32.mrf.mxu1  ;;  %v2594_v54 = vpop.f32.mrf.mxu0 }
 0x46f   : > { %v1631_v23 = vsel %vm740_vm5, %v1416_v52, -inf }
 0x470   : > { %v2587_v37 = vpop.f32.mrf.mxu1  ;;  %1632 = vmax.xlane.f32.xlu0 %v1631_v23  ;;  %v3155_v56 = vpop.f32.mrf.mxu0 }
 0x471   : > { %v1640_v53 = vsel %vm740_vm5, %v3155_v56, -inf }
 0x472   : > { %v1419_v60 = vpop.f32.mrf.mxu1  ;;  %1641 = vmax.xlane.f32.xlu1 %v1640_v53  ;;  %v2605_v61 = vpop.f32.mrf.mxu0 }
 0x474   : > { %v2588_v63 = vpop.f32.mrf.mxu1  ;;  %v1569_v1 = vpop.f32.mrf.mxu0 }
 0x476   : > { %v1516_v57 = vpop.f32.mrf.mxu1  ;;  %v2606_v32 = vpop.f32.mrf.mxu0 }
 0x477   : > { %v1637_v17 = vsel %vm740_vm5, %v1516_v57, -inf }
 0x478   : > { %v2599_v18 = vpop.f32.mrf.mxu1  ;;  %1638 = vmax.xlane.f32.xlu0 %v1637_v17 }
 0x47a   : > { %v1519_v20 = vpop.f32.mrf.mxu1 }
 0x47c   : > { %v2600_v21 = vpop.f32.mrf.mxu1 }
 0x47e   : > { %v1616_v25 = vpop.f32.mrf.mxu1 }
 0x47f   : > { %v1643_v58 = vsel %vm740_vm5, %v1616_v25, -inf }
 0x480   : > { %v2611_v0 = vpop.f32.mrf.mxu1  ;;  %1644 = vmax.xlane.f32.xlu0 %v1643_v58 }
 0x482   : > { %v1619_v16 = vpop.f32.mrf.mxu1 }
 0x483   : > { %1814 = vrot.lane.b32.xlu1 %v2884_v29, %s2790_s30 }
 0x484   : > { %v2612_v30 = vpop.f32.mrf.mxu1 }
 0x487   : > { %1862 = vrot.lane.b32.xlu1 %v2889_v35, %s2790_s30 }
 0x496   : > { %1766 = vrot.lane.b32.xlu0 %v2892_v38, %s2790_s30 }
 0x4e3   : > { %v1624_v2 = vpop.xlane.xlu0 %1623 }
 0x4e4   : > { %v1646_v24 = vsub.f32 %v1266_v19, %v1624_v2 }
 0x4e6   : > { %v1654_v31 = vmul.f32 1.442695, %v1646_v24 }
 0x4e8   : > { %2744 = vpow2.f32 %v1654_v31 }
 0x4eb   : > { %v1630_v33 = vpop.xlane.xlu0 %1629 }
 0x4ec   : > { %v1648_v34 = vsub.f32 %v1366_v28, %v1630_v33 }
 0x4ee   : > { %v1658_v44 = vmul.f32 1.442695, %v1648_v34 }
 0x4f0   : > { %2746 = vpow2.f32 %v1658_v44 }
 0x4f1   : > { %v1627_v46 = vpop.xlane.xlu1 %1626 }
 0x4f2   : > { %v1647_v49 = vsub.f32 %v1316_v22, %v1627_v46 }
 0x4f4   : > { %v1656_v45 = vmul.f32 1.442695, %v1647_v49 }
 0x4f5   : > { %v2745_v50 = vpop.eup %2744  ;;  %v1636_v63 = vpop.xlane.xlu1 %1635 }
 0x4f6   : > { %2748 = vpow2.f32 %v1656_v45  ;;  %v1670_v29 = vsel %vm740_vm5, %v2745_v50, 0.0  ;;  %v1650_v1 = vsub.f32 %v3150_v39, %v1636_v63 }
 0x4f7   : > { %1671 = vadd.xlane.f32.xlu1 %v1670_v29 }
 0x4f8   : > { %v1662_v17 = vmul.f32 1.442695, %v1650_v1 }
 0x4f9   : > { %v1633_v35 = vpop.xlane.xlu0 %1632 }
 0x4fa   : > { %v1649_v51 = vsub.f32 %v1416_v52, %v1633_v35 }
 0x4fb   : > { %v1642_v32 = vpop.xlane.xlu1 %1641 }
 0x4fc   : > { %v1660_v54 = vmul.f32 1.442695, %v1649_v51  ;;  %v1652_v18 = vsub.f32 %v3155_v56, %v1642_v32 }
 0x4fd   : > { %v3168_v38 = vpop.eup %2746 }
 0x4fe   : > { %2750 = vpow2.f32 %v1660_v54  ;;  %v1676_v19 = vsel %vm740_vm5, %v3168_v38, 0.0  ;;  %v1666_v20 = vmul.f32 1.442695, %v1652_v18 }
 0x4ff   : > { %1677 = vadd.xlane.f32.xlu1 %v1676_v19  ;;  %2752 = vpow2.f32 %v1662_v17  ;;  %v1815_v24 = vpop.permute.xlu1 %1814 }
 0x500   : > { %2754 = vpow2.f32 %v1666_v20  ;;  %v1820_v29 = vsel %vm842_vm4, %v1815_v24, 0 }
 0x501   : > { %v1639_v23 = vpop.xlane.xlu0 %1638 }
 0x502   : > { %v1651_v21 = vsub.f32 %v1516_v57, %v1639_v23 }
 0x503   : > { %v3172_v28 = vpop.eup %2748  ;;  %v1863_v31 = vpop.permute.xlu1 %1862 }
 0x504   : > { %v1673_v22 = vsel %vm740_vm5, %v3172_v28, 0.0  ;;  %v1664_v58 = vmul.f32 1.442695, %v1651_v21 }
 0x505   : > { %1674 = vadd.xlane.f32.xlu0 %v1673_v22 }
 0x506   : > { %2756 = vpow2.f32 %v1664_v58 }
 0x509   : > { %v1645_v37 = vpop.xlane.xlu0 %1644 }
 0x50a   : > { %v1653_v0 = vsub.f32 %v1616_v25, %v1645_v37  ;;  %v1868_v37 = vsel %vm842_vm4, %v1863_v31, 0 }
 0x50b   : > { %v3176_v53 = vpop.eup %2750 }
 0x50c   : > { %v1679_v52 = vsel %vm740_vm5, %v3176_v53, 0.0  ;;  %v3188_v16 = vpop.eup %2752 }
 0x50d   : > { %1680 = vadd.xlane.f32.xlu0 %v1679_v52  ;;  %v1767_v60 = vpop.permute.xlu0 %1766  ;;  %v1682_v39 = vsel %vm740_vm5, %v3188_v16, 0.0  ;;  %v3192_v30 = vpop.eup %2754 }
 0x50e   : > { %v1772_v61 = vsel %vm842_vm4, %v1767_v60, 0  ;;  %v1688_v56 = vsel %vm740_vm5, %v3192_v30, 0.0 }
 0x50f   : > { %2620 = vmatpush3.bf16.msra.mxu1 %v1772_v61 }
 0x510   : > { %1958 = vrot.lane.b32.xlu1 %v2895_v40, %s2790_s30  ;;  %2631 = vmatprep.subr.bf16.mxu1 %v2784_v27  ;;  %v1668_v40 = vmul.f32 1.442695, %v1653_v0 }
 0x512   : > { %2758 = vpow2.f32 %v1668_v40 }
 0x523   : > { %1910 = vrot.lane.b32.xlu0 %v2897_v41, %s2790_s30  ;;  %v3196_v41 = vpop.eup %2756 }
 0x524   : > { %v1685_v57 = vsel %vm740_vm5, %v3196_v41, 0.0  ;;  %v3200_v25 = vpop.eup %2758 }
 0x525   : > { %v1691_v2 = vsel %vm740_vm5, %v3200_v25, 0.0 }
 0x534   : > { %1683 = vadd.xlane.f32.xlu1 %v1682_v39 }
 0x538   : > { %1689 = vadd.xlane.f32.xlu1 %v1688_v56 }
 0x542   : > { %1686 = vadd.xlane.f32.xlu0 %v1685_v57 }
 0x546   : > { %1692 = vadd.xlane.f32.xlu0 %v1691_v2 }
 0x549   : > { %2054 = vrot.lane.b32.xlu1 %v2900_v42, %s2790_s30 }
 0x55c   : > { %2006 = vrot.lane.b32.xlu0 %v2904_v43, %s2790_s30 }
 0x580   : > { %v1672_v33 = vpop.xlane.xlu1 %1671 }
 0x581   : > { %2760 = vrcp.f32 %v1672_v33 }
 0x588   : > { %v1678_v34 = vpop.xlane.xlu1 %1677 }
 0x589   : > { %2762 = vrcp.f32 %v1678_v34 }
 0x58c   : > { %v1959_v60 = vpop.permute.xlu1 %1958 }
 0x58e   : > { %v2761_v44 = vpop.eup %2760  ;;  %v1675_v46 = vpop.xlane.xlu0 %1674 }
 0x58f   : > { %2764 = vrcp.f32 %v1675_v46  ;;  %v1702_v49 = vmul.f32 %v2761_v44, %v2745_v50 }
 0x591   : > { %v1710_v45 = vpack.c.bf16 %v1702_v49, %v1702_v49 }
 0x593   : > { %2616 = vmatmul.mubr.msk.bf16.vlgmr.msra.gmra.mxu0 %vm740_vm5, %v1710_v45 }
 0x594   : > { %2626 = vmatpush3.bf16.msra.mxu0 %v1820_v29  ;;  %2627 = vmatprep.mubr.msk.bf16.mxu0 %vm2785_vm2, %v2784_v27 }
 0x595   : > { %2637 = vmatprep.subr.bf16.mxu0 %v2784_v27 }
 0x596   : > { %v2763_v42 = vpop.eup %2762  ;;  %v1681_v43 = vpop.xlane.xlu0 %1680 }
 0x597   : > { %2766 = vrcp.f32 %v1681_v43  ;;  %v1704_v35 = vmul.f32 %v2763_v42, %v3168_v38  ;;  %v212_v42 = vld [vmem:[%s3315_s3] sm:$0x3] }
 0x599   : > { %v1712_v51 = vpack.c.bf16 %v1704_v35, %v1704_v35 }
 0x59a   : > { %v1911_v54 = vpop.permute.xlu0 %1910 }
 0x59b   : > { %v1916_v50 = vsel %vm842_vm4, %v1911_v54, 0  ;;  %2628 = vmatmul.mubr.msk.bf16.vlgmr.msra.gmra.mxu0 %vm740_vm5, %v1712_v51 }
 0x59c   : > { %v2765_v19 = vpop.eup %2764  ;;  %2638 = vmatpush3.bf16.msra.mxu0 %v1916_v50  ;;  %2639 = vmatprep.mubr.msk.bf16.mxu0 %vm2785_vm2, %v2784_v27 }
 0x59d   : > { %v1703_v22 = vmul.f32 %v2765_v19, %v3172_v28  ;;  %2649 = vmatprep.subr.bf16.mxu0 %v2784_v27  ;;  %v1964_v28 = vsel %vm842_vm4, %v1959_v60, 0 }
 0x59f   : > { %v1711_v23 = vpack.c.bf16 %v1703_v22, %v1703_v22 }
 0x5a1   : > { %2622 = vmatmul.mubr.msk.bf16.vlgmr.msra.gmra.mxu1 %vm740_vm5, %v1711_v23 }
 0x5a2   : > { %2632 = vmatpush3.bf16.msra.mxu1 %v1868_v37  ;;  %2633 = vmatprep.mubr.msk.bf16.mxu1 %vm2785_vm2, %v2784_v27 }
 0x5a3   : > { %2643 = vmatprep.subr.bf16.mxu1 %v2784_v27 }
 0x5a4   : > { %v2767_v38 = vpop.eup %2766 }
 0x5a5   : > { %v1705_v52 = vmul.f32 %v2767_v38, %v3176_v53 }
 0x5a7   : > { %v1713_v61 = vpack.c.bf16 %v1705_v52, %v1705_v52 }
 0x5a9   : > { %2634 = vmatmul.mubr.msk.bf16.vlgmr.msra.gmra.mxu1 %vm740_vm5, %v1713_v61 }
 0x5aa   : > { %2644 = vmatpush3.bf16.msra.mxu1 %v1964_v28  ;;  %2645 = vmatprep.mubr.msk.bf16.mxu1 %vm2785_vm2, %v2784_v27 }
 0x5ab   : > { %2655 = vmatprep.subr.bf16.mxu1 %v2784_v27 }
 0x5bd   : > { %v1684_v63 = vpop.xlane.xlu1 %1683 }
 0x5be   : > { %2768 = vrcp.f32 %v1684_v63 }
 0x5c1   : > { %v1690_v1 = vpop.xlane.xlu1 %1689 }
 0x5c2   : > { %2770 = vrcp.f32 %v1690_v1 }
 0x5c5   : > { %v2055_v57 = vpop.permute.xlu1 %2054 }
 0x5c6   : > { %v2060_v31 = vsel %vm842_vm4, %v2055_v57, 0 }
 0x5cb   : > { %v2769_v32 = vpop.eup %2768  ;;  %v1687_v17 = vpop.xlane.xlu0 %1686 }
 0x5cc   : > { %2772 = vrcp.f32 %v1687_v17  ;;  %v1706_v53 = vmul.f32 %v2769_v32, %v3188_v16 }
 0x5ce   : > { %v1714_v18 = vpack.c.bf16 %v1706_v53, %v1706_v53 }
 0x5cf   : > { %v2771_v20 = vpop.eup %2770  ;;  %v1693_v21 = vpop.xlane.xlu0 %1692 }
 0x5d0   : > { %2774 = vrcp.f32 %v1693_v21  ;;  %2640 = vmatmul.mubr.msk.bf16.vlgmr.msra.gmra.mxu0 %vm740_vm5, %v1714_v18  ;;  %v1708_v58 = vmul.f32 %v2771_v20, %v3192_v30 }
 0x5d1   : > { %2651 = vmatprep.mubr.msk.bf16.mxu0 %vm2785_vm2, %v2784_v27 }
 0x5d2   : > { %v1716_v39 = vpack.c.bf16 %v1708_v58, %v1708_v58 }
 0x5d3   : > { %v2007_v0 = vpop.permute.xlu0 %2006 }
 0x5d4   : > { %v2012_v40 = vsel %vm842_vm4, %v2007_v0, 0 }
 0x5d5   : > { %2650 = vmatpush3.bf16.msra.mxu0 %v2012_v40 }
 0x5d6   : > { %2675 = vmatprep.subr.msk.bf16.mxu0 %vm270_vm0, %v212_v42 }
 0x5d8   : > { %2652 = vmatmul.mubr.msk.bf16.vlgmr.msra.gmra.mxu0 %vm740_vm5, %v1716_v39 }
 0x5d9   : > { %v2773_v56 = vpop.eup %2772 }
 0x5da   : > { %v1707_v16 = vmul.f32 %v2773_v56, %v3196_v41 }
 0x5dc   : > { %v1715_v2 = vpack.c.bf16 %v1707_v16, %v1707_v16 }
 0x5dd   : > { %v2775_v24 = vpop.eup %2774 }
 0x5de   : > { %2646 = vmatmul.mubr.msk.bf16.vlgmr.msra.gmra.mxu1 %vm740_vm5, %v1715_v2  ;;  %v1709_v30 = vmul.f32 %v2775_v24, %v3200_v25 }
 0x5df   : > { %2656 = vmatpush3.bf16.msra.mxu1 %v2060_v31  ;;  %2657 = vmatprep.mubr.msk.bf16.mxu1 %vm2785_vm2, %v2784_v27  ;;  %v2159_v27 = vsel %vm270_vm0, %v212_v42, 0 }
 0x5e0   : > { %v1717_v33 = vpack.c.bf16 %v1709_v30, %v1709_v30  ;;  %2662 = vmatpush3.bf16.msra.mxu0 %v2159_v27 }
 0x5e6   : > { %2658 = vmatmul.mubr.msk.bf16.vlgmr.msra.gmra.mxu1 %vm740_vm5, %v1717_v33 }
 0x653   : > { %v1760_v34 = vpop.f32.mrf.mxu0 }
 0x655   : > { %v2617_v44 = vpop.f32.mrf.mxu0 }
 0x657   : > { %v1763_v46 = vpop.f32.mrf.mxu0 }
 0x659   : > { %v2618_v41 = vpop.f32.mrf.mxu0 }
 0x65b   : > { %v1856_v49 = vpop.f32.mrf.mxu0 }
 0x65d   : > { %v2629_v45 = vpop.f32.mrf.mxu0 }
 0x65f   : > { %v1859_v29 = vpop.f32.mrf.mxu0 }
 0x661   : > { %v1808_v43 = vpop.f32.mrf.mxu1  ;;  %v2630_v35 = vpop.f32.mrf.mxu0 }
 0x662   : > { %v2692_v25 = vpack.i.bf16 %v1808_v43, %v1760_v34 }
 0x663   : > { %v2623_v51 = vpop.f32.mrf.mxu1 }
 0x664   : > { %2693 = vrot.lane.b32.xlu0 %v2692_v25, %s2791_s7 }
 0x665   : > { %v1811_v54 = vpop.f32.mrf.mxu1 }
 0x667   : > { %v2624_v50 = vpop.f32.mrf.mxu1 }
 0x669   : > { %v1904_v19 = vpop.f32.mrf.mxu1 }
 0x66a   : > { %v2697_v22 = vpack.i.bf16 %v1904_v19, %v1856_v49 }
 0x66b   : > { %v2635_v23 = vpop.f32.mrf.mxu1 }
 0x66c   : > { %2698 = vrot.lane.b32.xlu1 %v2697_v22, %s2791_s7 }
 0x66d   : > { %v1907_v37 = vpop.f32.mrf.mxu1 }
 0x66f   : > { %v2636_v38 = vpop.f32.mrf.mxu1 }
 0x690   : > { %v1952_v52 = vpop.f32.mrf.mxu0 }
 0x692   : > { %v2641_v60 = vpop.f32.mrf.mxu0 }
 0x694   : > { %v1955_v61 = vpop.f32.mrf.mxu0 }
 0x696   : > { %v2642_v28 = vpop.f32.mrf.mxu0 }
 0x698   : > { %v2048_v63 = vpop.f32.mrf.mxu0 }
 0x69a   : > { %v2653_v1 = vpop.f32.mrf.mxu0 }
 0x69c   : > { %v2051_v32 = vpop.f32.mrf.mxu0 }
 0x69e   : > { %v2000_v17 = vpop.f32.mrf.mxu1  ;;  %v2654_v53 = vpop.f32.mrf.mxu0 }
 0x69f   : > { %v2702_v18 = vpack.i.bf16 %v2000_v17, %v1952_v52 }
 0x6a0   : > { %v2647_v20 = vpop.f32.mrf.mxu1 }
 0x6a1   : > { %2703 = vrot.lane.b32.xlu0 %v2702_v18, %s2791_s7 }
 0x6a2   : > { %v2003_v21 = vpop.f32.mrf.mxu1 }
 0x6a4   : > { %v2648_v58 = vpop.f32.mrf.mxu1 }
 0x6a6   : > { %v2096_v0 = vpop.f32.mrf.mxu1 }
 0x6a7   : > { %v2707_v40 = vpack.i.bf16 %v2096_v0, %v2048_v63 }
 0x6a8   : > { %v2659_v39 = vpop.f32.mrf.mxu1 }
 0x6a9   : > { %2708 = vrot.lane.b32.xlu1 %v2707_v40, %s2791_s7 }
 0x6aa   : > { %v2099_v56 = vpop.f32.mrf.mxu1 }
 0x6ac   : > { %v2660_v16 = vpop.f32.mrf.mxu1 }
 0x6d6   : > { %v2694_v57 = vpop.permute.xlu0 %2693 }
 0x6d7   : > { %v2696_v2 = vunpack.i.h.bf16 %v2694_v57  ;;  %v2695_v24 = vunpack.i.l.bf16 %v2694_v57 }
 0x6d9   : > { %v2135_v31 = vsel %vm350_vm3, %v3135_v48, %v2696_v2  ;;  %v2134_v30 = vsel %vm350_vm3, %v3131_v36, %v2695_v24 }
 0x6da   : > { %v2142_v33 = vpack.c.bf16 %v2135_v31, %v2134_v30 }
 0x6dc   : > { %2663 = vmatprep.mubr.msk.bf16.mxu0 %vm257_vm1, %v2142_v33 }
 0x6de   : > { %v2699_v34 = vpop.permute.xlu1 %2698 }
 0x6df   : > { %v2701_v44 = vunpack.i.h.bf16 %v2699_v34  ;;  %v2700_v46 = vunpack.i.l.bf16 %v2699_v34 }
 0x6e1   : > { %v2137_v41 = vsel %vm350_vm3, %v3137_v55, %v2701_v44  ;;  %v2136_v49 = vsel %vm350_vm3, %v3133_v47, %v2700_v46 }
 0x6e2   : > { %v2143_v45 = vpack.c.bf16 %v2137_v41, %v2136_v49 }
 0x6e4   : > { %2664 = vmatmul.mubr.msk.bf16.vlgmr.msra.gmra.mxu0 %vm257_vm1, %v2143_v45 }
 0x713   : > { %v2704_v29 = vpop.permute.xlu0 %2703 }
 0x714   : > { %v2706_v48 = vunpack.i.h.bf16 %v2704_v29  ;;  %v2705_v42 = vunpack.i.l.bf16 %v2704_v29 }
 0x716   : > { %v2139_v36 = vsel %vm350_vm3, %v3139_v59, %v2706_v48  ;;  %v2138_v43 = vsel %vm350_vm3, %v3141_v62, %v2705_v42 }
 0x717   : > { %v2144_v35 = vpack.c.bf16 %v2139_v36, %v2138_v43 }
 0x719   : > { %2667 = vmatprep.mubr.msk.bf16.mxu0 %vm257_vm1, %v2144_v35 }
 0x71b   : > { %v2709_v55 = vpop.permute.xlu1 %2708 }
 0x71c   : > { %v2711_v27 = vunpack.i.h.bf16 %v2709_v55  ;;  %v2710_v25 = vunpack.i.l.bf16 %v2709_v55 }
 0x71e   : > { %v2141_v47 = vsel %vm350_vm3, %v3146_v26, %v2711_v27  ;;  %v2140_v51 = vsel %vm350_vm3, %v3143_v15, %v2710_v25 }
 0x71f   : > { %v2145_v54 = vpack.c.bf16 %v2141_v47, %v2140_v51 }
 0x721   : > { %2668 = vmatmul.mubr.msk.bf16.gmra.mxu0 %vm257_vm1, %v2145_v54 }
 0x7a4   : > { %v2665_v50 = vpop.f32.mrf.mxu0 }
 0x7a5   : > { %v2228_v59 = vadd.f32 %v2665_v50, %v2372_v8 }
 0x7a6   : > { %v2195_v62 = vpop.f32.mrf.mxu0 }
 0x7a7   : > { %v2236_v15 = vpack.c.bf16 %v2228_v59, %v2228_v59  ;;  %v2226_v26 = vadd.f32 %v2368_v6, %v2195_v62 }
 0x7a8   : > { %v2666_v19 = vpop.f32.mrf.mxu0 }
 0x7a9   : > { %2245 = vst.msk [vmem:[%s3277_s10 + $0x8] sm:$0xf] %vm2242_vm6, %v2236_v15  ;;  %v2234_v8 = vpack.c.bf16 %v2226_v26, %v2226_v26  ;;  %v2229_v22 = vadd.f32 %v2666_v19, %v2373_v9 }
 0x7aa   : > { %v2198_v23 = vpop.f32.mrf.mxu0 }
 0x7ab   : > { %2243 = vst.msk [vmem:[%s3277_s10] sm:$0xf] %vm2242_vm6, %v2234_v8  ;;  %v2237_v37 = vpack.c.bf16 %v2229_v22, %v2229_v22  ;;  %v2227_v38 = vadd.f32 %v2369_v7, %v2198_v23 }
 0x7ad   : > { %2246 = vst.msk [vmem:[%s3277_s10 + $0xc] sm:$0xf] %vm2242_vm6, %v2237_v37  ;;  %v2235_v6 = vpack.c.bf16 %v2227_v38, %v2227_v38 }
 0x7af   : > { %2244 = vst.msk [vmem:[%s3277_s10 + $0x4] sm:$0xf] %vm2242_vm6, %v2235_v6 }
 0x7e1   : > { %v2669_v52 = vpop.f32.mrf.mxu0 }
 0x7e2   : > { %v2232_v4 = vadd.f32 %v2669_v52, %v2380_v13 }
 0x7e3   : > { %v2211_v9 = vpop.f32.mrf.mxu0 }
 0x7e4   : > { %v2240_v60 = vpack.c.bf16 %v2232_v4, %v2232_v4  ;;  %v2230_v61 = vadd.f32 %v2376_v11, %v2211_v9 }
 0x7e5   : > { %v2670_v28 = vpop.f32.mrf.mxu0 }
 0x7e6   : > { %2249 = vst.msk [vmem:[%s3277_s10 + $0x18] sm:$0xf] %vm2242_vm6, %v2240_v60  ;;  %v2238_v3 = vpack.c.bf16 %v2230_v61, %v2230_v61  ;;  %v2233_v7 = vadd.f32 %v2670_v28, %v2381_v14 }
 0x7e7   : > { %v2214_v63 = vpop.f32.mrf.mxu0 }
 0x7e8   : > { %2247 = vst.msk [vmem:[%s3277_s10 + $0x10] sm:$0xf] %vm2242_vm6, %v2238_v3  ;;  %v2241_v1 = vpack.c.bf16 %v2233_v7, %v2233_v7  ;;  %v2231_v32 = vadd.f32 %v2377_v12, %v2214_v63 }
 0x7ea   : > { %2250 = vst.msk [vmem:[%s3277_s10 + $0x1c] sm:$0xf] %vm2242_vm6, %v2241_v1  ;;  %v2239_v13 = vpack.c.bf16 %v2231_v32, %v2231_v32 }
 0x7ec   : > { %2248 = vst.msk [vmem:[%s3277_s10 + $0x14] sm:$0xf] %vm2242_vm6, %v2239_v13 }
 0x7ed PF: > { %s14_s15 = sadd.s32 1, %s2782_s15  }
 0x7ee   : > { %p11_p4 = scmp.ge.s32.totalorder %s14_s15, 4  }
 0x7f0   :  { %13 = sbr.rel (!%p11_p4) target bundleno = 1 (0x1), region = 66 }

// kernel: residual_axial_attention_block.5
= control target key start
LH: loop header
LB: loop body
LE: loop exit
PB: predicated region body
PF: predicated region fallthrough
CT: control target
= control target key end

     0   :  { %s4585_s15 = smov 0   ;;  %s4587_s16 = smov 0   ;;  %s5889_s0 = inlined_call_operand.vmem [shape: bf16[2,8,8,4], index: 0, kind: input, shape index: {}]   ;;  %s5890_s1 = inlined_call_operand.vmem [shape: f32[8,4], index: 1, kind: input, shape index: {}]   ;;  %s5891_s2 = inlined_call_operand.vmem [shape: bf16[4,12], index: 2, kind: input, shape index: {}]   ;;  %s5892_s3 = inlined_call_operand.vmem [shape: bf16[4,4], index: 3, kind: input, shape index: {}]   ;;  %s5893_s4 = inlined_call_operand.vmem [shape: bf16[2,8,8,4], index: 4, kind: output, shape index: {}]  }
   0x1   :  { %s4589_s17 = smov 0  }
   0x2 LB: > { %s26_s18 = sadd.s32 1, %s4546_s16  ;;  %p3904_p0 = scmp.ge.s32.totalorder %s4550_s17, 1  ;;  %s4550_s17 = sphi %s4589_s17, %s14_s17   ;;  %s4546_s16 = sphi %s4587_s16, %s6086_s16   ;;  %s4542_s15 = sphi %s4585_s15, %s6085_s15  }
   0x3   : > { %p28_p1 = scmp.ge.s32.totalorder %s26_s18, 2  ;;  %p181_p2 = scmp.lt.s32.totalorder %s4550_s17, 3 }
   0x5   : > { %s6088_s18 = smov (%p28_p1, %s26_s18), 0  ;;  %p182_p3 = pnand %p3904_p0, %p181_p2 }
   0x7   : > { %185 = sbr.rel (%p182_p3) target bundleno = 2171 (0x87b), region = 36 }
   0xc   : > { %v551_v0 = vld [vmem:[%s5891_s2] sm:$0x3]  ;;  %vm1025_vm0 = vcmask 1041408   ;;  %p213_p4 = scmp.lt.s32.totalorder %s4542_s15, 1  ;;  %vm890_vm1 = vcmask 1041409   ;;  %vm893_vm2 = vcmask 1042434  }
   0xd   : > { %4409 = vmatprep.subr.msk.bf16.mxu0 %vm1025_vm0, %v551_v0  ;;  %v1027_v1 = vsel %vm1025_vm0, %v551_v0, 0  ;;  %4410 = vmatprep.subr.msk.bf16.mxu1 %vm1025_vm0, %v551_v0  ;;  %v4612_v2 = vld [vmem:[%s5890_s1] sm:$0xff]  ;;  %vm896_vm3 = vcmask 1043459   ;;  %vm899_vm4 = vcmask 1044484   ;;  %vm902_vm5 = vcmask 1045509   ;;  %s4554_s27 = smov 124  }
   0xe   : > { %4196 = vmatpush3.bf16.msra.mxu0 %v1027_v1  ;;  %4408 = vmatpush3.bf16.msra.mxu1 %v1027_v1  ;;  %s6090_s15 = smov (!%p213_p4, %s4542_s15), 1  ;;  %v4618_v3 = vrot.slane %v4612_v2, 1  ;;  %v4621_v4 = vrot.slane %v4612_v2, 2  ;;  %v4624_v5 = vrot.slane %v4612_v2, 3  ;;  %v4634_v6 = vrot.slane %v4612_v2, 4  ;;  %s4555_s28 = smov 120  }
   0xf   : > { %s4063_s23 = sshll.u32 %s6090_s15, 5  ;;  %v4637_v7 = vrot.slane %v4612_v2, 5  ;;  %v4640_v8 = vrot.slane %v4612_v2, 6  ;;  %v4643_v9 = vrot.slane %v4612_v2, 7  ;;  %vm905_vm6 = vcmask 1046534   ;;  %s4556_s29 = smov 122  }
  0x10   : > { %s4631_s26 = scalar_lea.vmem %s5889_s0, %s4063_s23  ;;  %vm908_vm7 = vcmask 1047559   ;;  %vm1012_vm8 = vcmask 31744   ;;  %vm4553_vm9 = vmmov 0   ;;  %vm1105_vm10 = vcmask 15360   ;;  %s4557_s30 = smov 126  }
  0x11   : > { %v4646_v10 = vld [vmem:[%s4631_s26] sm:$0x1]  ;;  %v4649_v11 = vld [vmem:[%s4631_s26 + $0x4] sm:$0x1]  ;;  %v4652_v12 = vld [vmem:[%s4631_s26 + $0x8] sm:$0x1]  ;;  %s5478_s11 = scalar_lea.vmem %s5893_s4, %s4063_s23 }
  0x12   : > { %v4655_v13 = vld [vmem:[%s4631_s26 + $0xc] sm:$0x1]  ;;  %v4658_v14 = vld [vmem:[%s4631_s26 + $0x10] sm:$0x1]  ;;  %v4661_v15 = vld [vmem:[%s4631_s26 + $0x14] sm:$0x1]  ;;  %v5904_v16 = vunpack.c.l.bf16 %v4646_v10  ;;  %v5903_v17 = vunpack.c.l.bf16 %v4649_v11  ;;  %v5902_v18 = vunpack.c.l.bf16 %v4652_v12 }
  0x13   : > { %v4667_v19 = vld [vmem:[%s4631_s26 + $0x18] sm:$0x1]  ;;  %v4670_v20 = vld [vmem:[%s4631_s26 + $0x1c] sm:$0x1]  ;;  %v263_v21 = vshrl.u32 %v4646_v10, 16  ;;  %v268_v22 = vshrl.u32 %v4649_v11, 16  ;;  %v5898_v23 = vunpack.c.l.bf16 %v4655_v13  ;;  %v5897_v24 = vunpack.c.l.bf16 %v4658_v14 }
  0x14   : > { %v273_v25 = vshrl.u32 %v4652_v12, 16  ;;  %v278_v26 = vshrl.u32 %v4655_v13, 16  ;;  %v283_v27 = vshrl.u32 %v4658_v14, 16  ;;  %v288_v28 = vshrl.u32 %v4661_v15, 16  ;;  %s4558_s5 = smov 118   ;;  %s4559_s8 = smov 2  }
  0x15   : > { %v293_v29 = vshrl.u32 %v4667_v19, 16  ;;  %v298_v30 = vshrl.u32 %v4670_v20, 16  ;;  %v5896_v31 = vunpack.c.l.bf16 %v4661_v15  ;;  %v5895_v32 = vunpack.c.l.bf16 %v4667_v19 }
  0x16   : > { %v5894_v33 = vunpack.c.l.bf16 %v4670_v20  ;;  %v4685_v34 = vunpack.c.l.bf16 %v263_v21  ;;  %v4687_v35 = vunpack.c.l.bf16 %v268_v22  ;;  %v4689_v36 = vunpack.c.l.bf16 %v273_v25 }
  0x17   : > { %v4691_v37 = vunpack.c.l.bf16 %v278_v26  ;;  %v4693_v38 = vunpack.c.l.bf16 %v283_v27  ;;  %v4695_v39 = vunpack.c.l.bf16 %v288_v28  ;;  %v4697_v40 = vunpack.c.l.bf16 %v293_v29 }
  0x18   : > { %5961 = vst [vmem:[#allocation2_spill] sm:$0xff] %v4685_v34  ;;  %5962 = vst [vmem:[#allocation3_spill] sm:$0xff] %v4687_v35  ;;  %v4699_v41 = vunpack.c.l.bf16 %v298_v30  ;;  %v633_v42 = vadd.f32 %v5904_v16, %v4612_v2  ;;  %v634_v43 = vadd.f32 %v4618_v3, %v5903_v17  ;;  %v635_v44 = vadd.f32 %v4621_v4, %v5902_v18 }
  0x19   : > { %5963 = vst [vmem:[#allocation4_spill] sm:$0xff] %v4689_v36  ;;  %5964 = vst [vmem:[#allocation5_spill] sm:$0xff] %v4691_v37  ;;  %v636_v45 = vadd.f32 %v4624_v5, %v5898_v23  ;;  %v637_v46 = vadd.f32 %v4634_v6, %v5897_v24  ;;  %v638_v47 = vadd.f32 %v4637_v7, %v5896_v31  ;;  %vm1597_vm11 = vcmask 1043456  }
  0x1a   : > { %5965 = vst [vmem:[#allocation6_spill] sm:$0xff] %v4693_v38  ;;  %5966 = vst [vmem:[#allocation7_spill] sm:$0xff] %v4695_v39  ;;  %v639_v48 = vadd.f32 %v4640_v8, %v5895_v32  ;;  %v640_v49 = vadd.f32 %v4643_v9, %v5894_v33  ;;  %v641_v50 = vadd.f32 %v4685_v34, %v4612_v2  ;;  %vm1495_vm12 = vcmask 64512  }
  0x1b   : > { %5967 = vst [vmem:[#allocation8_spill] sm:$0xff] %v4697_v40  ;;  %5968 = vst [vmem:[#allocation9_spill] sm:$0xff] %v4699_v41  ;;  %v642_v51 = vadd.f32 %v4618_v3, %v4687_v35  ;;  %v643_v52 = vadd.f32 %v4621_v4, %v4689_v36  ;;  %v644_v53 = vadd.f32 %v4624_v5, %v4691_v37  ;;  %vm3386_vm13 = vcmask 25601  }
  0x1c   : > { %v645_v54 = vadd.f32 %v4634_v6, %v4693_v38  ;;  %v646_v55 = vadd.f32 %v4637_v7, %v4695_v39  ;;  %v647_v56 = vadd.f32 %v4640_v8, %v4697_v40  ;;  %v648_v57 = vadd.f32 %v4643_v9, %v4699_v41 }
  0x1d   : > { %v697_v58 = vpack.c.bf16 %v633_v42, %v633_v42  ;;  %v698_v59 = vpack.c.bf16 %v634_v43, %v634_v43  ;;  %v699_v60 = vpack.c.bf16 %v635_v44, %v635_v44  ;;  %v700_v61 = vpack.c.bf16 %v636_v45, %v636_v45 }
  0x1e   : > { %v701_v62 = vpack.c.bf16 %v637_v46, %v637_v46  ;;  %v702_v63 = vpack.c.bf16 %v638_v47, %v638_v47  ;;  %v703_v0 = vpack.c.bf16 %v639_v48, %v639_v48  ;;  %v704_v1 = vpack.c.bf16 %v640_v49, %v640_v49 }
  0x1f   : > { %v705_v21 = vpack.c.bf16 %v641_v50, %v641_v50  ;;  %v706_v22 = vpack.c.bf16 %v642_v51, %v642_v51  ;;  %v707_v25 = vpack.c.bf16 %v643_v52, %v643_v52  ;;  %v708_v26 = vpack.c.bf16 %v644_v53, %v644_v53 }
  0x20   : > { %v709_v27 = vpack.c.bf16 %v645_v54, %v645_v54  ;;  %v710_v28 = vpack.c.bf16 %v646_v55, %v646_v55  ;;  %v711_v29 = vpack.c.bf16 %v647_v56, %v647_v56  ;;  %v712_v30 = vpack.c.bf16 %v648_v57, %v648_v57 }
  0x21   : > { %v825_v42 = vunpack.c.l.b16 %v697_v58  ;;  %v826_v43 = vunpack.c.l.b16 %v698_v59  ;;  %v827_v44 = vunpack.c.l.b16 %v699_v60  ;;  %v828_v45 = vunpack.c.l.b16 %v700_v61 }
  0x22   : > { %v829_v46 = vunpack.c.l.b16 %v701_v62  ;;  %v830_v47 = vunpack.c.l.b16 %v702_v63  ;;  %v831_v48 = vunpack.c.l.b16 %v703_v0  ;;  %v832_v33 = vunpack.c.l.b16 %v704_v1 }
  0x23   : > { %v833_v49 = vunpack.c.l.b16 %v705_v21  ;;  %v834_v50 = vunpack.c.l.b16 %v706_v22  ;;  %v835_v51 = vunpack.c.l.b16 %v707_v25  ;;  %v836_v52 = vunpack.c.l.b16 %v708_v26 }
  0x24   : > { %v837_v32 = vunpack.c.l.b16 %v709_v27  ;;  %v838_v53 = vunpack.c.l.b16 %v710_v28  ;;  %v839_v54 = vunpack.c.l.b16 %v711_v29  ;;  %v840_v55 = vunpack.c.l.b16 %v712_v30  ;;  %v238_v30 = vld [vmem:[%s4631_s26] sm:$0x2] }
  0x25   : > { %v889_v56 = vrot.slane %v826_v43, 7  ;;  %v892_v31 = vrot.slane %v827_v44, 6  ;;  %v895_v57 = vrot.slane %v828_v45, 5  ;;  %v898_v58 = vrot.slane %v829_v46, 4  ;;  %v240_v45 = vld [vmem:[%s4631_s26 + $0x8] sm:$0x2] }
  0x26   : > { %v901_v59 = vrot.slane %v830_v47, 3  ;;  %v904_v60 = vrot.slane %v831_v48, 2  ;;  %v910_v62 = vrot.slane %v834_v50, 7  ;;  %v912_v63 = vrot.slane %v835_v51, 6  ;;  %v242_v48 = vld [vmem:[%s4631_s26 + $0x10] sm:$0x2] }
  0x27   : > { %v891_v61 = vsel %vm890_vm1, %v889_v56, %v825_v42  ;;  %v914_v0 = vrot.slane %v836_v52, 5  ;;  %v907_v21 = vrot.slane %v832_v33, 1  ;;  %v916_v22 = vrot.slane %v837_v32, 4  ;;  %v239_v42 = vld [vmem:[%s4631_s26 + $0x4] sm:$0x2] }
  0x28   : > { %v894_v1 = vsel %vm893_vm2, %v892_v31, %v891_v61  ;;  %v918_v25 = vrot.slane %v838_v53, 3  ;;  %v911_v27 = vsel %vm890_vm1, %v910_v62, %v833_v49  ;;  %v920_v28 = vrot.slane %v839_v54, 2  ;;  %v241_v31 = vld [vmem:[%s4631_s26 + $0xc] sm:$0x2]  ;;  %v243_v49 = vld [vmem:[%s4631_s26 + $0x14] sm:$0x2] }
  0x29   : > { %v897_v26 = vsel %vm896_vm3, %v895_v57, %v894_v1  ;;  %v922_v29 = vrot.slane %v840_v55, 1  ;;  %v913_v44 = vsel %vm893_vm2, %v912_v63, %v911_v27  ;;  %v3917_v33 = vrot.slane %v238_v30, 9  ;;  %v244_v54 = vld [vmem:[%s4631_s26 + $0x18] sm:$0x2]  ;;  %v245_v63 = vld [vmem:[%s4631_s26 + $0x1c] sm:$0x2] }
  0x2a   : > { %v900_v43 = vsel %vm899_vm4, %v898_v58, %v897_v26  ;;  %v3918_v32 = vrot.slane %v239_v42, 9  ;;  %v915_v47 = vsel %vm896_vm3, %v914_v0, %v913_v44  ;;  %v3919_v50 = vrot.slane %v240_v45, 9 }
  0x2b   : > { %v903_v46 = vsel %vm902_vm5, %v901_v59, %v900_v43  ;;  %v3920_v51 = vrot.slane %v241_v31, 9  ;;  %v917_v53 = vsel %vm899_vm4, %v916_v22, %v915_v47  ;;  %v3921_v55 = vrot.slane %v242_v48, 9 }
  0x2c   : > { %v906_v52 = vsel %vm905_vm6, %v904_v60, %v903_v46  ;;  %v3922_v56 = vrot.slane %v243_v49, 9  ;;  %v919_v58 = vsel %vm902_vm5, %v918_v25, %v917_v53  ;;  %v3923_v61 = vrot.slane %v244_v54, 9 }
  0x2d   : > { %v909_v57 = vsel %vm908_vm7, %v907_v21, %v906_v52  ;;  %v343_v59 = vshrl.u32 %v238_v30, 16  ;;  %v921_v62 = vsel %vm905_vm6, %v920_v28, %v919_v58  ;;  %v348_v0 = vshrl.u32 %v239_v42, 16 }
  0x2e   : > { %v353_v1 = vshrl.u32 %v240_v45, 16  ;;  %v358_v26 = vshrl.u32 %v241_v31, 16  ;;  %v923_v27 = vsel %vm908_vm7, %v922_v29, %v921_v62  ;;  %v3924_v60 = vrot.slane %v245_v63, 9 }
  0x2f   : > { %v363_v43 = vshrl.u32 %v242_v48, 16  ;;  %v368_v22 = vshrl.u32 %v243_v49, 16  ;;  %v1008_v44 = vpack.c.b16 %v923_v27, %v909_v57  ;;  %v4763_v46 = vrot.slane %v343_v59, 9 }
  0x30   : > { %v4765_v47 = vrot.slane %v348_v0, 9  ;;  %v4767_v21 = vrot.slane %v353_v1, 9  ;;  %v4769_v25 = vrot.slane %v358_v26, 9  ;;  %v373_v28 = vshrl.u32 %v244_v54, 16 }
  0x31   : > { %v4771_v30 = vrot.slane %v363_v43, 9  ;;  %v378_v42 = vshrl.u32 %v245_v63, 16  ;;  %4197 = vmatprep.mubr.msk.bf16.mxu0 %vm1012_vm8, %v1008_v44  ;;  %v4774_v45 = vrot.slane %v368_v22, 9  ;;  %v4776_v29 = vunpack.c.l.bf16 %v3918_v32 }
  0x32   : > { %v4778_v31 = vunpack.c.l.bf16 %v3919_v50  ;;  %v4780_v48 = vunpack.c.l.bf16 %v3920_v51  ;;  %v4782_v49 = vrot.slane %v373_v28, 9  ;;  %v4786_v53 = vunpack.c.l.bf16 %v3921_v55 }
  0x33   : > { %5969 = vst [vmem:[#allocation10_spill] sm:$0xff] %v4771_v30  ;;  %5970 = vst [vmem:[#allocation11_spill] sm:$0xff] %v4774_v45  ;;  %v4784_v52 = vrot.slane %v378_v42, 9  ;;  %v4788_v57 = vunpack.c.l.bf16 %v3922_v56  ;;  %v4790_v54 = vunpack.c.l.bf16 %v3917_v33  ;;  %v4792_v58 = vunpack.c.l.bf16 %v3923_v61 }
  0x34   : > { %5971 = vst [vmem:[#allocation12_spill] sm:$0xff] %v4782_v49  ;;  %v4794_v59 = vunpack.c.l.bf16 %v3924_v60  ;;  %v5899_v32 = vunpack.c.l.bf16 %v4765_v47  ;;  %v5900_v50 = vunpack.c.l.bf16 %v4763_v46  ;;  %v5901_v51 = vunpack.c.l.bf16 %v4767_v21 }
  0x35   : > { %5972 = vst [vmem:[#allocation13_spill] sm:$0xff] %v4784_v52  ;;  %v5905_v62 = vunpack.c.l.bf16 %v4769_v25  ;;  %v5909_v63 = vunpack.c.l.bf16 %v4771_v30  ;;  %v5913_v55 = vunpack.c.l.bf16 %v4774_v45  ;;  %v5917_v56 = vunpack.c.l.bf16 %v4782_v49 }
  0x36   : > { %v5921_v33 = vunpack.c.l.bf16 %v4784_v52  ;;  %v650_v61 = vadd.f32 %v4618_v3, %v4776_v29  ;;  %v651_v0 = vadd.f32 %v4621_v4, %v4778_v31  ;;  %v652_v1 = vadd.f32 %v4624_v5, %v4780_v48 }
  0x37   : > { %v653_v26 = vadd.f32 %v4634_v6, %v4786_v53  ;;  %v654_v27 = vadd.f32 %v4637_v7, %v4788_v57  ;;  %v649_v60 = vadd.f32 %v4790_v54, %v4612_v2  ;;  %v655_v43 = vadd.f32 %v4640_v8, %v4792_v58 }
  0x38   : > { %v656_v22 = vadd.f32 %v4643_v9, %v4794_v59  ;;  %v658_v44 = vadd.f32 %v4618_v3, %v5899_v32  ;;  %v657_v28 = vadd.f32 %v5900_v50, %v4612_v2  ;;  %v659_v42 = vadd.f32 %v4621_v4, %v5901_v51 }
  0x39   : > { %v660_v24 = vadd.f32 %v4624_v5, %v5905_v62  ;;  %v661_v23 = vadd.f32 %v4634_v6, %v5909_v63  ;;  %v662_v32 = vadd.f32 %v4637_v7, %v5913_v55  ;;  %v663_v50 = vadd.f32 %v4640_v8, %v5917_v56 }
  0x3a   : > { %v664_v51 = vadd.f32 %v4643_v9, %v5921_v33  ;;  %v714_v18 = vpack.c.bf16 %v650_v61, %v650_v61  ;;  %v715_v17 = vpack.c.bf16 %v651_v0, %v651_v0  ;;  %v716_v16 = vpack.c.bf16 %v652_v1, %v652_v1 }
  0x3b   : > { %v717_v62 = vpack.c.bf16 %v653_v26, %v653_v26  ;;  %v718_v41 = vpack.c.bf16 %v654_v27, %v654_v27  ;;  %v713_v40 = vpack.c.bf16 %v649_v60, %v649_v60  ;;  %v719_v39 = vpack.c.bf16 %v655_v43, %v655_v43 }
  0x3c   : > { %v720_v63 = vpack.c.bf16 %v656_v22, %v656_v22  ;;  %v722_v38 = vpack.c.bf16 %v658_v44, %v658_v44  ;;  %v721_v37 = vpack.c.bf16 %v657_v28, %v657_v28  ;;  %v723_v36 = vpack.c.bf16 %v659_v42, %v659_v42 }
  0x3d   : > { %v724_v55 = vpack.c.bf16 %v660_v24, %v660_v24  ;;  %v725_v35 = vpack.c.bf16 %v661_v23, %v661_v23  ;;  %v726_v34 = vpack.c.bf16 %v662_v32, %v662_v32  ;;  %v727_v49 = vpack.c.bf16 %v663_v50, %v663_v50 }
  0x3e   : > { %v728_v56 = vpack.c.bf16 %v664_v51, %v664_v51  ;;  %v842_v45 = vunpack.c.l.b16 %v714_v18  ;;  %v843_v52 = vunpack.c.l.b16 %v715_v17  ;;  %v844_v30 = vunpack.c.l.b16 %v716_v16 }
  0x3f   : > { %v845_v33 = vunpack.c.l.b16 %v717_v62  ;;  %v846_v61 = vunpack.c.l.b16 %v718_v41  ;;  %v841_v0 = vunpack.c.l.b16 %v713_v40  ;;  %v847_v1 = vunpack.c.l.b16 %v719_v39 }
  0x40   : > { %v848_v26 = vunpack.c.l.b16 %v720_v63  ;;  %v850_v27 = vunpack.c.l.b16 %v722_v38  ;;  %v849_v60 = vunpack.c.l.b16 %v721_v37  ;;  %v851_v43 = vunpack.c.l.b16 %v723_v36 }
  0x41   : > { %v852_v22 = vunpack.c.l.b16 %v724_v55  ;;  %v853_v44 = vunpack.c.l.b16 %v725_v35  ;;  %v854_v28 = vunpack.c.l.b16 %v726_v34  ;;  %v855_v42 = vunpack.c.l.b16 %v727_v49  ;;  %v247_v55 = vld [vmem:[%s4631_s26 + $0x4] sm:$0x4] }
  0x42   : > { %v924_v24 = vrot.slane %v842_v45, 7  ;;  %v926_v23 = vrot.slane %v843_v52, 6  ;;  %v856_v32 = vunpack.c.l.b16 %v728_v56  ;;  %v928_v50 = vrot.slane %v844_v30, 5  ;;  %v246_v52 = vld [vmem:[%s4631_s26] sm:$0x4] }
  0x43   : > { %v930_v18 = vrot.slane %v845_v33, 4  ;;  %v932_v17 = vrot.slane %v846_v61, 3  ;;  %v934_v40 = vrot.slane %v847_v1, 2  ;;  %v938_v39 = vrot.slane %v850_v27, 7  ;;  %v248_v56 = vld [vmem:[%s4631_s26 + $0x8] sm:$0x4] }
  0x44   : > { %v925_v16 = vsel %vm890_vm1, %v924_v24, %v841_v0  ;;  %v940_v38 = vrot.slane %v851_v43, 6  ;;  %v936_v37 = vrot.slane %v848_v26, 1  ;;  %v942_v34 = vrot.slane %v852_v22, 5  ;;  %v249_v1 = vld [vmem:[%s4631_s26 + $0xc] sm:$0x4] }
  0x45   : > { %v927_v36 = vsel %vm893_vm2, %v926_v23, %v925_v16  ;;  %v944_v35 = vrot.slane %v853_v44, 4  ;;  %v939_v30 = vsel %vm890_vm1, %v938_v39, %v849_v60  ;;  %v946_v45 = vrot.slane %v854_v28, 3  ;;  %v250_v26 = vld [vmem:[%s4631_s26 + $0x10] sm:$0x4]  ;;  %v251_v44 = vld [vmem:[%s4631_s26 + $0x14] sm:$0x4] }
  0x46   : > { %v929_v41 = vsel %vm896_vm3, %v928_v50, %v927_v36  ;;  %v948_v49 = vrot.slane %v855_v42, 2  ;;  %v941_v62 = vsel %vm893_vm2, %v940_v38, %v939_v30  ;;  %v950_v63 = vrot.slane %v856_v32, 1  ;;  %v252_v28 = vld [vmem:[%s4631_s26 + $0x18] sm:$0x4] }
  0x47   : > { %v931_v51 = vsel %vm899_vm4, %v930_v18, %v929_v41  ;;  %v3933_v33 = vrot.slane %v246_v52, 10  ;;  %v943_v0 = vsel %vm896_vm3, %v942_v34, %v941_v62  ;;  %v3934_v27 = vrot.slane %v247_v55, 10 }
  0x48   : > { %v933_v61 = vsel %vm902_vm5, %v932_v17, %v931_v51  ;;  %v3935_v60 = vrot.slane %v248_v56, 10  ;;  %v945_v22 = vsel %vm899_vm4, %v944_v35, %v943_v0  ;;  %v3936_v42 = vrot.slane %v249_v1, 10 }
  0x49   : > { %v935_v43 = vsel %vm905_vm6, %v934_v40, %v933_v61  ;;  %v3937_v24 = vrot.slane %v250_v26, 10  ;;  %v947_v32 = vsel %vm902_vm5, %v946_v45, %v945_v22  ;;  %v3938_v50 = vrot.slane %v251_v44, 10  ;;  %v253_v40 = vld [vmem:[%s4631_s26 + $0x1c] sm:$0x4] }
  0x4a   : > { %v937_v23 = vsel %vm908_vm7, %v936_v37, %v935_v43  ;;  %v3939_v18 = vrot.slane %v252_v28, 10  ;;  %v949_v17 = vsel %vm905_vm6, %v948_v49, %v947_v32  ;;  %v423_v16 = vshrl.u32 %v246_v52, 16 }
  0x4b   : > { %v428_v39 = vshrl.u32 %v247_v55, 16  ;;  %v433_v38 = vshrl.u32 %v248_v56, 16  ;;  %v951_v36 = vsel %vm908_vm7, %v950_v63, %v949_v17  ;;  %v438_v34 = vshrl.u32 %v249_v1, 16 }
  0x4c   : > { %v443_v35 = vshrl.u32 %v250_v26, 16  ;;  %v448_v41 = vshrl.u32 %v251_v44, 16  ;;  %v1009_v30 = vpack.c.b16 %v951_v36, %v937_v23  ;;  %v3940_v51 = vrot.slane %v253_v40, 10 }
  0x4d   : > { %v4866_v62 = vrot.slane %v423_v16, 10  ;;  %v4868_v37 = vrot.slane %v428_v39, 10  ;;  %v4870_v45 = vrot.slane %v433_v38, 10  ;;  %v4872_v61 = vrot.slane %v438_v34, 10 }
  0x4e   : > { %v4874_v49 = vrot.slane %v443_v35, 10  ;;  %v453_v52 = vshrl.u32 %v252_v28, 16  ;;  %4198 = vmatmul.mubr.msk.bf16.vlgmr.msra.gmra.mxu0 %vm1012_vm8, %v1009_v30  ;;  %v4877_v63 = vrot.slane %v448_v41, 10  ;;  %v458_v55 = vshrl.u32 %v253_v40, 16 }
  0x4f   : > { %5973 = vst [vmem:[#allocation14_spill] sm:$0xff] %v4866_v62  ;;  %5974 = vst [vmem:[#allocation15_spill] sm:$0xff] %v4868_v37  ;;  %v4879_v56 = vunpack.c.l.bf16 %v3933_v33  ;;  %v4881_v0 = vunpack.c.l.bf16 %v3934_v27  ;;  %v4885_v26 = vunpack.c.l.bf16 %v3935_v60  ;;  %v4887_v43 = vunpack.c.l.bf16 %v3936_v42 }
  0x50   : > { %5975 = vst [vmem:[#allocation16_spill] sm:$0xff] %v4870_v45  ;;  %5976 = vst [vmem:[#allocation17_spill] sm:$0xff] %v4872_v61  ;;  %v4883_v1 = vrot.slane %v453_v52, 10  ;;  %v4889_v22 = vunpack.c.l.bf16 %v3937_v24  ;;  %v4891_v44 = vrot.slane %v458_v55, 10  ;;  %v4893_v28 = vunpack.c.l.bf16 %v3938_v50 }
  0x51   : > { %5977 = vst [vmem:[#allocation18_spill] sm:$0xff] %v4874_v49  ;;  %5978 = vst [vmem:[#allocation19_spill] sm:$0xff] %v4877_v63  ;;  %v4895_v23 = vunpack.c.l.bf16 %v3939_v18  ;;  %v4897_v32 = vunpack.c.l.bf16 %v3940_v51  ;;  %v5922_v33 = vunpack.c.l.bf16 %v4868_v37  ;;  %v5923_v27 = vunpack.c.l.bf16 %v4870_v45 }
  0x52   : > { %5979 = vst [vmem:[#allocation20_spill] sm:$0xff] %v4879_v56  ;;  %5980 = vst [vmem:[#allocation21_spill] sm:$0xff] %v4881_v0  ;;  %v5925_v17 = vunpack.c.l.bf16 %v4872_v61  ;;  %v5929_v60 = vunpack.c.l.bf16 %v4874_v49  ;;  %v5933_v42 = vunpack.c.l.bf16 %v4866_v62  ;;  %v5937_v24 = vunpack.c.l.bf16 %v4877_v63 }
  0x53   : > { %5981 = vst [vmem:[#allocation22_spill] sm:$0xff] %v4883_v1  ;;  %5982 = vst [vmem:[#allocation23_spill] sm:$0xff] %v4885_v26  ;;  %v5941_v16 = vunpack.c.l.bf16 %v4883_v1  ;;  %v666_v18 = vadd.f32 %v4618_v3, %v4881_v0  ;;  %v667_v39 = vadd.f32 %v4621_v4, %v4885_v26  ;;  %v668_v38 = vadd.f32 %v4624_v5, %v4887_v43 }
  0x54   : > { %5983 = vst [vmem:[#allocation24_spill] sm:$0xff] %v4887_v43  ;;  %5984 = vst [vmem:[#allocation25_spill] sm:$0xff] %v4889_v22  ;;  %v669_v36 = vadd.f32 %v4634_v6, %v4889_v22  ;;  %v665_v40 = vadd.f32 %v4879_v56, %v4612_v2  ;;  %v670_v34 = vadd.f32 %v4637_v7, %v4893_v28  ;;  %v5989_v61 = vunpack.c.l.bf16 %v4891_v44 }
  0x55   : > { %5985 = vst [vmem:[#allocation26_spill] sm:$0xff] %v4891_v44  ;;  %5986 = vst [vmem:[#allocation27_spill] sm:$0xff] %v4893_v28  ;;  %v671_v35 = vadd.f32 %v4640_v8, %v4895_v23  ;;  %v672_v41 = vadd.f32 %v4643_v9, %v4897_v32  ;;  %v674_v30 = vadd.f32 %v4618_v3, %v5922_v33  ;;  %vm3387_vm14 = vsmask.f32 1280 }
  0x56   : > { %5987 = vst [vmem:[#allocation28_spill] sm:$0xff] %v4895_v23  ;;  %5988 = vst [vmem:[#allocation29_spill] sm:$0xff] %v4897_v32  ;;  %v675_v51 = vadd.f32 %v4621_v4, %v5923_v27  ;;  %v676_v52 = vadd.f32 %v4624_v5, %v5925_v17  ;;  %v677_v55 = vadd.f32 %v4634_v6, %v5929_v60  ;;  %vm3237_vm15 = vcmask 24576  }
  0x57   : > { %v673_v50 = vadd.f32 %v5933_v42, %v4612_v2  ;;  %v678_v33 = vadd.f32 %v4637_v7, %v5937_v24  ;;  %v679_v27 = vadd.f32 %v4640_v8, %v5941_v16  ;;  %v680_v17 = vadd.f32 %v4643_v9, %v5989_v61 }
  0x58   : > { %v730_v45 = vpack.c.bf16 %v666_v18, %v666_v18  ;;  %v731_v49 = vpack.c.bf16 %v667_v39, %v667_v39  ;;  %v732_v37 = vpack.c.bf16 %v668_v38, %v668_v38  ;;  %v733_v60 = vpack.c.bf16 %v669_v36, %v669_v36 }
  0x59   : > { %v729_v32 = vpack.c.bf16 %v665_v40, %v665_v40  ;;  %v734_v23 = vpack.c.bf16 %v670_v34, %v670_v34  ;;  %v735_v62 = vpack.c.bf16 %v671_v35, %v671_v35  ;;  %v736_v42 = vpack.c.bf16 %v672_v41, %v672_v41 }
  0x5a   : > { %v738_v28 = vpack.c.bf16 %v674_v30, %v674_v30  ;;  %v739_v63 = vpack.c.bf16 %v675_v51, %v675_v51  ;;  %v740_v22 = vpack.c.bf16 %v676_v52, %v676_v52  ;;  %v741_v24 = vpack.c.bf16 %v677_v55, %v677_v55 }
  0x5b   : > { %v737_v43 = vpack.c.bf16 %v673_v50, %v673_v50  ;;  %v742_v1 = vpack.c.bf16 %v678_v33, %v678_v33  ;;  %v743_v26 = vpack.c.bf16 %v679_v27, %v679_v27  ;;  %v744_v16 = vpack.c.bf16 %v680_v17, %v680_v17 }
  0x5c   : > { %v858_v0 = vunpack.c.l.b16 %v730_v45  ;;  %v859_v44 = vunpack.c.l.b16 %v731_v49  ;;  %v860_v56 = vunpack.c.l.b16 %v732_v37  ;;  %v861_v61 = vunpack.c.l.b16 %v733_v60  ;;  %v254_v60 = vld [vmem:[%s4631_s26] sm:$0x8] }
  0x5d   : > { %v857_v18 = vunpack.c.l.b16 %v729_v32  ;;  %v862_v39 = vunpack.c.l.b16 %v734_v23  ;;  %v863_v38 = vunpack.c.l.b16 %v735_v62  ;;  %v864_v36 = vunpack.c.l.b16 %v736_v42 }
  0x5e   : > { %v866_v40 = vunpack.c.l.b16 %v738_v28  ;;  %v867_v34 = vunpack.c.l.b16 %v739_v63  ;;  %v868_v35 = vunpack.c.l.b16 %v740_v22  ;;  %v869_v41 = vunpack.c.l.b16 %v741_v24 }
  0x5f   : > { %v865_v30 = vunpack.c.l.b16 %v737_v43  ;;  %v870_v51 = vunpack.c.l.b16 %v742_v1  ;;  %v871_v52 = vunpack.c.l.b16 %v743_v26  ;;  %v952_v55 = vrot.slane %v858_v0, 7 }
  0x60   : > { %v872_v50 = vunpack.c.l.b16 %v744_v16  ;;  %v954_v33 = vrot.slane %v859_v44, 6  ;;  %v956_v27 = vrot.slane %v860_v56, 5  ;;  %v958_v17 = vrot.slane %v861_v61, 4  ;;  %v255_v61 = vld [vmem:[%s4631_s26 + $0x4] sm:$0x8] }
  0x61   : > { %v953_v37 = vsel %vm890_vm1, %v952_v55, %v857_v18  ;;  %v960_v45 = vrot.slane %v862_v39, 3  ;;  %v962_v49 = vrot.slane %v863_v38, 2  ;;  %v966_v23 = vrot.slane %v866_v40, 7  ;;  %v256_v18 = vld [vmem:[%s4631_s26 + $0x8] sm:$0x8] }
  0x62   : > { %v955_v62 = vsel %vm893_vm2, %v954_v33, %v953_v37  ;;  %v968_v63 = vrot.slane %v867_v34, 6  ;;  %v970_v22 = vrot.slane %v868_v35, 5  ;;  %v972_v43 = vrot.slane %v869_v41, 4  ;;  %v257_v40 = vld [vmem:[%s4631_s26 + $0xc] sm:$0x8] }
  0x63   : > { %v957_v1 = vsel %vm896_vm3, %v956_v27, %v955_v62  ;;  %v964_v0 = vrot.slane %v864_v36, 1  ;;  %v967_v56 = vsel %vm890_vm1, %v966_v23, %v865_v30  ;;  %v974_v26 = vrot.slane %v870_v51, 3  ;;  %v258_v34 = vld [vmem:[%s4631_s26 + $0x10] sm:$0x8]  ;;  %v260_v27 = vld [vmem:[%s4631_s26 + $0x18] sm:$0x8] }
  0x64   : > { %v959_v44 = vsel %vm899_vm4, %v958_v17, %v957_v1  ;;  %v969_v28 = vsel %vm893_vm2, %v968_v63, %v967_v56  ;;  %v976_v32 = vrot.slane %v871_v52, 2  ;;  %v978_v16 = vrot.slane %v872_v50, 1  ;;  %v259_v52 = vld [vmem:[%s4631_s26 + $0x14] sm:$0x8]  ;;  %v261_v23 = vld [vmem:[%s4631_s26 + $0x1c] sm:$0x8] }
  0x65   : > { %v961_v42 = vsel %vm902_vm5, %v960_v45, %v959_v44  ;;  %v971_v24 = vsel %vm896_vm3, %v970_v22, %v969_v28  ;;  %v3949_v39 = vrot.slane %v254_v60, 11  ;;  %v3950_v35 = vrot.slane %v255_v61, 11 }
  0x66   : > { %v963_v38 = vsel %vm905_vm6, %v962_v49, %v961_v42  ;;  %v973_v36 = vsel %vm899_vm4, %v972_v43, %v971_v24  ;;  %v3951_v41 = vrot.slane %v256_v18, 11  ;;  %v3952_v55 = vrot.slane %v257_v40, 11 }
  0x67   : > { %v965_v30 = vsel %vm908_vm7, %v964_v0, %v963_v38  ;;  %v975_v51 = vsel %vm902_vm5, %v974_v26, %v973_v36  ;;  %v3953_v50 = vrot.slane %v258_v34, 11  ;;  %v3954_v17 = vrot.slane %v259_v52, 11 }
  0x68   : > { %v977_v33 = vsel %vm905_vm6, %v976_v32, %v975_v51  ;;  %v503_v37 = vshrl.u32 %v254_v60, 16  ;;  %v508_v45 = vshrl.u32 %v255_v61, 16  ;;  %v513_v62 = vshrl.u32 %v256_v18, 16 }
  0x69   : > { %v979_v49 = vsel %vm908_vm7, %v978_v16, %v977_v33  ;;  %v518_v63 = vshrl.u32 %v257_v40, 16  ;;  %v523_v22 = vshrl.u32 %v258_v34, 16  ;;  %v3955_v1 = vrot.slane %v260_v27, 11 }
  0x6a   : > { %v1010_v43 = vpack.c.b16 %v979_v49, %v965_v30  ;;  %v3956_v0 = vrot.slane %v261_v23, 11  ;;  %v528_v56 = vshrl.u32 %v259_v52, 16  ;;  %v4969_v26 = vrot.slane %v508_v45, 11 }
  0x6b   : > { %v4971_v44 = vrot.slane %v513_v62, 11  ;;  %v4973_v28 = vrot.slane %v518_v63, 11  ;;  %v533_v32 = vshrl.u32 %v260_v27, 16  ;;  %v4976_v60 = vrot.slane %v503_v37, 11 }
  0x6c   : > { %5990 = vst [vmem:[#allocation30_spill] sm:$0xff] %v4969_v26  ;;  %4201 = vmatprep.mubr.msk.bf16.mxu1 %vm1012_vm8, %v1010_v43  ;;  %v4978_v42 = vrot.slane %v523_v22, 11  ;;  %v4980_v24 = vrot.slane %v528_v56, 11  ;;  %v538_v16 = vshrl.u32 %v261_v23, 16  ;;  %v4984_v18 = vunpack.c.l.bf16 %v3950_v35 }
  0x6d   : > { %5991 = vst [vmem:[#allocation31_spill] sm:$0xff] %v4971_v44  ;;  %5992 = vst [vmem:[#allocation32_spill] sm:$0xff] %v4973_v28  ;;  %v4982_v61 = vrot.slane %v533_v32, 11  ;;  %v4986_v38 = vunpack.c.l.bf16 %v3951_v41  ;;  %v4988_v36 = vunpack.c.l.bf16 %v3952_v55  ;;  %v4992_v34 = vunpack.c.l.bf16 %v3949_v39 }
  0x6e   : > { %5993 = vst [vmem:[#allocation33_spill] sm:$0xff] %v4976_v60  ;;  %5994 = vst [vmem:[#allocation34_spill] sm:$0xff] %v4978_v42  ;;  %v4990_v40 = vrot.slane %v538_v16, 11  ;;  %v4994_v30 = vunpack.c.l.bf16 %v3953_v50  ;;  %v4996_v51 = vunpack.c.l.bf16 %v3954_v17  ;;  %v4998_v52 = vunpack.c.l.bf16 %v3955_v1 }
  0x6f   : > { %5995 = vst [vmem:[#allocation35_spill] sm:$0xff] %v4980_v24  ;;  %5996 = vst [vmem:[#allocation36_spill] sm:$0xff] %v4982_v61  ;;  %v5947_v33 = vunpack.c.l.bf16 %v4969_v26  ;;  %v5946_v27 = vunpack.c.l.bf16 %v4971_v44  ;;  %v5945_v35 = vunpack.c.l.bf16 %v4973_v28  ;;  %v5003_v41 = vunpack.c.l.bf16 %v3956_v0 }
  0x70   : > { %5997 = vst [vmem:[#allocation37_spill] sm:$0xff] %v4990_v40  ;;  %v5949_v55 = vunpack.c.l.bf16 %v4976_v60  ;;  %v5952_v37 = vunpack.c.l.bf16 %v4978_v42  ;;  %v5955_v39 = vunpack.c.l.bf16 %v4980_v24  ;;  %v5958_v50 = vunpack.c.l.bf16 %v4982_v61 }
  0x71   : > { %5998 = vst [vmem:[#allocation38_spill] sm:$0xff] %v5003_v41  ;;  %v682_v17 = vadd.f32 %v4618_v3, %v4984_v18  ;;  %v683_v45 = vadd.f32 %v4621_v4, %v4986_v38  ;;  %v684_v49 = vadd.f32 %v4624_v5, %v4988_v36  ;;  %v681_v62 = vadd.f32 %v4992_v34, %v4612_v2 }
  0x72   : > { %v685_v63 = vadd.f32 %v4634_v6, %v4994_v30  ;;  %v686_v22 = vadd.f32 %v4637_v7, %v4996_v51  ;;  %v687_v43 = vadd.f32 %v4640_v8, %v4998_v52  ;;  %v690_v1 = vadd.f32 %v4618_v3, %v5947_v33 }
  0x73   : > { %v691_v0 = vadd.f32 %v4621_v4, %v5946_v27  ;;  %v692_v56 = vadd.f32 %v4624_v5, %v5945_v35  ;;  %v688_v32 = vadd.f32 %v4643_v9, %v5003_v41  ;;  %v689_v16 = vadd.f32 %v5949_v55, %v4612_v2 }
  0x74   : > { %v693_v23 = vadd.f32 %v4634_v6, %v5952_v37  ;;  %v694_v3 = vadd.f32 %v4637_v7, %v5955_v39  ;;  %v695_v4 = vadd.f32 %v4640_v8, %v5958_v50  ;;  %v746_v5 = vpack.c.bf16 %v682_v17, %v682_v17 }
  0x75   : > { %v747_v35 = vpack.c.bf16 %v683_v45, %v683_v45  ;;  %v748_v27 = vpack.c.bf16 %v684_v49, %v684_v49  ;;  %v5999_v33 = vunpack.c.l.bf16 %v4990_v40  ;;  %v745_v2 = vpack.c.bf16 %v681_v62, %v681_v62 }
  0x76   : > { %v749_v55 = vpack.c.bf16 %v685_v63, %v685_v63  ;;  %v750_v42 = vpack.c.bf16 %v686_v22, %v686_v22  ;;  %v751_v44 = vpack.c.bf16 %v687_v43, %v687_v43  ;;  %v754_v6 = vpack.c.bf16 %v690_v1, %v690_v1 }
  0x77   : > { %v696_v28 = vadd.f32 %v4643_v9, %v5999_v33  ;;  %v755_v37 = vpack.c.bf16 %v691_v0, %v691_v0  ;;  %v756_v24 = vpack.c.bf16 %v692_v56, %v692_v56  ;;  %v752_v26 = vpack.c.bf16 %v688_v32, %v688_v32 }
  0x78   : > { %v753_v7 = vpack.c.bf16 %v689_v16, %v689_v16  ;;  %v757_v39 = vpack.c.bf16 %v693_v23, %v693_v23  ;;  %v758_v61 = vpack.c.bf16 %v694_v3, %v694_v3  ;;  %v759_v60 = vpack.c.bf16 %v695_v4, %v695_v4 }
  0x79   : > { %v874_v8 = vunpack.c.l.b16 %v746_v5  ;;  %v875_v17 = vunpack.c.l.b16 %v747_v35  ;;  %v876_v45 = vunpack.c.l.b16 %v748_v27  ;;  %v760_v49 = vpack.c.bf16 %v696_v28, %v696_v28 }
  0x7a   : > { %v873_v50 = vunpack.c.l.b16 %v745_v2  ;;  %v877_v40 = vunpack.c.l.b16 %v749_v55  ;;  %v878_v41 = vunpack.c.l.b16 %v750_v42  ;;  %v879_v9 = vunpack.c.l.b16 %v751_v44 }
  0x7b   : > { %v882_v33 = vunpack.c.l.b16 %v754_v6  ;;  %v883_v62 = vunpack.c.l.b16 %v755_v37  ;;  %v884_v63 = vunpack.c.l.b16 %v756_v24  ;;  %v880_v22 = vunpack.c.l.b16 %v752_v26 }
  0x7c   : > { %v881_v43 = vunpack.c.l.b16 %v753_v7  ;;  %v885_v1 = vunpack.c.l.b16 %v757_v39  ;;  %v886_v0 = vunpack.c.l.b16 %v758_v61  ;;  %v887_v56 = vunpack.c.l.b16 %v759_v60 }
  0x7d   : > { %v980_v32 = vrot.slane %v874_v8, 7  ;;  %v982_v23 = vrot.slane %v875_v17, 6  ;;  %v984_v16 = vrot.slane %v876_v45, 5  ;;  %v888_v3 = vunpack.c.l.b16 %v760_v49 }
  0x7e   : > { %v986_v4 = vrot.slane %v877_v40, 4  ;;  %v988_v35 = vrot.slane %v878_v41, 3  ;;  %v994_v27 = vrot.slane %v882_v33, 7  ;;  %v996_v55 = vrot.slane %v883_v62, 6 }
  0x7f   : > { %v981_v28 = vsel %vm890_vm1, %v980_v32, %v873_v50  ;;  %v998_v42 = vrot.slane %v884_v63, 5  ;;  %v1000_v44 = vrot.slane %v885_v1, 4  ;;  %v990_v24 = vrot.slane %v879_v9, 2 }
  0x80   : > { %v983_v37 = vsel %vm893_vm2, %v982_v23, %v981_v28  ;;  %v995_v26 = vsel %vm890_vm1, %v994_v27, %v881_v43  ;;  %v1002_v39 = vrot.slane %v886_v0, 3  ;;  %v992_v61 = vrot.slane %v880_v22, 1  ;;  %vm5490_vm1 = vmand %vm3386_vm13, %vm3387_vm14 }
  0x81   : > { %v985_v60 = vsel %vm896_vm3, %v984_v16, %v983_v37  ;;  %v997_v5 = vsel %vm893_vm2, %v996_v55, %v995_v26  ;;  %v1004_v2 = vrot.slane %v887_v56, 2  ;;  %v1006_v50 = vrot.slane %v888_v3, 1 }
  0x82   : > { %v987_v40 = vsel %vm899_vm4, %v986_v4, %v985_v60  ;;  %v999_v41 = vsel %vm896_vm3, %v998_v42, %v997_v5  ;;  %v4552_v62 = vmov 0.0   ;;  %vm3477_vm3 = vsmask.f32 7942 }
  0x83   : > { %v989_v6 = vsel %vm902_vm5, %v988_v35, %v987_v40  ;;  %v1001_v7 = vsel %vm899_vm4, %v1000_v44, %v999_v41  ;;  %4217 = vmatprep.subr.bf16.mxu0 %v4552_v62  ;;  %4205 = vmatprep.subr.bf16.mxu1 %v4552_v62  ;;  %vm3320_vm4 = vsmask.f32 7938 }
  0x84   : > { %v991_v8 = vsel %vm905_vm6, %v990_v24, %v989_v6  ;;  %v1003_v17 = vsel %vm902_vm5, %v1002_v39, %v1001_v7  ;;  %4219 = vmatprep.mubr.msk.bf16.mxu0 %vm4553_vm9, %v4552_v62  ;;  %vm5603_vm5 = vmand %vm3386_vm13, %vm3477_vm3  ;;  %vm3791_vm13 = vsmask.f32 7950 }
  0x85   : > { %v993_v45 = vsel %vm908_vm7, %v992_v61, %v991_v8  ;;  %v1005_v49 = vsel %vm905_vm6, %v1004_v2, %v1003_v17  ;;  %vm5644_vm6 = vmand %vm3237_vm15, %vm3320_vm4 }
  0x86   : > { %v1007_v9 = vsel %vm908_vm7, %v1006_v50, %v1005_v49  ;;  %vm3700_vm7 = vcmask 27651  }
  0x87   : > { %v1011_v33 = vpack.c.b16 %v1007_v9, %v993_v45  ;;  %vm5795_vm14 = vmand %vm3700_vm7, %vm3791_vm13 }
  0x89   : > { %4202 = vmatmul.mubr.msk.bf16.vlgmr.msra.gmra.mxu1 %vm1012_vm8, %v1011_v33 }
  0x8a   : > { %4207 = vmatprep.mubr.msk.bf16.mxu1 %vm4553_vm9, %v4552_v62 }
 0x10e   : > { %v4199_v63 = vpop.f32.mrf.mxu0 }
 0x10f   : > { %v5071_v22 = vpack.c.bf16 %v4199_v63, %v4199_v63 }
 0x110   : > { %v1063_v43 = vpop.f32.mrf.mxu0 }
 0x111   : > { %v5073_v1 = vpack.c.bf16 %v1063_v43, %v1063_v43  ;;  %1202 = vrot.lane.b32.xlu1 %v5071_v22, %s4554_s27 }
 0x112   : > { %v4200_v0 = vpop.f32.mrf.mxu0 }
 0x113   : > { %v5076_v56 = vpack.c.bf16 %v4200_v0, %v4200_v0  ;;  %1103 = vrot.lane.b32.xlu0 %v5073_v1, %s4554_s27 }
 0x114   : > { %v1066_v32 = vpop.f32.mrf.mxu0 }
 0x115   : > { %v5079_v23 = vpack.c.bf16 %v1066_v32, %v1066_v32  ;;  %1251 = vrot.lane.b32.xlu1 %v5076_v56, %s4554_s27 }
 0x117   : > { %1153 = vrot.lane.b32.xlu0 %v5079_v23, %s4554_s27 }
 0x149   : > { %v4203_v16 = vpop.f32.mrf.mxu1 }
 0x14a   : > { %v5086_v28 = vpack.c.bf16 %v4203_v16, %v4203_v16 }
 0x14b   : > { %v1079_v3 = vpop.f32.mrf.mxu1 }
 0x14c   : > { %v5083_v4 = vpack.c.bf16 %v1079_v3, %v1079_v3 }
 0x14d   : > { %v4204_v35 = vpop.f32.mrf.mxu1 }
 0x14e   : > { %1300 = vrot.lane.b32.xlu0 %v5083_v4, %s4554_s27  ;;  %v5090_v42 = vpack.c.bf16 %v4204_v35, %v4204_v35 }
 0x14f   : > { %v1082_v27 = vpop.f32.mrf.mxu1 }
 0x150   : > { %v5088_v55 = vpack.c.bf16 %v1082_v27, %v1082_v27 }
 0x152   : > { %1349 = vrot.lane.b32.xlu1 %v5088_v55, %s4554_s27  ;;  %1398 = vrot.lane.b32.xlu0 %v5086_v28, %s4554_s27 }
 0x156   : > { %1447 = vrot.lane.b32.xlu1 %v5090_v42, %s4554_s27  ;;  %1641 = vrot.lane.b32.xlu0 %v5079_v23, %s4555_s28 }
 0x15a   : > { %1592 = vrot.lane.b32.xlu1 %v5073_v1, %s4555_s28 }
 0x15e   : > { %1689 = vrot.lane.b32.xlu1 %v5071_v22, %s4555_s28 }
 0x183   : > { %v1203_v44 = vpop.permute.xlu1 %1202 }
 0x184   : > { %v1208_v37 = vsel %vm1105_vm10, %v1203_v44, 0 }
 0x185   : > { %4218 = vmatpush3.bf16.xpose.msra.mxu0 %v1208_v37  ;;  %v1104_v24 = vpop.permute.xlu0 %1103 }
 0x186   : > { %v1110_v26 = vsel %vm1105_vm10, %v1104_v24, 0  ;;  %4229 = vmatprep.subr.bf16.mxu0 %v4552_v62 }
 0x187   : > { %4206 = vmatpush3.bf16.xpose.msra.mxu1 %v1110_v26  ;;  %v1252_v61 = vpop.permute.xlu1 %1251 }
 0x188   : > { %4211 = vmatprep.subr.bf16.mxu1 %v4552_v62  ;;  %v1257_v5 = vsel %vm1105_vm10, %v1252_v61, 0 }
 0x189   : > { %v1154_v39 = vpop.permute.xlu0 %1153 }
 0x18a   : > { %v1159_v60 = vsel %vm1105_vm10, %v1154_v39, 0 }
 0x18c   : > { %4220 = vmatmul.mubr.msk.bf16.vlgmr.msra.gmra.mxu0 %vm1105_vm10, %v5071_v22 }
 0x18d   : > { %4231 = vmatprep.mubr.msk.bf16.mxu0 %vm4553_vm9, %v4552_v62 }
 0x18e   : > { %4208 = vmatmul.mubr.msk.bf16.vlgmr.msra.gmra.mxu1 %vm1105_vm10, %v5073_v1 }
 0x18f   : > { %4212 = vmatpush3.bf16.xpose.msra.mxu1 %v1159_v60  ;;  %4213 = vmatprep.mubr.msk.bf16.mxu1 %vm4553_vm9, %v4552_v62 }
 0x190   : > { %4223 = vmatprep.subr.bf16.mxu1 %v4552_v62 }
 0x196   : > { %4214 = vmatmul.mubr.msk.bf16.vlgmr.msra.gmra.mxu1 %vm1105_vm10, %v5079_v23 }
 0x197   : > { %4224 = vmatpush3.bf16.xpose.msra.mxu1 %v1257_v5  ;;  %4225 = vmatprep.mubr.msk.bf16.mxu1 %vm4553_vm9, %v4552_v62 }
 0x198   : > { %4235 = vmatprep.subr.bf16.mxu1 %v4552_v62 }
 0x19e   : > { %4226 = vmatmul.mubr.msk.bf16.vlgmr.msra.gmra.mxu1 %vm1105_vm10, %v5076_v56 }
 0x19f   : > { %4237 = vmatprep.mubr.msk.bf16.mxu1 %vm4553_vm9, %v4552_v62 }
 0x1c0   : > { %v1301_v2 = vpop.permute.xlu0 %1300 }
 0x1c1   : > { %v1306_v40 = vsel %vm1105_vm10, %v1301_v2, 0 }
 0x1c2   : > { %4230 = vmatpush3.bf16.xpose.msra.mxu0 %v1306_v40 }
 0x1c3   : > { %4241 = vmatprep.subr.bf16.mxu0 %v4552_v62 }
 0x1c4   : > { %v1350_v41 = vpop.permute.xlu1 %1349  ;;  %v1399_v6 = vpop.permute.xlu0 %1398 }
 0x1c5   : > { %v1355_v50 = vsel %vm1105_vm10, %v1350_v41, 0  ;;  %v1404_v8 = vsel %vm1105_vm10, %v1399_v6, 0 }
 0x1c6   : > { %4236 = vmatpush3.bf16.xpose.msra.mxu1 %v1355_v50 }
 0x1c7   : > { %4247 = vmatprep.subr.bf16.mxu1 %v4552_v62 }
 0x1c8   : > { %v1448_v7 = vpop.permute.xlu1 %1447  ;;  %v1642_v9 = vpop.permute.xlu0 %1641 }
 0x1c9   : > { %4232 = vmatmul.mubr.msk.bf16.vlgmr.msra.gmra.mxu0 %vm1105_vm10, %v5083_v4  ;;  %v1453_v17 = vsel %vm1105_vm10, %v1448_v7, 0  ;;  %v1647_v33 = vsel %vm1597_vm11, %v1642_v9, 0 }
 0x1ca   : > { %4242 = vmatpush3.bf16.xpose.msra.mxu0 %v1404_v8  ;;  %4243 = vmatprep.mubr.msk.bf16.mxu0 %vm4553_vm9, %v4552_v62 }
 0x1cb   : > { %4253 = vmatprep.subr.bf16.mxu0 %v4552_v62 }
 0x1cc   : > { %v1593_v45 = vpop.permute.xlu1 %1592 }
 0x1cd   : > { %4238 = vmatmul.mubr.msk.bf16.vlgmr.msra.gmra.mxu1 %vm1105_vm10, %v5088_v55  ;;  %v1599_v49 = vsel %vm1597_vm11, %v1593_v45, 0 }
 0x1ce   : > { %4248 = vmatpush3.bf16.xpose.msra.mxu1 %v1453_v17  ;;  %4249 = vmatprep.mubr.msk.bf16.mxu1 %vm4553_vm9, %v4552_v62 }
 0x1cf   : > { %4259 = vmatprep.subr.bf16.mxu1 %v4552_v62 }
 0x1d1   : > { %4244 = vmatmul.mubr.msk.bf16.vlgmr.msra.gmra.mxu0 %vm1105_vm10, %v5086_v28 }
 0x1d2   : > { %4254 = vmatpush3.bf16.msra.mxu0 %v1599_v49  ;;  %4255 = vmatprep.mubr.msk.bf16.mxu0 %vm4553_vm9, %v4552_v62 }
 0x1d3   : > { %4265 = vmatprep.subr.bf16.mxu0 %v4552_v62 }
 0x1d5   : > { %4250 = vmatmul.mubr.msk.bf16.vlgmr.msra.gmra.mxu1 %vm1105_vm10, %v5090_v42 }
 0x1d6   : > { %4260 = vmatpush3.bf16.msra.mxu1 %v1647_v33  ;;  %4261 = vmatprep.mubr.msk.bf16.mxu1 %vm4553_vm9, %v4552_v62 }
 0x1d7   : > { %4271 = vmatprep.subr.bf16.mxu1 %v4552_v62 }
 0x24c   : > { %v1244_v63 = vpop.f32.mrf.mxu0 }
 0x24d   : > { %v1502_v43 = vsel %vm1495_vm12, %v1244_v63, -inf }
 0x24e   : > { %v1146_v0 = vpop.f32.mrf.mxu1  ;;  %v4221_v32 = vpop.f32.mrf.mxu0  ;;  %1503 = vmax.xlane.f32.xlu0 %v1502_v43 }
 0x24f   : > { %v1496_v35 = vsel %vm1495_vm12, %v1146_v0, -inf }
 0x250   : > { %v4209_v16 = vpop.f32.mrf.mxu1  ;;  %v1247_v3 = vpop.f32.mrf.mxu0 }
 0x252   : > { %v1149_v27 = vpop.f32.mrf.mxu1  ;;  %v4222_v44 = vpop.f32.mrf.mxu0  ;;  %1497 = vmax.xlane.f32.xlu0 %v1496_v35 }
 0x254   : > { %v4210_v37 = vpop.f32.mrf.mxu1 }
 0x256   : > { %v5155_v24 = vpop.f32.mrf.mxu1 }
 0x257   : > { %v1499_v45 = vsel %vm1495_vm12, %v5155_v24, -inf }
 0x258   : > { %v4215_v26 = vpop.f32.mrf.mxu1 }
 0x25a   : > { %v1198_v39 = vpop.f32.mrf.mxu1 }
 0x25c   : > { %v4216_v60 = vpop.f32.mrf.mxu1 }
 0x25e   : > { %v1293_v61 = vpop.f32.mrf.mxu1 }
 0x25f   : > { %v1505_v5 = vsel %vm1495_vm12, %v1293_v61, -inf }
 0x260   : > { %1506 = vmax.xlane.f32.xlu0 %v1505_v5  ;;  %v4227_v2 = vpop.f32.mrf.mxu1 }
 0x262   : > { %v1296_v40 = vpop.f32.mrf.mxu1 }
 0x264   : > { %v4228_v41 = vpop.f32.mrf.mxu1 }
 0x289   : > { %v1342_v50 = vpop.f32.mrf.mxu0 }
 0x28a   : > { %v1508_v6 = vsel %vm1495_vm12, %v1342_v50, -inf }
 0x28b   : > { %1509 = vmax.xlane.f32.xlu1 %v1508_v6  ;;  %v4233_v7 = vpop.f32.mrf.mxu0 }
 0x28d   : > { %v1345_v8 = vpop.f32.mrf.mxu0  ;;  %v1391_v17 = vpop.f32.mrf.mxu1 }
 0x28e   : > { %v1511_v49 = vsel %vm1495_vm12, %v1391_v17, -inf }
 0x28f   : > { %1500 = vmax.xlane.f32.xlu1 %v1499_v45  ;;  %v4234_v9 = vpop.f32.mrf.mxu0  ;;  %1512 = vmax.xlane.f32.xlu0 %v1511_v49  ;;  %v4239_v33 = vpop.f32.mrf.mxu1 }
 0x291   : > { %v1440_v43 = vpop.f32.mrf.mxu0  ;;  %v1394_v32 = vpop.f32.mrf.mxu1 }
 0x292   : > { %v1514_v16 = vsel %vm1495_vm12, %v1440_v43, -inf }
 0x293   : > { %1515 = vmax.xlane.f32.xlu1 %v1514_v16  ;;  %v4245_v3 = vpop.f32.mrf.mxu0  ;;  %v4240_v35 = vpop.f32.mrf.mxu1 }
 0x295   : > { %v1443_v27 = vpop.f32.mrf.mxu0  ;;  %v5163_v44 = vpop.f32.mrf.mxu1 }
 0x296   : > { %v1517_v37 = vsel %vm1495_vm12, %v5163_v44, -inf }
 0x297   : > { %v4246_v26 = vpop.f32.mrf.mxu0  ;;  %1518 = vmax.xlane.f32.xlu0 %v1517_v37  ;;  %v4251_v39 = vpop.f32.mrf.mxu1 }
 0x299   : > { %v1492_v60 = vpop.f32.mrf.mxu1 }
 0x29b   : > { %v4252_v5 = vpop.f32.mrf.mxu1 }
 0x2a4   : > { %1737 = vrot.lane.b32.xlu1 %v5076_v56, %s4555_s28 }
 0x2ad   : > { %1785 = vrot.lane.b32.xlu0 %v5083_v4, %s4555_s28 }
 0x2d7   : > { %v1504_v2 = vpop.xlane.xlu0 %1503 }
 0x2d8   : > { %v1522_v40 = vsub.f32 %v1244_v63, %v1504_v2  ;;  %v5181_v63 = vpop.permute.xlu1 %1689 }
 0x2da   : > { %v1532_v41 = vmul.f32 1.442695, %v1522_v40 }
 0x2db   : > { %v1498_v6 = vpop.xlane.xlu0 %1497 }
 0x2dc   : > { %4464 = vpow2.f32 %v1532_v41  ;;  %v1520_v7 = vsub.f32 %v1146_v0, %v1498_v6 }
 0x2de   : > { %v1528_v8 = vmul.f32 1.442695, %v1520_v7 }
 0x2e0   : > { %4466 = vpow2.f32 %v1528_v8 }
 0x2e9   : > { %v5171_v45 = vpop.eup %4464  ;;  %v1507_v0 = vpop.xlane.xlu0 %1506 }
 0x2ea   : > { %v1550_v49 = vsel %vm1495_vm12, %v5171_v45, 0.0  ;;  %v1523_v16 = vsub.f32 %v1293_v61, %v1507_v0 }
 0x2eb   : > { %1551 = vadd.xlane.f32.xlu1 %v1550_v49 }
 0x2ec   : > { %v1534_v37 = vmul.f32 1.442695, %v1523_v16 }
 0x2ed   : > { %v5175_v9 = vpop.eup %4466 }
 0x2ee   : > { %v1544_v33 = vsel %vm1495_vm12, %v5175_v9, 0.0 }
 0x2ef   : > { %1545 = vadd.xlane.f32.xlu1 %v1544_v33 }
 0x300   : > { %1833 = vrot.lane.b32.xlu1 %v5088_v55, %s4555_s28 }
 0x314   : > { %v1510_v32 = vpop.xlane.xlu1 %1509 }
 0x315   : > { %v1524_v3 = vsub.f32 %v1342_v50, %v1510_v32 }
 0x317   : > { %v1536_v35 = vmul.f32 1.442695, %v1524_v3 }
 0x318   : > { %v1501_v27 = vpop.xlane.xlu1 %1500  ;;  %v1513_v26 = vpop.xlane.xlu0 %1512 }
 0x319   : > { %4468 = vpow2.f32 %v1536_v35  ;;  %v1521_v39 = vsub.f32 %v5155_v24, %v1501_v27  ;;  %v1525_v60 = vsub.f32 %v1391_v17, %v1513_v26 }
 0x31a   : > { %4470 = vpow2.f32 %v1534_v37 }
 0x31b   : > { %v1530_v5 = vmul.f32 1.442695, %v1521_v39  ;;  %v1538_v40 = vmul.f32 1.442695, %v1525_v60 }
 0x31c   : > { %v1516_v2 = vpop.xlane.xlu1 %1515 }
 0x31d   : > { %4472 = vpow2.f32 %v1530_v5  ;;  %v1526_v41 = vsub.f32 %v1440_v43, %v1516_v2 }
 0x31e   : > { %4474 = vpow2.f32 %v1538_v40  ;;  %v1695_v40 = vsel %vm1597_vm11, %v5181_v63, 0 }
 0x31f   : > { %v1540_v6 = vmul.f32 1.442695, %v1526_v41 }
 0x320   : > { %v1519_v32 = vpop.xlane.xlu0 %1518  ;;  %v1738_v27 = vpop.permute.xlu1 %1737 }
 0x321   : > { %4476 = vpow2.f32 %v1540_v6  ;;  %v1527_v16 = vsub.f32 %v5163_v44, %v1519_v32 }
 0x323   : > { %v1542_v3 = vmul.f32 1.442695, %v1527_v16 }
 0x325   : > { %4478 = vpow2.f32 %v1542_v3 }
 0x326   : > { %v5184_v7 = vpop.eup %4468 }
 0x327   : > { %v1556_v61 = vsel %vm1495_vm12, %v5184_v7, 0.0  ;;  %v5188_v50 = vpop.eup %4470 }
 0x328   : > { %1557 = vadd.xlane.f32.xlu1 %v1556_v61  ;;  %v1553_v43 = vsel %vm1495_vm12, %v5188_v50, 0.0 }
 0x32a   : > { %v5190_v8 = vpop.eup %4472 }
 0x32b   : > { %v1547_v24 = vsel %vm1495_vm12, %v5190_v8, 0.0  ;;  %v5194_v17 = vpop.eup %4474 }
 0x32c   : > { %1548 = vadd.xlane.f32.xlu0 %v1547_v24  ;;  %v1559_v0 = vsel %vm1495_vm12, %v5194_v17, 0.0 }
 0x32e   : > { %v5198_v49 = vpop.eup %4476 }
 0x32f   : > { %v1562_v33 = vsel %vm1495_vm12, %v5198_v49, 0.0 }
 0x330   : > { %1554 = vadd.xlane.f32.xlu0 %v1553_v43  ;;  %1563 = vadd.xlane.f32.xlu1 %v1562_v33 }
 0x332   : > { %v5225_v35 = vpop.eup %4478 }
 0x333   : > { %v1565_v44 = vsel %vm1495_vm12, %v5225_v35, 0.0 }
 0x334   : > { %1560 = vadd.xlane.f32.xlu0 %v1559_v0 }
 0x341   : > { %1929 = vrot.lane.b32.xlu1 %v5090_v42, %s4555_s28 }
 0x345   : > { %2029 = vrot.lane.b32.xlu1 %v5079_v23, %s4556_s29 }
 0x349   : > { %2027 = vrot.lane.b32.xlu1 %v5079_v23, %s4557_s30 }
 0x34a   : > { %1881 = vrot.lane.b32.xlu0 %v5086_v28, %s4555_s28 }
 0x34d   : > { %2129 = vrot.lane.b32.xlu1 %v5076_v56, %s4556_s29 }
 0x351   : > { %2127 = vrot.lane.b32.xlu1 %v5076_v56, %s4557_s30 }
 0x355   : > { %2229 = vrot.lane.b32.xlu1 %v5088_v55, %s4556_s29 }
 0x359   : > { %2227 = vrot.lane.b32.xlu1 %v5088_v55, %s4557_s30 }
 0x35d   : > { %2329 = vrot.lane.b32.xlu1 %v5090_v42, %s4556_s29 }
 0x361   : > { %2327 = vrot.lane.b32.xlu1 %v5090_v42, %s4557_s30 }
 0x365   : > { %2473 = vrot.lane.b32.xlu1 %v5073_v1, %s4558_s5 }
 0x369   : > { %1566 = vadd.xlane.f32.xlu0 %v1565_v44 }
 0x374   : > { %v1552_v37 = vpop.xlane.xlu1 %1551 }
 0x378   : > { %v1546_v26 = vpop.xlane.xlu1 %1545 }
 0x379   : > { %4480 = vrcp.f32 %v1546_v26 }
 0x37a   : > { %4482 = vrcp.f32 %v1552_v37 }
 0x37f   : > { %1979 = vrot.lane.b32.xlu0 %v5073_v1, %s4556_s29 }
 0x383   : > { %1977 = vrot.lane.b32.xlu0 %v5073_v1, %s4557_s30 }
 0x386   : > { %v4481_v39 = vpop.eup %4480 }
 0x387   : > { %2079 = vrot.lane.b32.xlu0 %v5071_v22, %s4556_s29  ;;  %v1576_v60 = vmul.f32 %v4481_v39, %v5175_v9  ;;  %v4483_v2 = vpop.eup %4482  ;;  %v1786_v9 = vpop.permute.xlu0 %1785 }
 0x388   : > { %v1578_v1 = vmul.f32 %v4483_v2, %v5171_v45  ;;  %v1791_v63 = vsel %vm1597_vm11, %v1786_v9, 0  ;;  %v1834_v45 = vpop.permute.xlu1 %1833 }
 0x389   : > { %v1584_v5 = vpack.c.bf16 %v1576_v60, %v1576_v60  ;;  %v1839_v9 = vsel %vm1597_vm11, %v1834_v45, 0 }
 0x38a   : > { %v1586_v41 = vpack.c.bf16 %v1578_v1, %v1578_v1 }
 0x38b   : > { %2077 = vrot.lane.b32.xlu0 %v5071_v22, %s4557_s30  ;;  %4256 = vmatmul.mubr.msk.bf16.vlgmr.msra.gmra.mxu0 %vm1495_vm12, %v1584_v5 }
 0x38c   : > { %4266 = vmatpush3.bf16.msra.mxu0 %v1695_v40  ;;  %4267 = vmatprep.mubr.msk.bf16.mxu0 %vm4553_vm9, %v4552_v62 }
 0x38d   : > { %4277 = vmatprep.subr.bf16.mxu0 %v4552_v62 }
 0x38f   : > { %2179 = vrot.lane.b32.xlu0 %v5083_v4, %s4556_s29 }
 0x393   : > { %2177 = vrot.lane.b32.xlu0 %v5083_v4, %s4557_s30  ;;  %4268 = vmatmul.mubr.msk.bf16.vlgmr.msra.gmra.mxu0 %vm1495_vm12, %v1586_v41 }
 0x394   : > { %4278 = vmatpush3.bf16.msra.mxu0 %v1791_v63  ;;  %4279 = vmatprep.mubr.msk.bf16.mxu0 %vm4553_vm9, %v4552_v62 }
 0x395   : > { %4289 = vmatprep.subr.bf16.mxu0 %v4552_v62 }
 0x397   : > { %2279 = vrot.lane.b32.xlu0 %v5086_v28, %s4556_s29 }
 0x39b   : > { %2277 = vrot.lane.b32.xlu0 %v5086_v28, %s4557_s30 }
 0x3b1   : > { %v1558_v6 = vpop.xlane.xlu1 %1557 }
 0x3b2   : > { %4484 = vrcp.f32 %v1558_v6 }
 0x3b5   : > { %v1549_v61 = vpop.xlane.xlu0 %1548 }
 0x3b6   : > { %4486 = vrcp.f32 %v1549_v61 }
 0x3b9   : > { %v1555_v24 = vpop.xlane.xlu0 %1554  ;;  %v1564_v43 = vpop.xlane.xlu1 %1563 }
 0x3ba   : > { %4488 = vrcp.f32 %v1555_v24 }
 0x3bb   : > { %4490 = vrcp.f32 %v1564_v43 }
 0x3bd   : > { %v1561_v33 = vpop.xlane.xlu0 %1560 }
 0x3be   : > { %4492 = vrcp.f32 %v1561_v33 }
 0x3bf   : > { %v4485_v0 = vpop.eup %4484 }
 0x3c0   : > { %v1580_v32 = vmul.f32 %v4485_v0, %v5184_v7  ;;  %v1743_v7 = vsel %vm1597_vm11, %v1738_v27, 0 }
 0x3c1   : > { %v1882_v16 = vpop.permute.xlu0 %1881 }
 0x3c2   : > { %v1588_v3 = vpack.c.bf16 %v1580_v32, %v1580_v32  ;;  %v1887_v37 = vsel %vm1597_vm11, %v1882_v16, 0 }
 0x3c3   : > { %v4487_v44 = vpop.eup %4486 }
 0x3c4   : > { %v1577_v26 = vmul.f32 %v4487_v44, %v5190_v8  ;;  %4280 = vmatmul.mubr.msk.bf16.vlgmr.msra.gmra.mxu0 %vm1495_vm12, %v1588_v3 }
 0x3c5   : > { %4290 = vmatpush3.bf16.msra.mxu0 %v1887_v37  ;;  %4291 = vmatprep.mubr.msk.bf16.mxu0 %vm4553_vm9, %v4552_v62 }
 0x3c6   : > { %v1585_v39 = vpack.c.bf16 %v1577_v26, %v1577_v26  ;;  %4301 = vmatprep.subr.bf16.mxu0 %v4552_v62 }
 0x3c7   : > { %v4489_v60 = vpop.eup %4488 }
 0x3c8   : > { %v4491_v5 = vpop.eup %4490  ;;  %4262 = vmatmul.mubr.msk.bf16.vlgmr.msra.gmra.mxu1 %vm1495_vm12, %v1585_v39  ;;  %v1579_v2 = vmul.f32 %v4489_v60, %v5188_v50  ;;  %v1930_v50 = vpop.permute.xlu1 %1929 }
 0x3c9   : > { %4272 = vmatpush3.bf16.msra.mxu1 %v1743_v7  ;;  %4273 = vmatprep.mubr.msk.bf16.mxu1 %vm4553_vm9, %v4552_v62  ;;  %v1582_v8 = vmul.f32 %v4491_v5, %v5198_v49  ;;  %v1935_v63 = vsel %vm1597_vm11, %v1930_v50, 0 }
 0x3ca   : > { %4283 = vmatprep.subr.bf16.mxu1 %v4552_v62  ;;  %v1587_v1 = vpack.c.bf16 %v1579_v2, %v1579_v2 }
 0x3cb   : > { %v1590_v40 = vpack.c.bf16 %v1582_v8, %v1582_v8  ;;  %v4493_v27 = vpop.eup %4492 }
 0x3cc   : > { %v1581_v49 = vmul.f32 %v4493_v27, %v5194_v17  ;;  %v2030_v45 = vpop.permute.xlu1 %2029 }
 0x3cd   : > { %4292 = vmatmul.mubr.msk.bf16.vlgmr.msra.gmra.mxu0 %vm1495_vm12, %v1590_v40  ;;  %v2035_v5 = vsel %vm1105_vm10, %v2030_v45, 0 }
 0x3ce   : > { %4303 = vmatprep.mubr.msk.bf16.mxu0 %vm4553_vm9, %v4552_v62  ;;  %v1589_v41 = vpack.c.bf16 %v1581_v49, %v1581_v49 }
 0x3d0   : > { %4274 = vmatmul.mubr.msk.bf16.vlgmr.msra.gmra.mxu1 %vm1495_vm12, %v1587_v1  ;;  %v2028_v6 = vpop.permute.xlu1 %2027 }
 0x3d1   : > { %4284 = vmatpush3.bf16.msra.mxu1 %v1839_v9  ;;  %4285 = vmatprep.mubr.msk.bf16.mxu1 %vm4553_vm9, %v4552_v62 }
 0x3d2   : > { %4295 = vmatprep.subr.bf16.mxu1 %v4552_v62 }
 0x3d4   : > { %v2130_v61 = vpop.permute.xlu1 %2129 }
 0x3d5   : > { %v2135_v40 = vsel %vm1105_vm10, %v2130_v61, 0 }
 0x3d8   : > { %4286 = vmatmul.mubr.msk.bf16.vlgmr.msra.gmra.mxu1 %vm1495_vm12, %v1589_v41  ;;  %v2128_v17 = vpop.permute.xlu1 %2127 }
 0x3d9   : > { %4296 = vmatpush3.bf16.msra.mxu1 %v1935_v63  ;;  %4297 = vmatprep.mubr.msk.bf16.mxu1 %vm4553_vm9, %v4552_v62 }
 0x3da   : > { %4307 = vmatprep.subr.bf16.mxu1 %v4552_v62 }
 0x3dc   : > { %v2230_v32 = vpop.permute.xlu1 %2229 }
 0x3dd   : > { %v2235_v50 = vsel %vm1105_vm10, %v2230_v32, 0 }
 0x3e0   : > { %v2228_v26 = vpop.permute.xlu1 %2227 }
 0x3f2   : > { %v1567_v24 = vpop.xlane.xlu0 %1566 }
 0x3f3   : > { %4494 = vrcp.f32 %v1567_v24 }
 0x3f6   : > { %v1980_v43 = vpop.permute.xlu0 %1979 }
 0x3f7   : > { %v1985_v33 = vsel %vm1105_vm10, %v1980_v43, 0 }
 0x3f8   : > { %4302 = vmatpush3.bf16.xpose.msra.mxu0 %v1985_v33 }
 0x3f9   : > { %4313 = vmatprep.subr.bf16.mxu0 %v4552_v62 }
 0x3fa   : > { %v1978_v0 = vpop.permute.xlu0 %1977 }
 0x3fe   : > { %v2080_v16 = vpop.permute.xlu0 %2079 }
 0x3ff   : > { %v2085_v3 = vsel %vm1105_vm10, %v2080_v16, 0  ;;  %4304 = vmatmul.mubr.msk.bf16.vlgmr.msra.gmra.mxu0 %vm1105_vm10, %v1978_v0 }
 0x400   : > { %v4495_v44 = vpop.eup %4494  ;;  %4314 = vmatpush3.bf16.xpose.msra.mxu0 %v2085_v3  ;;  %4315 = vmatprep.mubr.msk.bf16.mxu0 %vm4553_vm9, %v4552_v62 }
 0x401   : > { %v1583_v37 = vmul.f32 %v4495_v44, %v5225_v35  ;;  %4325 = vmatprep.subr.bf16.mxu0 %v4552_v62  ;;  %v2330_v35 = vpop.permute.xlu1 %2329 }
 0x402   : > { %v2078_v39 = vpop.permute.xlu0 %2077  ;;  %v2335_v45 = vsel %vm1105_vm10, %v2330_v35, 0 }
 0x403   : > { %v1591_v60 = vpack.c.bf16 %v1583_v37, %v1583_v37 }
 0x405   : > { %4298 = vmatmul.mubr.msk.bf16.vlgmr.msra.gmra.mxu1 %vm1495_vm12, %v1591_v60  ;;  %v2328_v1 = vpop.permute.xlu1 %2327 }
 0x406   : > { %4308 = vmatpush3.bf16.xpose.msra.mxu1 %v2035_v5  ;;  %v2180_v7 = vpop.permute.xlu0 %2179  ;;  %4309 = vmatprep.mubr.msk.bf16.mxu1 %vm4553_vm9, %v4552_v62 }
 0x407   : > { %v2185_v8 = vsel %vm1105_vm10, %v2180_v7, 0  ;;  %4316 = vmatmul.mubr.msk.bf16.vlgmr.msra.gmra.mxu0 %vm1105_vm10, %v2078_v39  ;;  %4319 = vmatprep.subr.bf16.mxu1 %v4552_v62 }
 0x408   : > { %4326 = vmatpush3.bf16.xpose.msra.mxu0 %v2185_v8  ;;  %4327 = vmatprep.mubr.msk.bf16.mxu0 %vm4553_vm9, %v4552_v62 }
 0x409   : > { %4337 = vmatprep.subr.bf16.mxu0 %v4552_v62  ;;  %v2474_v49 = vpop.permute.xlu1 %2473 }
 0x40a   : > { %v2178_v2 = vpop.permute.xlu0 %2177  ;;  %v2479_v63 = vsel %vm1597_vm11, %v2474_v49, 0 }
 0x40d   : > { %4310 = vmatmul.mubr.msk.bf16.vlgmr.msra.gmra.mxu1 %vm1105_vm10, %v2028_v6 }
 0x40e   : > { %4320 = vmatpush3.bf16.xpose.msra.mxu1 %v2135_v40  ;;  %v2280_v27 = vpop.permute.xlu0 %2279  ;;  %4321 = vmatprep.mubr.msk.bf16.mxu1 %vm4553_vm9, %v4552_v62 }
 0x40f   : > { %v2285_v9 = vsel %vm1105_vm10, %v2280_v27, 0  ;;  %4328 = vmatmul.mubr.msk.bf16.vlgmr.msra.gmra.mxu0 %vm1105_vm10, %v2178_v2  ;;  %4331 = vmatprep.subr.bf16.mxu1 %v4552_v62 }
 0x410   : > { %4338 = vmatpush3.bf16.xpose.msra.mxu0 %v2285_v9  ;;  %4339 = vmatprep.mubr.msk.bf16.mxu0 %vm4553_vm9, %v4552_v62 }
 0x411   : > { %4349 = vmatprep.subr.bf16.mxu0 %v4552_v62 }
 0x412   : > { %v2278_v41 = vpop.permute.xlu0 %2277 }
 0x415   : > { %4322 = vmatmul.mubr.msk.bf16.vlgmr.msra.gmra.mxu1 %vm1105_vm10, %v2128_v17 }
 0x416   : > { %4332 = vmatpush3.bf16.xpose.msra.mxu1 %v2235_v50  ;;  %4333 = vmatprep.mubr.msk.bf16.mxu1 %vm4553_vm9, %v4552_v62 }
 0x417   : > { %4340 = vmatmul.mubr.msk.bf16.vlgmr.msra.gmra.mxu0 %vm1105_vm10, %v2278_v41  ;;  %4343 = vmatprep.subr.bf16.mxu1 %v4552_v62 }
 0x418   : > { %4350 = vmatpush3.bf16.msra.mxu0 %v2479_v63  ;;  %4351 = vmatprep.mubr.msk.bf16.mxu0 %vm4553_vm9, %v4552_v62 }
 0x419   : > { %4361 = vmatprep.subr.bf16.mxu0 %v4552_v62 }
 0x41d   : > { %4334 = vmatmul.mubr.msk.bf16.vlgmr.msra.gmra.mxu1 %vm1105_vm10, %v2228_v26 }
 0x41e   : > { %4344 = vmatpush3.bf16.xpose.msra.mxu1 %v2335_v45  ;;  %4345 = vmatprep.mubr.msk.bf16.mxu1 %vm4553_vm9, %v4552_v62 }
 0x41f   : > { %4355 = vmatprep.subr.bf16.mxu1 %v4552_v62 }
 0x425   : > { %4346 = vmatmul.mubr.msk.bf16.vlgmr.msra.gmra.mxu1 %vm1105_vm10, %v2328_v1 }
 0x426   : > { %4357 = vmatprep.mubr.msk.bf16.mxu1 %vm4553_vm9, %v4552_v62 }
 0x44b   : > { %v5334_v6 = vpop.f32.mrf.mxu0 }
 0x44d   : > { %v4257_v61 = vpop.f32.mrf.mxu0 }
 0x44f   : > { %v1638_v24 = vpop.f32.mrf.mxu0 }
 0x451   : > { %v4258_v17 = vpop.f32.mrf.mxu0 }
 0x453   : > { %v5336_v43 = vpop.f32.mrf.mxu0 }
 0x455   : > { %v4269_v33 = vpop.f32.mrf.mxu0 }
 0x457   : > { %v1734_v0 = vpop.f32.mrf.mxu0 }
 0x459   : > { %v4270_v32 = vpop.f32.mrf.mxu0 }
 0x484   : > { %v5338_v16 = vpop.f32.mrf.mxu0 }
 0x486   : > { %v4281_v3 = vpop.f32.mrf.mxu0 }
 0x488   : > { %v5340_v44 = vpop.f32.mrf.mxu1  ;;  %v1830_v37 = vpop.f32.mrf.mxu0 }
 0x48a   : > { %v4263_v26 = vpop.f32.mrf.mxu1  ;;  %v4282_v39 = vpop.f32.mrf.mxu0 }
 0x48c   : > { %v1686_v60 = vpop.f32.mrf.mxu1 }
 0x48d   : > { %v5342_v5 = vpop.f32.mrf.mxu0 }
 0x48e   : > { %v4264_v7 = vpop.f32.mrf.mxu1 }
 0x48f   : > { %v4293_v8 = vpop.f32.mrf.mxu0 }
 0x490   : > { %v5344_v35 = vpop.f32.mrf.mxu1 }
 0x491   : > { %v1926_v2 = vpop.f32.mrf.mxu0 }
 0x492   : > { %v4275_v40 = vpop.f32.mrf.mxu1 }
 0x493   : > { %v4294_v1 = vpop.f32.mrf.mxu0 }
 0x494   : > { %v1782_v27 = vpop.f32.mrf.mxu1 }
 0x496   : > { %v4276_v9 = vpop.f32.mrf.mxu1 }
 0x498   : > { %v5346_v49 = vpop.f32.mrf.mxu1 }
 0x49a   : > { %v4287_v50 = vpop.f32.mrf.mxu1 }
 0x49c   : > { %v1878_v41 = vpop.f32.mrf.mxu1 }
 0x49e   : > { %v4288_v63 = vpop.f32.mrf.mxu1 }
 0x4bf   : > { %v2021_v45 = vpop.f32.mrf.mxu0 }
 0x4c0   : > { %v2377_v61 = vsel %vm1495_vm12, %v2021_v45, -inf }
 0x4c1   : > { %2378 = vmax.xlane.f32.xlu0 %v2377_v61  ;;  %v4305_v24 = vpop.f32.mrf.mxu0 }
 0x4c3   : > { %v2024_v17 = vpop.f32.mrf.mxu0 }
 0x4c5   : > { %v5349_v33 = vpop.f32.mrf.mxu1  ;;  %v4306_v0 = vpop.f32.mrf.mxu0 }
 0x4c7   : > { %v4299_v32 = vpop.f32.mrf.mxu1  ;;  %v2121_v3 = vpop.f32.mrf.mxu0 }
 0x4c8   : > { %v2383_v37 = vsel %vm1495_vm12, %v2121_v3, -inf }
 0x4c9   : > { %v1974_v26 = vpop.f32.mrf.mxu1  ;;  %2384 = vmax.xlane.f32.xlu0 %v2383_v37  ;;  %v4317_v39 = vpop.f32.mrf.mxu0 }
 0x4cb   : > { %v4300_v60 = vpop.f32.mrf.mxu1  ;;  %v2124_v7 = vpop.f32.mrf.mxu0 }
 0x4cd   : > { %v2071_v8 = vpop.f32.mrf.mxu1  ;;  %v4318_v2 = vpop.f32.mrf.mxu0 }
 0x4ce   : > { %v2380_v40 = vsel %vm1495_vm12, %v2071_v8, -inf }
 0x4cf   : > { %2381 = vmax.xlane.f32.xlu1 %v2380_v40  ;;  %v4311_v1 = vpop.f32.mrf.mxu1  ;;  %v5353_v27 = vpop.f32.mrf.mxu0 }
 0x4d0   : > { %v2389_v41 = vsel %vm1495_vm12, %v5353_v27, -inf }
 0x4d1   : > { %v2074_v9 = vpop.f32.mrf.mxu1  ;;  %v4329_v50 = vpop.f32.mrf.mxu0 }
 0x4d3   : > { %v4312_v63 = vpop.f32.mrf.mxu1  ;;  %2390 = vmax.xlane.f32.xlu1 %v2389_v41  ;;  %v2224_v61 = vpop.f32.mrf.mxu0 }
 0x4d5   : > { %v2171_v24 = vpop.f32.mrf.mxu1  ;;  %v4330_v17 = vpop.f32.mrf.mxu0 }
 0x4d6   : > { %v2386_v0 = vsel %vm1495_vm12, %v2171_v24, -inf }
 0x4d7   : > { %v4323_v32 = vpop.f32.mrf.mxu1  ;;  %2387 = vmax.xlane.f32.xlu0 %v2386_v0  ;;  %v5358_v37 = vpop.f32.mrf.mxu0 }
 0x4d8   : > { %v2395_v26 = vsel %vm1495_vm12, %v5358_v37, -inf }
 0x4d9   : > { %v2174_v39 = vpop.f32.mrf.mxu1  ;;  %2396 = vmax.xlane.f32.xlu1 %v2395_v26  ;;  %v4341_v60 = vpop.f32.mrf.mxu0 }
 0x4db   : > { %v4324_v7 = vpop.f32.mrf.mxu1  ;;  %v2324_v2 = vpop.f32.mrf.mxu0 }
 0x4dd   : > { %v2271_v40 = vpop.f32.mrf.mxu1  ;;  %v4342_v1 = vpop.f32.mrf.mxu0 }
 0x4de   : > { %v2392_v9 = vsel %vm1495_vm12, %v2271_v40, -inf }
 0x4df   : > { %v4335_v50 = vpop.f32.mrf.mxu1  ;;  %2393 = vmax.xlane.f32.xlu0 %v2392_v9 }
 0x4e1   : > { %v2274_v41 = vpop.f32.mrf.mxu1 }
 0x4e3   : > { %v4336_v63 = vpop.f32.mrf.mxu1 }
 0x4e5   : > { %v2371_v61 = vpop.f32.mrf.mxu1 }
 0x4e6   : > { %v2398_v17 = vsel %vm1495_vm12, %v2371_v61, -inf }
 0x4e7   : > { %v4347_v0 = vpop.f32.mrf.mxu1  ;;  %2399 = vmax.xlane.f32.xlu0 %v2398_v17 }
 0x4e9   : > { %v2374_v32 = vpop.f32.mrf.mxu1 }
 0x4ea   : > { %2569 = vrot.lane.b32.xlu1 %v5071_v22, %s4558_s5 }
 0x4eb   : > { %v4348_v26 = vpop.f32.mrf.mxu1 }
 0x4ee   : > { %2617 = vrot.lane.b32.xlu1 %v5076_v56, %s4558_s5 }
 0x4fd   : > { %2521 = vrot.lane.b32.xlu0 %v5079_v23, %s4558_s5 }
 0x54a   : > { %v2379_v39 = vpop.xlane.xlu0 %2378 }
 0x54b   : > { %v2401_v60 = vsub.f32 %v2021_v45, %v2379_v39 }
 0x54d   : > { %v2409_v7 = vmul.f32 1.442695, %v2401_v60 }
 0x54f   : > { %4496 = vpow2.f32 %v2409_v7 }
 0x552   : > { %v2385_v2 = vpop.xlane.xlu0 %2384 }
 0x553   : > { %v2403_v1 = vsub.f32 %v2121_v3, %v2385_v2 }
 0x555   : > { %v2413_v9 = vmul.f32 1.442695, %v2403_v1 }
 0x557   : > { %4498 = vpow2.f32 %v2413_v9 }
 0x558   : > { %v2382_v50 = vpop.xlane.xlu1 %2381 }
 0x559   : > { %v2402_v41 = vsub.f32 %v2071_v8, %v2382_v50 }
 0x55b   : > { %v2411_v63 = vmul.f32 1.442695, %v2402_v41 }
 0x55c   : > { %v4497_v17 = vpop.eup %4496  ;;  %v2391_v1 = vpop.xlane.xlu1 %2390 }
 0x55d   : > { %4500 = vpow2.f32 %v2411_v63  ;;  %v2425_v22 = vsel %vm1495_vm12, %v4497_v17, 0.0  ;;  %v2405_v9 = vsub.f32 %v5353_v27, %v2391_v1 }
 0x55e   : > { %2426 = vadd.xlane.f32.xlu1 %v2425_v22 }
 0x55f   : > { %v2417_v41 = vmul.f32 1.442695, %v2405_v9 }
 0x560   : > { %v2388_v56 = vpop.xlane.xlu0 %2387 }
 0x561   : > { %v2404_v0 = vsub.f32 %v2171_v24, %v2388_v56 }
 0x562   : > { %v2397_v50 = vpop.xlane.xlu1 %2396 }
 0x563   : > { %v2415_v32 = vmul.f32 1.442695, %v2404_v0  ;;  %v2407_v63 = vsub.f32 %v5358_v37, %v2397_v50 }
 0x564   : > { %v5371_v23 = vpop.eup %4498 }
 0x565   : > { %4502 = vpow2.f32 %v2415_v32  ;;  %v2431_v45 = vsel %vm1495_vm12, %v5371_v23, 0.0  ;;  %v2421_v22 = vmul.f32 1.442695, %v2407_v63 }
 0x566   : > { %2432 = vadd.xlane.f32.xlu1 %v2431_v45  ;;  %4504 = vpow2.f32 %v2417_v41 }
 0x567   : > { %4506 = vpow2.f32 %v2421_v22 }
 0x568   : > { %v2394_v26 = vpop.xlane.xlu0 %2393 }
 0x569   : > { %v2406_v56 = vsub.f32 %v2271_v40, %v2394_v26 }
 0x56a   : > { %v5375_v3 = vpop.eup %4500 }
 0x56b   : > { %v2428_v8 = vsel %vm1495_vm12, %v5375_v3, 0.0  ;;  %v2419_v0 = vmul.f32 1.442695, %v2406_v56 }
 0x56c   : > { %2429 = vadd.xlane.f32.xlu0 %v2428_v8 }
 0x56d   : > { %4508 = vpow2.f32 %v2419_v0 }
 0x570   : > { %v2400_v39 = vpop.xlane.xlu0 %2399 }
 0x571   : > { %v2408_v32 = vsub.f32 %v2371_v61, %v2400_v39  ;;  %v2570_v39 = vpop.permute.xlu1 %2569 }
 0x572   : > { %v5379_v60 = vpop.eup %4502  ;;  %v2575_v63 = vsel %vm1597_vm11, %v2570_v39, 0 }
 0x573   : > { %v2434_v24 = vsel %vm1495_vm12, %v5379_v60, 0.0  ;;  %v5391_v45 = vpop.eup %4504 }
 0x574   : > { %2435 = vadd.xlane.f32.xlu0 %v2434_v24  ;;  %v2522_v7 = vpop.permute.xlu0 %2521  ;;  %v2437_v27 = vsel %vm1495_vm12, %v5391_v45, 0.0  ;;  %v5395_v8 = vpop.eup %4506 }
 0x575   : > { %v2527_v2 = vsel %vm1597_vm11, %v2522_v7, 0  ;;  %v2443_v37 = vsel %vm1495_vm12, %v5395_v8, 0.0  ;;  %v2618_v24 = vpop.permute.xlu1 %2617 }
 0x576   : > { %4356 = vmatpush3.bf16.msra.mxu1 %v2527_v2 }
 0x577   : > { %2713 = vrot.lane.b32.xlu1 %v5088_v55, %s4558_s5  ;;  %4367 = vmatprep.subr.bf16.mxu1 %v4552_v62  ;;  %v2423_v55 = vmul.f32 1.442695, %v2408_v32 }
 0x579   : > { %4510 = vpow2.f32 %v2423_v55 }
 0x58a   : > { %2665 = vrot.lane.b32.xlu0 %v5083_v4, %s4558_s5  ;;  %v5399_v4 = vpop.eup %4508 }
 0x58b   : > { %v2440_v40 = vsel %vm1495_vm12, %v5399_v4, 0.0  ;;  %v5403_v61 = vpop.eup %4510 }
 0x58c   : > { %v2446_v26 = vsel %vm1495_vm12, %v5403_v61, 0.0 }
 0x59b   : > { %2438 = vadd.xlane.f32.xlu1 %v2437_v27 }
 0x59f   : > { %2444 = vadd.xlane.f32.xlu1 %v2443_v37  ;;  %v2623_v37 = vsel %vm1597_vm11, %v2618_v24, 0 }
 0x5a9   : > { %2441 = vadd.xlane.f32.xlu0 %v2440_v40 }
 0x5ad   : > { %2447 = vadd.xlane.f32.xlu0 %v2446_v26 }
 0x5b0   : > { %2809 = vrot.lane.b32.xlu1 %v5090_v42, %s4558_s5 }
 0x5c3   : > { %2761 = vrot.lane.b32.xlu0 %v5086_v28, %s4558_s5 }
 0x5e7   : > { %v2427_v7 = vpop.xlane.xlu1 %2426 }
 0x5e8   : > { %4512 = vrcp.f32 %v2427_v7 }
 0x5ef   : > { %v2433_v2 = vpop.xlane.xlu1 %2432 }
 0x5f0   : > { %4514 = vrcp.f32 %v2433_v2 }
 0x5f3   : > { %v2714_v26 = vpop.permute.xlu1 %2713 }
 0x5f5   : > { %v4513_v1 = vpop.eup %4512  ;;  %v2430_v9 = vpop.xlane.xlu0 %2429 }
 0x5f6   : > { %4516 = vrcp.f32 %v2430_v9  ;;  %v2457_v50 = vmul.f32 %v4513_v1, %v4497_v17 }
 0x5f8   : > { %v2465_v41 = vpack.c.bf16 %v2457_v50, %v2457_v50 }
 0x5fa   : > { %4352 = vmatmul.mubr.msk.bf16.vlgmr.msra.gmra.mxu0 %vm1495_vm12, %v2465_v41 }
 0x5fb   : > { %4362 = vmatpush3.bf16.msra.mxu0 %v2575_v63  ;;  %4363 = vmatprep.mubr.msk.bf16.mxu0 %vm4553_vm9, %v4552_v62 }
 0x5fc   : > { %4373 = vmatprep.subr.bf16.mxu0 %v4552_v62 }
 0x5fd   : > { %v4515_v28 = vpop.eup %4514  ;;  %v2436_v42 = vpop.xlane.xlu0 %2435 }
 0x5fe   : > { %4518 = vrcp.f32 %v2436_v42  ;;  %v2459_v22 = vmul.f32 %v4515_v28, %v5371_v23 }
 0x600   : > { %v2467_v56 = vpack.c.bf16 %v2459_v22, %v2459_v22 }
 0x601   : > { %v2666_v0 = vpop.permute.xlu0 %2665 }
 0x602   : > { %v2671_v17 = vsel %vm1597_vm11, %v2666_v0, 0  ;;  %4364 = vmatmul.mubr.msk.bf16.vlgmr.msra.gmra.mxu0 %vm1495_vm12, %v2467_v56 }
 0x603   : > { %v4517_v32 = vpop.eup %4516  ;;  %4374 = vmatpush3.bf16.msra.mxu0 %v2671_v17  ;;  %4375 = vmatprep.mubr.msk.bf16.mxu0 %vm4553_vm9, %v4552_v62 }
 0x604   : > { %v2458_v55 = vmul.f32 %v4517_v32, %v5375_v3  ;;  %4385 = vmatprep.subr.bf16.mxu0 %v4552_v62  ;;  %v2719_v3 = vsel %vm1597_vm11, %v2714_v26, 0 }
 0x606   : > { %v2466_v27 = vpack.c.bf16 %v2458_v55, %v2458_v55 }
 0x608   : > { %4358 = vmatmul.mubr.msk.bf16.vlgmr.msra.gmra.mxu1 %vm1495_vm12, %v2466_v27 }
 0x609   : > { %4368 = vmatpush3.bf16.msra.mxu1 %v2623_v37  ;;  %4369 = vmatprep.mubr.msk.bf16.mxu1 %vm4553_vm9, %v4552_v62 }
 0x60a   : > { %4379 = vmatprep.subr.bf16.mxu1 %v4552_v62 }
 0x60b   : > { %v4519_v23 = vpop.eup %4518 }
 0x60c   : > { %v2460_v40 = vmul.f32 %v4519_v23, %v5379_v60 }
 0x60e   : > { %v2468_v39 = vpack.c.bf16 %v2460_v40, %v2460_v40 }
 0x610   : > { %4370 = vmatmul.mubr.msk.bf16.vlgmr.msra.gmra.mxu1 %vm1495_vm12, %v2468_v39 }
 0x611   : > { %4380 = vmatpush3.bf16.msra.mxu1 %v2719_v3  ;;  %4381 = vmatprep.mubr.msk.bf16.mxu1 %vm4553_vm9, %v4552_v62 }
 0x612   : > { %4391 = vmatprep.subr.bf16.mxu1 %v4552_v62 }
 0x624   : > { %v2439_v24 = vpop.xlane.xlu1 %2438 }
 0x625   : > { %4520 = vrcp.f32 %v2439_v24 }
 0x628   : > { %v2445_v7 = vpop.xlane.xlu1 %2444 }
 0x629   : > { %4522 = vrcp.f32 %v2445_v7 }
 0x62c   : > { %v2810_v0 = vpop.permute.xlu1 %2809 }
 0x62d   : > { %v2815_v55 = vsel %vm1597_vm11, %v2810_v0, 0 }
 0x632   : > { %v4521_v2 = vpop.eup %4520  ;;  %v2442_v1 = vpop.xlane.xlu0 %2441 }
 0x633   : > { %4524 = vrcp.f32 %v2442_v1  ;;  %v2461_v60 = vmul.f32 %v4521_v2, %v5391_v45  ;;  %v552_v1 = vld [vmem:[%s5892_s3] sm:$0x3] }
 0x635   : > { %v2469_v9 = vpack.c.bf16 %v2461_v60, %v2461_v60 }
 0x636   : > { %v4523_v50 = vpop.eup %4522  ;;  %v2448_v41 = vpop.xlane.xlu0 %2447 }
 0x637   : > { %4526 = vrcp.f32 %v2448_v41  ;;  %4376 = vmatmul.mubr.msk.bf16.vlgmr.msra.gmra.mxu0 %vm1495_vm12, %v2469_v9  ;;  %v2463_v63 = vmul.f32 %v4523_v50, %v5395_v8 }
 0x638   : > { %4387 = vmatprep.mubr.msk.bf16.mxu0 %vm4553_vm9, %v4552_v62 }
 0x639   : > { %v2471_v22 = vpack.c.bf16 %v2463_v63, %v2463_v63 }
 0x63a   : > { %v2762_v28 = vpop.permute.xlu0 %2761 }
 0x63b   : > { %v2767_v42 = vsel %vm1597_vm11, %v2762_v28, 0 }
 0x63c   : > { %4386 = vmatpush3.bf16.msra.mxu0 %v2767_v42 }
 0x63d   : > { %4411 = vmatprep.subr.msk.bf16.mxu0 %vm1025_vm0, %v552_v1 }
 0x63f   : > { %4388 = vmatmul.mubr.msk.bf16.vlgmr.msra.gmra.mxu0 %vm1495_vm12, %v2471_v22 }
 0x640   : > { %v4525_v56 = vpop.eup %4524 }
 0x641   : > { %v2462_v45 = vmul.f32 %v4525_v56, %v5399_v4 }
 0x643   : > { %v2470_v17 = vpack.c.bf16 %v2462_v45, %v2462_v45 }
 0x644   : > { %v4527_v32 = vpop.eup %4526 }
 0x645   : > { %4382 = vmatmul.mubr.msk.bf16.vlgmr.msra.gmra.mxu1 %vm1495_vm12, %v2470_v17  ;;  %v2464_v8 = vmul.f32 %v4527_v32, %v5403_v61  ;;  %v2914_v61 = vsel %vm1025_vm0, %v552_v1, 0  ;;  %vm3238_vm0 = vsmask.f32 256 }
 0x646   : > { %4392 = vmatpush3.bf16.msra.mxu1 %v2815_v55  ;;  %4393 = vmatprep.mubr.msk.bf16.mxu1 %vm4553_vm9, %v4552_v62  ;;  %vm5532_vm2 = vmand %vm3237_vm15, %vm3238_vm0  ;;  %vm3543_vm9 = vcmask 26626   ;;  %vm3634_vm15 = vsmask.f32 7946 }
 0x647   : > { %v2472_v27 = vpack.c.bf16 %v2464_v8, %v2464_v8  ;;  %4398 = vmatpush3.bf16.msra.mxu0 %v2914_v61  ;;  %vm5850_vm0 = vmand %vm3543_vm9, %vm3634_vm15 }
 0x64d   : > { %4394 = vmatmul.mubr.msk.bf16.vlgmr.msra.gmra.mxu1 %vm1495_vm12, %v2472_v27 }
 0x6ba   : > { %v2515_v37 = vpop.f32.mrf.mxu0 }
 0x6bc   : > { %v4353_v23 = vpop.f32.mrf.mxu0 }
 0x6be   : > { %v2518_v40 = vpop.f32.mrf.mxu0 }
 0x6c0   : > { %v4354_v4 = vpop.f32.mrf.mxu0 }
 0x6c2   : > { %v2611_v26 = vpop.f32.mrf.mxu0 }
 0x6c4   : > { %v4365_v39 = vpop.f32.mrf.mxu0 }
 0x6c6   : > { %v2614_v3 = vpop.f32.mrf.mxu0 }
 0x6c8   : > { %v2563_v24 = vpop.f32.mrf.mxu1  ;;  %v4366_v7 = vpop.f32.mrf.mxu0 }
 0x6c9   : > { %v4444_v2 = vpack.i.bf16 %v2563_v24, %v2515_v37 }
 0x6ca   : > { %v4359_v62 = vpop.f32.mrf.mxu1 }
 0x6cb   : > { %4445 = vrot.lane.b32.xlu0 %v4444_v2, %s4559_s8 }
 0x6cc   : > { %v2566_v60 = vpop.f32.mrf.mxu1 }
 0x6ce   : > { %v4360_v9 = vpop.f32.mrf.mxu1 }
 0x6d0   : > { %v2659_v50 = vpop.f32.mrf.mxu1 }
 0x6d1   : > { %v4449_v41 = vpack.i.bf16 %v2659_v50, %v2611_v26 }
 0x6d2   : > { %v4371_v63 = vpop.f32.mrf.mxu1 }
 0x6d3   : > { %4450 = vrot.lane.b32.xlu1 %v4449_v41, %s4559_s8 }
 0x6d4   : > { %v2662_v28 = vpop.f32.mrf.mxu1 }
 0x6d6   : > { %v4372_v42 = vpop.f32.mrf.mxu1 }
 0x6f7   : > { %v2707_v22 = vpop.f32.mrf.mxu0 }
 0x6f9   : > { %v4377_v56 = vpop.f32.mrf.mxu0 }
 0x6fb   : > { %v2710_v45 = vpop.f32.mrf.mxu0 }
 0x6fd   : > { %v4378_v0 = vpop.f32.mrf.mxu0 }
 0x6ff   : > { %v2803_v17 = vpop.f32.mrf.mxu0 }
 0x701   : > { %v4389_v32 = vpop.f32.mrf.mxu0 }
 0x703   : > { %v2806_v55 = vpop.f32.mrf.mxu0 }
 0x705   : > { %v2755_v8 = vpop.f32.mrf.mxu1  ;;  %v4390_v27 = vpop.f32.mrf.mxu0 }
 0x706   : > { %v4454_v37 = vpack.i.bf16 %v2755_v8, %v2707_v22 }
 0x707   : > { %v4383_v23 = vpop.f32.mrf.mxu1 }
 0x708   : > { %4455 = vrot.lane.b32.xlu0 %v4454_v37, %s4559_s8 }
 0x709   : > { %v2758_v40 = vpop.f32.mrf.mxu1 }
 0x70b   : > { %v4384_v4 = vpop.f32.mrf.mxu1 }
 0x70d   : > { %v2851_v39 = vpop.f32.mrf.mxu1 }
 0x70e   : > { %v4459_v26 = vpack.i.bf16 %v2851_v39, %v2803_v17 }
 0x70f   : > { %v4395_v3 = vpop.f32.mrf.mxu1 }
 0x710   : > { %4460 = vrot.lane.b32.xlu1 %v4459_v26, %s4559_s8 }
 0x711   : > { %v2854_v24 = vpop.f32.mrf.mxu1 }
 0x713   : > { %v4396_v7 = vpop.f32.mrf.mxu1 }
 0x73d   : > { %v4446_v2 = vpop.permute.xlu0 %4445 }
 0x73e   : > { %v4448_v1 = vunpack.i.h.bf16 %v4446_v2  ;;  %v4447_v62 = vunpack.i.l.bf16 %v4446_v2 }
 0x740   : > { %v2890_v61 = vsel %vm1105_vm10, %v5340_v44, %v4448_v1  ;;  %v2889_v60 = vsel %vm1105_vm10, %v5334_v6, %v4447_v62 }
 0x741   : > { %v2897_v9 = vpack.c.bf16 %v2890_v61, %v2889_v60 }
 0x743   : > { %4399 = vmatprep.mubr.msk.bf16.mxu0 %vm1012_vm8, %v2897_v9  ;;  %v3395_v9 = vld [vmem:[%s5478_s11 + $0x8] sm:$0x2] }
 0x745   : > { %v4451_v50 = vpop.permute.xlu1 %4450 }
 0x746   : > { %v4453_v41 = vunpack.i.h.bf16 %v4451_v50  ;;  %v4452_v63 = vunpack.i.l.bf16 %v4451_v50  ;;  %v3401_v50 = vld [vmem:[%s5478_s11 + $0x10] sm:$0x2] }
 0x748   : > { %v2892_v28 = vsel %vm1105_vm10, %v5344_v35, %v4453_v41  ;;  %v2891_v42 = vsel %vm1105_vm10, %v5336_v43, %v4452_v63 }
 0x749   : > { %v2898_v22 = vpack.c.bf16 %v2892_v28, %v2891_v42  ;;  %v3404_v42 = vld [vmem:[%s5478_s11 + $0x14] sm:$0x2] }
 0x74b   : > { %4400 = vmatmul.mubr.msk.bf16.vlgmr.msra.gmra.mxu0 %vm1012_vm8, %v2898_v22  ;;  %v3407_v22 = vld [vmem:[%s5478_s11 + $0x18] sm:$0x2] }
 0x77a   : > { %v4456_v56 = vpop.permute.xlu0 %4455 }
 0x77b   : > { %v4458_v44 = vunpack.i.h.bf16 %v4456_v56  ;;  %v4457_v45 = vunpack.i.l.bf16 %v4456_v56 }
 0x77d   : > { %v2894_v6 = vsel %vm1105_vm10, %v5346_v49, %v4458_v44  ;;  %v2893_v0 = vsel %vm1105_vm10, %v5338_v16, %v4457_v45 }
 0x77e   : > { %v2899_v17 = vpack.c.bf16 %v2894_v6, %v2893_v0  ;;  %v3410_v0 = vld [vmem:[%s5478_s11 + $0x1c] sm:$0x2] }
 0x780   : > { %4403 = vmatprep.mubr.msk.bf16.mxu0 %vm1012_vm8, %v2899_v17 }
 0x782   : > { %v4461_v35 = vpop.permute.xlu1 %4460 }
 0x783   : > { %v4463_v32 = vunpack.i.h.bf16 %v4461_v35  ;;  %v4462_v55 = vunpack.i.l.bf16 %v4461_v35 }
 0x785   : > { %v2896_v43 = vsel %vm1105_vm10, %v5349_v33, %v4463_v32  ;;  %v2895_v8 = vsel %vm1105_vm10, %v5342_v5, %v4462_v55  ;;  %vm3544_vm10 = vsmask.f32 2304 }
 0x786   : > { %v2900_v27 = vpack.c.bf16 %v2896_v43, %v2895_v8  ;;  %vm5736_vm12 = vmand %vm3543_vm9, %vm3544_vm10 }
 0x788   : > { %4404 = vmatmul.mubr.msk.bf16.gmra.mxu0 %vm1012_vm8, %v2900_v27  ;;  %vm3701_vm8 = vsmask.f32 3328 }
 0x789   : > { %vm5690_vm11 = vmand %vm3700_vm7, %vm3701_vm8 }
 0x80b   : > { %v4401_v37 = vpop.f32.mrf.mxu0 }
 0x80c   : > { %v3003_v16 = vrot.slane %v4401_v37, 1  ;;  %v3004_v49 = vrot.slane %v4401_v37, 2  ;;  %v3005_v23 = vrot.slane %v4401_v37, 3  ;;  %v3006_v40 = vrot.slane %v4401_v37, 4 }
 0x80d   : > { %v3007_v5 = vrot.slane %v4401_v37, 5  ;;  %v3008_v33 = vrot.slane %v4401_v37, 6  ;;  %v3009_v4 = vrot.slane %v4401_v37, 7  ;;  %v3125_v39 = vadd.f32 %v4401_v37, %v4790_v54  ;;  %v3392_v54 = vld [vmem:[%s5478_s11 + $0x4] sm:$0x2]  ;;  %v2950_v17 = vpop.f32.mrf.mxu0 }
 0x80e   : > { %v3126_v26 = vadd.f32 %v3003_v16, %v4776_v29  ;;  %v3127_v3 = vadd.f32 %v3004_v49, %v4778_v31  ;;  %v3128_v24 = vadd.f32 %v3005_v23, %v4780_v48  ;;  %v3129_v7 = vadd.f32 %v3006_v40, %v4786_v53  ;;  %v3389_v31 = vld [vmem:[%s5478_s11] sm:$0x2] }
 0x80f   : > { %v3130_v2 = vadd.f32 %v3007_v5, %v4788_v57  ;;  %v3131_v1 = vadd.f32 %v3008_v33, %v4792_v58  ;;  %v3132_v62 = vadd.f32 %v3009_v4, %v4794_v59  ;;  %v4073_v61 = vpack.c.bf16 %v3125_v39, %v3125_v39  ;;  %v3398_v58 = vld [vmem:[%s5478_s11 + $0xc] sm:$0x2] }
 0x810   : > { %v4074_v48 = vpack.c.bf16 %v3126_v26, %v3126_v26  ;;  %v4075_v60 = vpack.c.bf16 %v3127_v3, %v3127_v3  ;;  %v4076_v53 = vpack.c.bf16 %v3128_v24, %v3128_v24  ;;  %v4077_v57 = vpack.c.bf16 %v3129_v7, %v3129_v7 }
 0x811   : > { %v4078_v59 = vpack.c.bf16 %v3130_v2, %v3130_v2  ;;  %v4079_v41 = vpack.c.bf16 %v3131_v1, %v3131_v1  ;;  %v4080_v63 = vpack.c.bf16 %v3132_v62, %v3132_v62  ;;  %v3370_v28 = vrot.slane %v4073_v61, 7  ;;  %v6016_v61 = vld [vmem:[#allocation10_spill] sm:$0xff] }
 0x812   : > { %v3371_v56 = vrot.slane %v4074_v48, 7  ;;  %v3372_v44 = vrot.slane %v4075_v60, 7  ;;  %v3373_v45 = vrot.slane %v4076_v53, 7  ;;  %v3374_v6 = vrot.slane %v4077_v57, 7  ;;  %v3240_v57 = vld [vmem:[%s5478_s11] sm:$0x1] }
 0x813   : > { %v3375_v35 = vrot.slane %v4078_v59, 7  ;;  %v3376_v32 = vrot.slane %v4079_v41, 7  ;;  %v3377_v55 = vrot.slane %v4080_v63, 7  ;;  %v3390_v43 = vsel %vm5490_vm1, %v3370_v28, %v3389_v31  ;;  %v3249_v28 = vld [vmem:[%s5478_s11 + $0xc] sm:$0x1] }
 0x814   : > { %3391 = vst [vmem:[%s5478_s11] sm:$0x2] %v3390_v43  ;;  %v3393_v8 = vsel %vm5490_vm1, %v3371_v56, %v3392_v54  ;;  %v3396_v27 = vsel %vm5490_vm1, %v3372_v44, %v3395_v9  ;;  %v3399_v37 = vsel %vm5490_vm1, %v3373_v45, %v3398_v58  ;;  %v3402_v16 = vsel %vm5490_vm1, %v3374_v6, %v3401_v50  ;;  %v3243_v9 = vld [vmem:[%s5478_s11 + $0x4] sm:$0x1]  ;;  %v3246_v58 = vld [vmem:[%s5478_s11 + $0x8] sm:$0x1] }
 0x815   : > { %3394 = vst [vmem:[%s5478_s11 + $0x4] sm:$0x2] %v3393_v8  ;;  %3397 = vst [vmem:[%s5478_s11 + $0x8] sm:$0x2] %v3396_v27  ;;  %v3405_v49 = vsel %vm5490_vm1, %v3375_v35, %v3404_v42  ;;  %v3408_v23 = vsel %vm5490_vm1, %v3376_v32, %v3407_v22  ;;  %v3411_v40 = vsel %vm5490_vm1, %v3377_v55, %v3410_v0  ;;  %v2989_v5 = vrot.slane %v2950_v17, 1 }
 0x816   : > { %3400 = vst [vmem:[%s5478_s11 + $0xc] sm:$0x2] %v3399_v37  ;;  %3403 = vst [vmem:[%s5478_s11 + $0x10] sm:$0x2] %v3402_v16  ;;  %v2990_v33 = vrot.slane %v2950_v17, 2  ;;  %v2991_v4 = vrot.slane %v2950_v17, 3  ;;  %v6002_v7 = vunpack.c.l.bf16 %v4646_v10  ;;  %v6003_v1 = vunpack.c.l.bf16 %v4649_v11 }
 0x817   : > { %3406 = vst [vmem:[%s5478_s11 + $0x14] sm:$0x2] %v3405_v49  ;;  %3409 = vst [vmem:[%s5478_s11 + $0x18] sm:$0x2] %v3408_v23  ;;  %v2992_v39 = vrot.slane %v2950_v17, 4  ;;  %v2993_v26 = vrot.slane %v2950_v17, 5  ;;  %v6006_v29 = vunpack.c.l.bf16 %v4652_v12  ;;  %v6007_v54 = vunpack.c.l.bf16 %v4655_v13 }
 0x818   : > { %3412 = vst [vmem:[%s5478_s11 + $0x1c] sm:$0x2] %v3411_v40  ;;  %v2994_v3 = vrot.slane %v2950_v17, 6  ;;  %v2995_v24 = vrot.slane %v2950_v17, 7  ;;  %v3109_v2 = vadd.f32 %v2950_v17, %v6002_v7  ;;  %v3110_v62 = vadd.f32 %v2989_v5, %v6003_v1  ;;  %v3255_v42 = vld [vmem:[%s5478_s11 + $0x14] sm:$0x1] }
 0x819   : > { %v3111_v31 = vadd.f32 %v2990_v33, %v6006_v29  ;;  %v3112_v48 = vadd.f32 %v2991_v4, %v6007_v54  ;;  %v6008_v10 = vunpack.c.l.bf16 %v4658_v14  ;;  %v6009_v53 = vunpack.c.l.bf16 %v4661_v15  ;;  %v3252_v14 = vld [vmem:[%s5478_s11 + $0x10] sm:$0x1]  ;;  %v3261_v45 = vld [vmem:[%s5478_s11 + $0x1c] sm:$0x1]  ;;  %v6018_v54 = vld [vmem:[#allocation11_spill] sm:$0xff] }
 0x81a   : > { %v6010_v50 = vunpack.c.l.bf16 %v4667_v19  ;;  %v6011_v12 = vunpack.c.l.bf16 %v4670_v20  ;;  %v3173_v63 = vpack.c.bf16 %v3109_v2, %v3109_v2  ;;  %v3174_v13 = vpack.c.bf16 %v3110_v62, %v3110_v62  ;;  %v3258_v19 = vld [vmem:[%s5478_s11 + $0x18] sm:$0x1]  ;;  %v4402_v20 = vpop.f32.mrf.mxu0 }
 0x81b   : > { %v3113_v60 = vadd.f32 %v2992_v39, %v6008_v10  ;;  %v3114_v11 = vadd.f32 %v2993_v26, %v6009_v53  ;;  %v3175_v15 = vpack.c.bf16 %v3111_v31, %v3111_v31  ;;  %v3176_v22 = vpack.c.bf16 %v3112_v48, %v3112_v48 }
 0x81c   : > { %v3115_v59 = vadd.f32 %v2994_v3, %v6010_v50  ;;  %v3116_v41 = vadd.f32 %v2995_v24, %v6011_v12  ;;  %v3241_v17 = vsel %vm5532_vm2, %v3173_v63, %v3240_v57  ;;  %v3244_v35 = vsel %vm5532_vm2, %v3174_v13, %v3243_v9  ;;  %v3482_v63 = vld [vmem:[%s5478_s11 + $0x4] sm:$0x2]  ;;  %v3485_v13 = vld [vmem:[%s5478_s11 + $0x8] sm:$0x2] }
 0x81d   : > { %v3177_v56 = vpack.c.bf16 %v3113_v60, %v3113_v60  ;;  %v3178_v44 = vpack.c.bf16 %v3114_v11, %v3114_v11  ;;  %3242 = vst [vmem:[%s5478_s11] sm:$0x1] %v3241_v17  ;;  %3245 = vst [vmem:[%s5478_s11 + $0x4] sm:$0x1] %v3244_v35  ;;  %v3247_v32 = vsel %vm5532_vm2, %v3175_v15, %v3246_v58  ;;  %v3010_v16 = vrot.slane %v4402_v20, 1 }
 0x81e   : > { %v3179_v6 = vpack.c.bf16 %v3115_v59, %v3115_v59  ;;  %v3180_v0 = vpack.c.bf16 %v3116_v41, %v3116_v41  ;;  %v3250_v55 = vsel %vm5532_vm2, %v3176_v22, %v3249_v28  ;;  %3248 = vst [vmem:[%s5478_s11 + $0x8] sm:$0x1] %v3247_v32  ;;  %v3011_v49 = vrot.slane %v4402_v20, 2  ;;  %v3479_v41 = vld [vmem:[%s5478_s11] sm:$0x2] }
 0x81f   : > { %v3253_v43 = vsel %vm5532_vm2, %v3177_v56, %v3252_v14  ;;  %v3256_v8 = vsel %vm5532_vm2, %v3178_v44, %v3255_v42  ;;  %3251 = vst [vmem:[%s5478_s11 + $0xc] sm:$0x1] %v3250_v55  ;;  %v3012_v23 = vrot.slane %v4402_v20, 3  ;;  %v3013_v40 = vrot.slane %v4402_v20, 4  ;;  %v3488_v22 = vld [vmem:[%s5478_s11 + $0xc] sm:$0x2] }
 0x820   : > { %3254 = vst [vmem:[%s5478_s11 + $0x10] sm:$0x1] %v3253_v43  ;;  %3257 = vst [vmem:[%s5478_s11 + $0x14] sm:$0x1] %v3256_v8  ;;  %v3259_v27 = vsel %vm5532_vm2, %v3179_v6, %v3258_v19  ;;  %v3262_v37 = vsel %vm5532_vm2, %v3180_v0, %v3261_v45  ;;  %v3014_v5 = vrot.slane %v4402_v20, 5  ;;  %v3015_v33 = vrot.slane %v4402_v20, 6 }
 0x821   : > { %3260 = vst [vmem:[%s5478_s11 + $0x18] sm:$0x1] %v3259_v27  ;;  %3263 = vst [vmem:[%s5478_s11 + $0x1c] sm:$0x1] %v3262_v37  ;;  %v3016_v4 = vrot.slane %v4402_v20, 7  ;;  %v6012_v39 = vunpack.c.l.bf16 %v4763_v46  ;;  %v6013_v3 = vunpack.c.l.bf16 %v4765_v47  ;;  %v6014_v7 = vunpack.c.l.bf16 %v4767_v21  ;;  %v6020_v46 = vld [vmem:[#allocation12_spill] sm:$0xff] }
 0x822   : > { %v6015_v1 = vunpack.c.l.bf16 %v4769_v25  ;;  %v6017_v29 = vunpack.c.l.bf16 %v6016_v61  ;;  %v6019_v48 = vunpack.c.l.bf16 %v6018_v54  ;;  %v6021_v60 = vunpack.c.l.bf16 %v6020_v46  ;;  %v6022_v47 = vld [vmem:[#allocation13_spill] sm:$0xff]  ;;  %v3491_v56 = vld [vmem:[%s5478_s11 + $0x10] sm:$0x2]  ;;  %v3494_v0 = vld [vmem:[%s5478_s11 + $0x14] sm:$0x2] }
 0x823   : > { %v3133_v26 = vadd.f32 %v4402_v20, %v6012_v39  ;;  %v3134_v24 = vadd.f32 %v3010_v16, %v6013_v3  ;;  %v3135_v2 = vadd.f32 %v3011_v49, %v6014_v7  ;;  %v6023_v11 = vunpack.c.l.bf16 %v6022_v47  ;;  %v3497_v43 = vld [vmem:[%s5478_s11 + $0x18] sm:$0x2]  ;;  %v3500_v49 = vld [vmem:[%s5478_s11 + $0x1c] sm:$0x2]  ;;  %v6027_v46 = vld [vmem:[#allocation3_spill] sm:$0xff] }
 0x824   : > { %v3136_v62 = vadd.f32 %v3012_v23, %v6015_v1  ;;  %v3137_v31 = vadd.f32 %v3013_v40, %v6017_v29  ;;  %v3138_v10 = vadd.f32 %v3014_v5, %v6019_v48  ;;  %v3139_v53 = vadd.f32 %v3015_v33, %v6021_v60  ;;  %v2953_v23 = vpop.f32.mrf.mxu0  ;;  %v6026_v48 = vld [vmem:[#allocation2_spill] sm:$0xff] }
 0x825   : > { %v3140_v57 = vadd.f32 %v3016_v4, %v6023_v11  ;;  %v4081_v21 = vpack.c.bf16 %v3133_v26, %v3133_v26  ;;  %v4082_v9 = vpack.c.bf16 %v3134_v24, %v3134_v24  ;;  %v4083_v58 = vpack.c.bf16 %v3135_v2, %v3135_v2  ;;  %v6029_v11 = vld [vmem:[#allocation5_spill] sm:$0xff] }
 0x826   : > { %v4084_v25 = vpack.c.bf16 %v3136_v62, %v3136_v62  ;;  %v4085_v50 = vpack.c.bf16 %v3137_v31, %v3137_v31  ;;  %v4086_v59 = vpack.c.bf16 %v3138_v10, %v3138_v10  ;;  %v4087_v12 = vpack.c.bf16 %v3139_v53, %v3139_v53  ;;  %v6028_v53 = vld [vmem:[#allocation4_spill] sm:$0xff] }
 0x827   : > { %v4088_v28 = vpack.c.bf16 %v3140_v57, %v3140_v57  ;;  %v3438_v14 = vshll.u32 %v4081_v21, 16  ;;  %v3442_v42 = vshll.u32 %v4082_v9, 16  ;;  %v3446_v15 = vshll.u32 %v4083_v58, 16  ;;  %v6030_v21 = vld [vmem:[#allocation6_spill] sm:$0xff]  ;;  %v6031_v58 = vld [vmem:[#allocation7_spill] sm:$0xff] }
 0x828   : > { %v3450_v44 = vshll.u32 %v4084_v25, 16  ;;  %v3454_v19 = vshll.u32 %v4085_v50, 16  ;;  %v3458_v45 = vshll.u32 %v4086_v59, 16  ;;  %v3462_v20 = vshll.u32 %v4087_v12, 16  ;;  %v6032_v50 = vld [vmem:[#allocation8_spill] sm:$0xff]  ;;  %v6033_v12 = vld [vmem:[#allocation9_spill] sm:$0xff] }
 0x829   : > { %v3440_v17 = vrot.slane %v3438_v14, 7  ;;  %v3444_v35 = vrot.slane %v3442_v42, 7  ;;  %v3448_v32 = vrot.slane %v3446_v15, 7  ;;  %v3466_v55 = vshll.u32 %v4088_v28, 16 }
 0x82a   : > { %v3452_v8 = vrot.slane %v3450_v44, 7  ;;  %v3456_v27 = vrot.slane %v3454_v19, 7  ;;  %v3460_v37 = vrot.slane %v3458_v45, 7  ;;  %v3464_v16 = vrot.slane %v3462_v20, 7  ;;  %v3331_v44 = vld [vmem:[%s5478_s11 + $0xc] sm:$0x1] }
 0x82b   : > { %v3468_v40 = vrot.slane %v3466_v55, 7  ;;  %v3480_v5 = vsel %vm5603_vm5, %v3440_v17, %v3479_v41  ;;  %v3483_v33 = vsel %vm5603_vm5, %v3444_v35, %v3482_v63  ;;  %v3486_v4 = vsel %vm5603_vm5, %v3448_v32, %v3485_v13  ;;  %v3322_v13 = vld [vmem:[%s5478_s11] sm:$0x1]  ;;  %v3337_v17 = vld [vmem:[%s5478_s11 + $0x14] sm:$0x1] }
 0x82c   : > { %3481 = vst [vmem:[%s5478_s11] sm:$0x2] %v3480_v5  ;;  %3484 = vst [vmem:[%s5478_s11 + $0x4] sm:$0x2] %v3483_v33  ;;  %v3489_v39 = vsel %vm5603_vm5, %v3452_v8, %v3488_v22  ;;  %v3492_v26 = vsel %vm5603_vm5, %v3456_v27, %v3491_v56  ;;  %v3495_v3 = vsel %vm5603_vm5, %v3460_v37, %v3494_v0  ;;  %v2996_v2 = vrot.slane %v2953_v23, 1  ;;  %v3325_v22 = vld [vmem:[%s5478_s11 + $0x4] sm:$0x1] }
 0x82d   : > { %3487 = vst [vmem:[%s5478_s11 + $0x8] sm:$0x2] %v3486_v4  ;;  %v3498_v24 = vsel %vm5603_vm5, %v3464_v16, %v3497_v43  ;;  %3490 = vst [vmem:[%s5478_s11 + $0xc] sm:$0x2] %v3489_v39  ;;  %v3501_v7 = vsel %vm5603_vm5, %v3468_v40, %v3500_v49  ;;  %v2997_v1 = vrot.slane %v2953_v23, 2  ;;  %v2998_v62 = vrot.slane %v2953_v23, 3 }
 0x82e   : > { %3493 = vst [vmem:[%s5478_s11 + $0x10] sm:$0x2] %v3492_v26  ;;  %3496 = vst [vmem:[%s5478_s11 + $0x14] sm:$0x2] %v3495_v3  ;;  %v2999_v61 = vrot.slane %v2953_v23, 4  ;;  %v3000_v29 = vrot.slane %v2953_v23, 5  ;;  %v3117_v10 = vadd.f32 %v2953_v23, %v6026_v48  ;;  %v3118_v60 = vadd.f32 %v2996_v2, %v6027_v46 }
 0x82f   : > { %3499 = vst [vmem:[%s5478_s11 + $0x18] sm:$0x2] %v3498_v24  ;;  %3502 = vst [vmem:[%s5478_s11 + $0x1c] sm:$0x2] %v3501_v7  ;;  %v3001_v31 = vrot.slane %v2953_v23, 6  ;;  %v3002_v54 = vrot.slane %v2953_v23, 7  ;;  %v3119_v47 = vadd.f32 %v2997_v1, %v6028_v53  ;;  %v3120_v57 = vadd.f32 %v2998_v62, %v6029_v11 }
 0x830   : > { %v3121_v9 = vadd.f32 %v2999_v61, %v6030_v21  ;;  %v3122_v25 = vadd.f32 %v3000_v29, %v6031_v58  ;;  %v4065_v28 = vpack.c.bf16 %v3117_v10, %v3117_v10  ;;  %v4066_v14 = vpack.c.bf16 %v3118_v60, %v3118_v60  ;;  %v3328_v56 = vld [vmem:[%s5478_s11 + $0x8] sm:$0x1]  ;;  %v3334_v0 = vld [vmem:[%s5478_s11 + $0x10] sm:$0x1]  ;;  %v3340_v35 = vld [vmem:[%s5478_s11 + $0x18] sm:$0x1] }
 0x831   : > { %v3123_v59 = vadd.f32 %v3001_v31, %v6032_v50  ;;  %v3124_v41 = vadd.f32 %v3002_v54, %v6033_v12  ;;  %v4067_v42 = vpack.c.bf16 %v3119_v47, %v3119_v47  ;;  %v4068_v15 = vpack.c.bf16 %v3120_v57, %v3120_v57  ;;  %v3343_v27 = vld [vmem:[%s5478_s11 + $0x1c] sm:$0x1]  ;;  %v6036_v57 = vld [vmem:[#allocation38_spill] sm:$0xff]  ;;  %v3715_v50 = vld [vmem:[%s5478_s11 + $0x10] sm:$0x8] }
 0x832   : > { %v4069_v19 = vpack.c.bf16 %v3121_v9, %v3121_v9  ;;  %v4070_v45 = vpack.c.bf16 %v3122_v25, %v3122_v25  ;;  %v3289_v32 = vshll.u32 %v4065_v28, 16  ;;  %v3292_v55 = vshll.u32 %v4066_v14, 16  ;;  %v3709_v25 = vld [vmem:[%s5478_s11 + $0x8] sm:$0x8]  ;;  %v3721_v28 = vld [vmem:[%s5478_s11 + $0x18] sm:$0x8] }
 0x833   : > { %v4071_v20 = vpack.c.bf16 %v3123_v59, %v3123_v59  ;;  %v4072_v6 = vpack.c.bf16 %v3124_v41, %v3124_v41  ;;  %v3295_v43 = vshll.u32 %v4067_v42, 16  ;;  %v3298_v8 = vshll.u32 %v4068_v15, 16 }
 0x834   : > { %v3301_v37 = vshll.u32 %v4069_v19, 16  ;;  %v3304_v16 = vshll.u32 %v4070_v45, 16  ;;  %v3323_v40 = vsel %vm5644_vm6, %v3289_v32, %v3322_v13  ;;  %v3326_v5 = vsel %vm5644_vm6, %v3292_v55, %v3325_v22  ;;  %v3718_v13 = vld [vmem:[%s5478_s11 + $0x14] sm:$0x8] }
 0x835   : > { %v3307_v49 = vshll.u32 %v4071_v20, 16  ;;  %v3310_v23 = vshll.u32 %v4072_v6, 16  ;;  %v3329_v33 = vsel %vm5644_vm6, %v3295_v43, %v3328_v56  ;;  %v3332_v4 = vsel %vm5644_vm6, %v3298_v8, %v3331_v44  ;;  %3324 = vst [vmem:[%s5478_s11] sm:$0x1] %v3323_v40  ;;  %3327 = vst [vmem:[%s5478_s11 + $0x4] sm:$0x1] %v3326_v5 }
 0x836   : > { %3330 = vst [vmem:[%s5478_s11 + $0x8] sm:$0x1] %v3329_v33  ;;  %3333 = vst [vmem:[%s5478_s11 + $0xc] sm:$0x1] %v3332_v4  ;;  %v3335_v39 = vsel %vm5644_vm6, %v3301_v37, %v3334_v0  ;;  %v3338_v26 = vsel %vm5644_vm6, %v3304_v16, %v3337_v17  ;;  %v3724_v56 = vld [vmem:[%s5478_s11 + $0x1c] sm:$0x8] }
 0x837   : > { %v3341_v3 = vsel %vm5644_vm6, %v3307_v49, %v3340_v35  ;;  %v3344_v24 = vsel %vm5644_vm6, %v3310_v23, %v3343_v27  ;;  %3336 = vst [vmem:[%s5478_s11 + $0x10] sm:$0x1] %v3335_v39  ;;  %3339 = vst [vmem:[%s5478_s11 + $0x14] sm:$0x1] %v3338_v26  ;;  %v6039_v33 = vld [vmem:[#allocation20_spill] sm:$0xff]  ;;  %v6040_v39 = vld [vmem:[#allocation21_spill] sm:$0xff] }
 0x838   : > { %3342 = vst [vmem:[%s5478_s11 + $0x18] sm:$0x1] %v3341_v3  ;;  %3345 = vst [vmem:[%s5478_s11 + $0x1c] sm:$0x1] %v3344_v24  ;;  %v6041_v3 = vld [vmem:[#allocation23_spill] sm:$0xff] }
 0x848   : > { %v4405_v7 = vpop.f32.mrf.mxu0 }
 0x849   : > { %v3031_v2 = vrot.slane %v4405_v7, 1  ;;  %v3032_v1 = vrot.slane %v4405_v7, 2  ;;  %v3033_v62 = vrot.slane %v4405_v7, 3  ;;  %v3034_v61 = vrot.slane %v4405_v7, 4 }
 0x84a   : > { %v3035_v29 = vrot.slane %v4405_v7, 5  ;;  %v3036_v31 = vrot.slane %v4405_v7, 6  ;;  %v3037_v54 = vrot.slane %v4405_v7, 7  ;;  %v3157_v48 = vadd.f32 %v4405_v7, %v4992_v34  ;;  %v2966_v44 = vpop.f32.mrf.mxu0  ;;  %v6042_v7 = vld [vmem:[#allocation24_spill] sm:$0xff] }
 0x84b   : > { %v3158_v10 = vadd.f32 %v3031_v2, %v4984_v18  ;;  %v3159_v46 = vadd.f32 %v3032_v1, %v4986_v38  ;;  %v3160_v60 = vadd.f32 %v3033_v62, %v4988_v36  ;;  %v3161_v53 = vadd.f32 %v3034_v61, %v4994_v30  ;;  %v3703_v38 = vld [vmem:[%s5478_s11] sm:$0x8]  ;;  %v3706_v36 = vld [vmem:[%s5478_s11 + $0x4] sm:$0x8]  ;;  %v6043_v1 = vld [vmem:[#allocation25_spill] sm:$0xff] }
 0x84c   : > { %v3162_v47 = vadd.f32 %v3035_v29, %v4996_v51  ;;  %v3163_v11 = vadd.f32 %v3036_v31, %v4998_v52  ;;  %v3164_v21 = vadd.f32 %v3037_v54, %v6036_v57  ;;  %v4105_v34 = vpack.c.bf16 %v3157_v48, %v3157_v48  ;;  %v3712_v52 = vld [vmem:[%s5478_s11 + $0xc] sm:$0x8]  ;;  %v6045_v31 = vld [vmem:[#allocation28_spill] sm:$0xff]  ;;  %v6046_v48 = vld [vmem:[#allocation29_spill] sm:$0xff] }
 0x84d   : > { %v4106_v30 = vpack.c.bf16 %v3158_v10, %v3158_v10  ;;  %v4107_v9 = vpack.c.bf16 %v3159_v46, %v3159_v46  ;;  %v4108_v58 = vpack.c.bf16 %v3160_v60, %v3160_v60  ;;  %v4109_v51 = vpack.c.bf16 %v3161_v53, %v3161_v53  ;;  %v6044_v61 = vld [vmem:[#allocation27_spill] sm:$0xff] }
 0x84e   : > { %v4110_v59 = vpack.c.bf16 %v3162_v47, %v3162_v47  ;;  %v4111_v12 = vpack.c.bf16 %v3163_v11, %v3163_v11  ;;  %v4112_v41 = vpack.c.bf16 %v3164_v21, %v3164_v21  ;;  %v3684_v63 = vrot.slane %v4105_v34, 5  ;;  %v3546_v47 = vld [vmem:[%s5478_s11] sm:$0x4]  ;;  %v3549_v11 = vld [vmem:[%s5478_s11 + $0x4] sm:$0x4] }
 0x84f   : > { %v3685_v14 = vrot.slane %v4106_v30, 5  ;;  %v3686_v42 = vrot.slane %v4107_v9, 5  ;;  %v3687_v15 = vrot.slane %v4108_v58, 5  ;;  %v3688_v22 = vrot.slane %v4109_v51, 5  ;;  %v3558_v30 = vld [vmem:[%s5478_s11 + $0x10] sm:$0x4] }
 0x850   : > { %v3689_v19 = vrot.slane %v4110_v59, 5  ;;  %v3690_v45 = vrot.slane %v4111_v12, 5  ;;  %v3691_v20 = vrot.slane %v4112_v41, 5  ;;  %v3704_v6 = vsel %vm5690_vm11, %v3684_v63, %v3703_v38  ;;  %v3552_v38 = vld [vmem:[%s5478_s11 + $0x8] sm:$0x4] }
 0x851   : > { %3705 = vst [vmem:[%s5478_s11] sm:$0x8] %v3704_v6  ;;  %v3707_v0 = vsel %vm5690_vm11, %v3685_v14, %v3706_v36  ;;  %v3710_v17 = vsel %vm5690_vm11, %v3686_v42, %v3709_v25  ;;  %v3713_v35 = vsel %vm5690_vm11, %v3687_v15, %v3712_v52  ;;  %v3716_v32 = vsel %vm5690_vm11, %v3688_v22, %v3715_v50  ;;  %v3555_v36 = vld [vmem:[%s5478_s11 + $0xc] sm:$0x4]  ;;  %v3561_v52 = vld [vmem:[%s5478_s11 + $0x14] sm:$0x4] }
 0x852   : > { %3708 = vst [vmem:[%s5478_s11 + $0x4] sm:$0x8] %v3707_v0  ;;  %3711 = vst [vmem:[%s5478_s11 + $0x8] sm:$0x8] %v3710_v17  ;;  %v3719_v55 = vsel %vm5690_vm11, %v3689_v19, %v3718_v13  ;;  %v3722_v43 = vsel %vm5690_vm11, %v3690_v45, %v3721_v28  ;;  %v3725_v8 = vsel %vm5690_vm11, %v3691_v20, %v3724_v56  ;;  %v3017_v27 = vrot.slane %v2966_v44, 1  ;;  %v4406_v28 = vpop.f32.mrf.mxu0 }
 0x853   : > { %3714 = vst [vmem:[%s5478_s11 + $0xc] sm:$0x8] %v3713_v35  ;;  %3717 = vst [vmem:[%s5478_s11 + $0x10] sm:$0x8] %v3716_v32  ;;  %v3018_v37 = vrot.slane %v2966_v44, 2  ;;  %v3019_v16 = vrot.slane %v2966_v44, 3  ;;  %v3141_v4 = vadd.f32 %v2966_v44, %v6039_v33 }
 0x854   : > { %3720 = vst [vmem:[%s5478_s11 + $0x14] sm:$0x8] %v3719_v55  ;;  %3723 = vst [vmem:[%s5478_s11 + $0x18] sm:$0x8] %v3722_v43  ;;  %v3020_v49 = vrot.slane %v2966_v44, 4  ;;  %v3021_v23 = vrot.slane %v2966_v44, 5  ;;  %v3142_v26 = vadd.f32 %v3017_v27, %v6040_v39 }
 0x855   : > { %3726 = vst [vmem:[%s5478_s11 + $0x1c] sm:$0x8] %v3725_v8  ;;  %v3022_v40 = vrot.slane %v2966_v44, 6  ;;  %v3023_v5 = vrot.slane %v2966_v44, 7  ;;  %v3143_v24 = vadd.f32 %v3018_v37, %v6041_v3  ;;  %v3144_v2 = vadd.f32 %v3019_v16, %v6042_v7  ;;  %v3564_v50 = vld [vmem:[%s5478_s11 + $0x18] sm:$0x4] }
 0x856   : > { %v3145_v62 = vadd.f32 %v3020_v49, %v6043_v1  ;;  %v3146_v29 = vadd.f32 %v3021_v23, %v6044_v61  ;;  %v4089_v46 = vpack.c.bf16 %v3141_v4, %v3141_v4  ;;  %v4090_v60 = vpack.c.bf16 %v3142_v26, %v3142_v26  ;;  %v3567_v13 = vld [vmem:[%s5478_s11 + $0x1c] sm:$0x4]  ;;  %v6051_v49 = vld [vmem:[#allocation30_spill] sm:$0xff]  ;;  %v6055_v39 = vld [vmem:[#allocation32_spill] sm:$0xff] }
 0x857   : > { %v3147_v54 = vadd.f32 %v3022_v40, %v6045_v31  ;;  %v3148_v10 = vadd.f32 %v3023_v5, %v6046_v48  ;;  %v4091_v57 = vpack.c.bf16 %v3143_v24, %v3143_v24  ;;  %v4092_v21 = vpack.c.bf16 %v3144_v2, %v3144_v2  ;;  %v6049_v27 = vld [vmem:[#allocation33_spill] sm:$0xff]  ;;  %v6053_v5 = vld [vmem:[#allocation31_spill] sm:$0xff]  ;;  %v6057_v24 = vld [vmem:[#allocation34_spill] sm:$0xff] }
 0x858   : > { %v4093_v34 = vpack.c.bf16 %v3145_v62, %v3145_v62  ;;  %v4094_v18 = vpack.c.bf16 %v3146_v29, %v3146_v29  ;;  %v3527_v51 = vrot.slane %v4089_v46, 6  ;;  %v3528_v25 = vrot.slane %v4090_v60, 6  ;;  %v6059_v1 = vld [vmem:[#allocation35_spill] sm:$0xff]  ;;  %v6061_v29 = vld [vmem:[#allocation36_spill] sm:$0xff]  ;;  %v6063_v48 = vld [vmem:[#allocation37_spill] sm:$0xff] }
 0x859   : > { %v4095_v9 = vpack.c.bf16 %v3147_v54, %v3147_v54  ;;  %v4096_v58 = vpack.c.bf16 %v3148_v10, %v3148_v10  ;;  %v3529_v59 = vrot.slane %v4091_v57, 6  ;;  %v3530_v12 = vrot.slane %v4092_v21, 6 }
 0x85a   : > { %v3531_v41 = vrot.slane %v4093_v34, 6  ;;  %v3532_v63 = vrot.slane %v4094_v18, 6  ;;  %v3547_v15 = vsel %vm5736_vm12, %v3527_v51, %v3546_v47  ;;  %v3550_v22 = vsel %vm5736_vm12, %v3528_v25, %v3549_v11  ;;  %v3793_v18 = vld [vmem:[%s5478_s11] sm:$0x8]  ;;  %v3802_v25 = vld [vmem:[%s5478_s11 + $0xc] sm:$0x8] }
 0x85b   : > { %v3533_v14 = vrot.slane %v4095_v9, 6  ;;  %v3534_v42 = vrot.slane %v4096_v58, 6  ;;  %3548 = vst [vmem:[%s5478_s11] sm:$0x4] %v3547_v15  ;;  %3551 = vst [vmem:[%s5478_s11 + $0x4] sm:$0x4] %v3550_v22  ;;  %v3553_v56 = vsel %vm5736_vm12, %v3529_v59, %v3552_v38  ;;  %v3556_v44 = vsel %vm5736_vm12, %v3530_v12, %v3555_v36 }
 0x85c   : > { %v3559_v19 = vsel %vm5736_vm12, %v3531_v41, %v3558_v30  ;;  %v3562_v45 = vsel %vm5736_vm12, %v3532_v63, %v3561_v52  ;;  %3554 = vst [vmem:[%s5478_s11 + $0x8] sm:$0x4] %v3553_v56  ;;  %3557 = vst [vmem:[%s5478_s11 + $0xc] sm:$0x4] %v3556_v44  ;;  %v3038_v0 = vrot.slane %v4406_v28, 1  ;;  %v3039_v17 = vrot.slane %v4406_v28, 2 }
 0x85d   : > { %3560 = vst [vmem:[%s5478_s11 + $0x10] sm:$0x4] %v3559_v19  ;;  %3563 = vst [vmem:[%s5478_s11 + $0x14] sm:$0x4] %v3562_v45  ;;  %v3565_v20 = vsel %vm5736_vm12, %v3533_v14, %v3564_v50  ;;  %v3568_v6 = vsel %vm5736_vm12, %v3534_v42, %v3567_v13  ;;  %v3040_v35 = vrot.slane %v4406_v28, 3  ;;  %v3041_v32 = vrot.slane %v4406_v28, 4 }
 0x85e   : > { %3566 = vst [vmem:[%s5478_s11 + $0x18] sm:$0x4] %v3565_v20  ;;  %3569 = vst [vmem:[%s5478_s11 + $0x1c] sm:$0x4] %v3568_v6  ;;  %v3042_v55 = vrot.slane %v4406_v28, 5  ;;  %v3043_v43 = vrot.slane %v4406_v28, 6  ;;  %v6050_v37 = vunpack.c.l.bf16 %v6049_v27  ;;  %v6052_v23 = vunpack.c.l.bf16 %v6051_v49  ;;  %v2969_v6 = vpop.f32.mrf.mxu0 }
 0x85f   : > { %v3044_v8 = vrot.slane %v4406_v28, 7  ;;  %v6054_v33 = vunpack.c.l.bf16 %v6053_v5  ;;  %v6056_v26 = vunpack.c.l.bf16 %v6055_v39  ;;  %v6058_v7 = vunpack.c.l.bf16 %v6057_v24  ;;  %v3796_v38 = vld [vmem:[%s5478_s11 + $0x4] sm:$0x8]  ;;  %v3799_v36 = vld [vmem:[%s5478_s11 + $0x8] sm:$0x8] }
 0x860   : > { %v3165_v16 = vadd.f32 %v4406_v28, %v6050_v37  ;;  %v3166_v40 = vadd.f32 %v3038_v0, %v6052_v23  ;;  %v6060_v62 = vunpack.c.l.bf16 %v6059_v1  ;;  %v6062_v31 = vunpack.c.l.bf16 %v6061_v29  ;;  %v3805_v52 = vld [vmem:[%s5478_s11 + $0x10] sm:$0x8]  ;;  %v3808_v13 = vld [vmem:[%s5478_s11 + $0x14] sm:$0x8]  ;;  %v3811_v22 = vld [vmem:[%s5478_s11 + $0x18] sm:$0x8] }
 0x861   : > { %v3167_v4 = vadd.f32 %v3039_v17, %v6054_v33  ;;  %v3168_v3 = vadd.f32 %v3040_v35, %v6056_v26  ;;  %v3169_v2 = vadd.f32 %v3041_v32, %v6058_v7  ;;  %v6064_v10 = vunpack.c.l.bf16 %v6063_v48  ;;  %v3814_v20 = vld [vmem:[%s5478_s11 + $0x1c] sm:$0x8]  ;;  %v6067_v39 = vld [vmem:[#allocation14_spill] sm:$0xff]  ;;  %v6069_v24 = vld [vmem:[#allocation15_spill] sm:$0xff] }
 0x862   : > { %v3170_v61 = vadd.f32 %v3042_v55, %v6060_v62  ;;  %v3171_v54 = vadd.f32 %v3043_v43, %v6062_v31  ;;  %v4113_v60 = vpack.c.bf16 %v3165_v16, %v3165_v16  ;;  %v4114_v53 = vpack.c.bf16 %v3166_v40, %v3166_v40  ;;  %v6071_v1 = vld [vmem:[#allocation16_spill] sm:$0xff]  ;;  %v6073_v29 = vld [vmem:[#allocation17_spill] sm:$0xff]  ;;  %v6075_v48 = vld [vmem:[#allocation18_spill] sm:$0xff] }
 0x863   : > { %v3172_v46 = vadd.f32 %v3044_v8, %v6064_v10  ;;  %v4115_v47 = vpack.c.bf16 %v3167_v4, %v3167_v4  ;;  %v4116_v11 = vpack.c.bf16 %v3168_v3, %v3168_v3  ;;  %v4117_v57 = vpack.c.bf16 %v3169_v2, %v3169_v2  ;;  %v3645_v63 = vld [vmem:[%s5478_s11 + $0xc] sm:$0x4] }
 0x864   : > { %v4118_v21 = vpack.c.bf16 %v3170_v61, %v3170_v61  ;;  %v4119_v34 = vpack.c.bf16 %v3171_v54, %v3171_v54  ;;  %v3752_v9 = vshll.u32 %v4113_v60, 16  ;;  %v3756_v58 = vshll.u32 %v4114_v53, 16  ;;  %v6077_v60 = vld [vmem:[#allocation19_spill] sm:$0xff] }
 0x865   : > { %v4120_v30 = vpack.c.bf16 %v3172_v46, %v3172_v46  ;;  %v3760_v51 = vshll.u32 %v4115_v47, 16  ;;  %v3764_v50 = vshll.u32 %v4116_v11, 16  ;;  %v3768_v59 = vshll.u32 %v4117_v57, 16  ;;  %v6079_v11 = vld [vmem:[#allocation22_spill] sm:$0xff] }
 0x866   : > { %v3772_v12 = vshll.u32 %v4118_v21, 16  ;;  %v3776_v41 = vshll.u32 %v4119_v34, 16  ;;  %v3754_v28 = vrot.slane %v3752_v9, 5  ;;  %v3758_v14 = vrot.slane %v3756_v58, 5  ;;  %v6081_v34 = vld [vmem:[#allocation26_spill] sm:$0xff] }
 0x867   : > { %v3762_v42 = vrot.slane %v3760_v51, 5  ;;  %v3780_v15 = vshll.u32 %v4120_v30, 16  ;;  %v3766_v56 = vrot.slane %v3764_v50, 5  ;;  %v3770_v44 = vrot.slane %v3768_v59, 5  ;;  %v3636_v59 = vld [vmem:[%s5478_s11] sm:$0x4] }
 0x868   : > { %v3774_v19 = vrot.slane %v3772_v12, 5  ;;  %v3778_v45 = vrot.slane %v3776_v41, 5  ;;  %v3794_v17 = vsel %vm5795_vm14, %v3754_v28, %v3793_v18  ;;  %v3797_v35 = vsel %vm5795_vm14, %v3758_v14, %v3796_v38  ;;  %v3639_v12 = vld [vmem:[%s5478_s11 + $0x4] sm:$0x4]  ;;  %v3642_v41 = vld [vmem:[%s5478_s11 + $0x8] sm:$0x4] }
 0x869   : > { %v3782_v0 = vrot.slane %v3780_v15, 5  ;;  %v3800_v32 = vsel %vm5795_vm14, %v3762_v42, %v3799_v36  ;;  %3795 = vst [vmem:[%s5478_s11] sm:$0x8] %v3794_v17  ;;  %3798 = vst [vmem:[%s5478_s11 + $0x4] sm:$0x8] %v3797_v35  ;;  %v3803_v55 = vsel %vm5795_vm14, %v3766_v56, %v3802_v25  ;;  %v3806_v43 = vsel %vm5795_vm14, %v3770_v44, %v3805_v52  ;;  %v3648_v15 = vld [vmem:[%s5478_s11 + $0x10] sm:$0x4] }
 0x86a   : > { %3801 = vst [vmem:[%s5478_s11 + $0x8] sm:$0x8] %v3800_v32  ;;  %v3809_v8 = vsel %vm5795_vm14, %v3774_v19, %v3808_v13  ;;  %v3812_v27 = vsel %vm5795_vm14, %v3778_v45, %v3811_v22  ;;  %3804 = vst [vmem:[%s5478_s11 + $0xc] sm:$0x8] %v3803_v55  ;;  %v3024_v16 = vrot.slane %v2969_v6, 1  ;;  %v3025_v49 = vrot.slane %v2969_v6, 2 }
 0x86b   : > { %3807 = vst [vmem:[%s5478_s11 + $0x10] sm:$0x8] %v3806_v43  ;;  %3810 = vst [vmem:[%s5478_s11 + $0x14] sm:$0x8] %v3809_v8  ;;  %v3815_v37 = vsel %vm5795_vm14, %v3782_v0, %v3814_v20  ;;  %v3026_v23 = vrot.slane %v2969_v6, 3  ;;  %v3027_v40 = vrot.slane %v2969_v6, 4  ;;  %v6068_v26 = vunpack.c.l.bf16 %v6067_v39 }
 0x86c   : > { %3813 = vst [vmem:[%s5478_s11 + $0x18] sm:$0x8] %v3812_v27  ;;  %3816 = vst [vmem:[%s5478_s11 + $0x1c] sm:$0x8] %v3815_v37  ;;  %v3028_v5 = vrot.slane %v2969_v6, 5  ;;  %v3029_v33 = vrot.slane %v2969_v6, 6  ;;  %v6070_v7 = vunpack.c.l.bf16 %v6069_v24  ;;  %v6072_v62 = vunpack.c.l.bf16 %v6071_v1 }
 0x86d   : > { %v3030_v4 = vrot.slane %v2969_v6, 7  ;;  %v3149_v3 = vadd.f32 %v2969_v6, %v6068_v26  ;;  %v6074_v31 = vunpack.c.l.bf16 %v6073_v29  ;;  %v6076_v10 = vunpack.c.l.bf16 %v6075_v48  ;;  %v3651_v22 = vld [vmem:[%s5478_s11 + $0x14] sm:$0x4]  ;;  %v3654_v6 = vld [vmem:[%s5478_s11 + $0x18] sm:$0x4] }
 0x86e   : > { %v3150_v2 = vadd.f32 %v3024_v16, %v6070_v7  ;;  %v3151_v61 = vadd.f32 %v3025_v49, %v6072_v62  ;;  %v6078_v53 = vunpack.c.l.bf16 %v6077_v60  ;;  %v6080_v57 = vunpack.c.l.bf16 %v6079_v11  ;;  %v3657_v55 = vld [vmem:[%s5478_s11 + $0x1c] sm:$0x4] }
 0x86f   : > { %v3152_v54 = vadd.f32 %v3026_v23, %v6074_v31  ;;  %v3153_v46 = vadd.f32 %v3027_v40, %v6076_v10  ;;  %v6082_v18 = vunpack.c.l.bf16 %v6081_v34  ;;  %v4097_v36 = vpack.c.bf16 %v3149_v3, %v3149_v3 }
 0x870   : > { %v3154_v47 = vadd.f32 %v3028_v5, %v6078_v53  ;;  %v3155_v21 = vadd.f32 %v3029_v33, %v6080_v57  ;;  %v4098_v30 = vpack.c.bf16 %v3150_v2, %v3150_v2  ;;  %v4099_v9 = vpack.c.bf16 %v3151_v61, %v3151_v61 }
 0x871   : > { %v3156_v38 = vadd.f32 %v3030_v4, %v6082_v18  ;;  %v4100_v58 = vpack.c.bf16 %v3152_v54, %v3152_v54  ;;  %v4101_v51 = vpack.c.bf16 %v3153_v46, %v3153_v46  ;;  %v3595_v13 = vshll.u32 %v4097_v36, 16 }
 0x872   : > { %v4102_v25 = vpack.c.bf16 %v3154_v47, %v3154_v47  ;;  %v4103_v52 = vpack.c.bf16 %v3155_v21, %v3155_v21  ;;  %v3599_v28 = vshll.u32 %v4098_v30, 16  ;;  %v3603_v14 = vshll.u32 %v4099_v9, 16 }
 0x873   : > { %v4104_v50 = vpack.c.bf16 %v3156_v38, %v3156_v38  ;;  %v3607_v42 = vshll.u32 %v4100_v58, 16  ;;  %v3611_v56 = vshll.u32 %v4101_v51, 16  ;;  %v3597_v0 = vrot.slane %v3595_v13, 6 }
 0x874   : > { %v3615_v44 = vshll.u32 %v4102_v25, 16  ;;  %v3619_v19 = vshll.u32 %v4103_v52, 16  ;;  %v3601_v17 = vrot.slane %v3599_v28, 6  ;;  %v3605_v35 = vrot.slane %v3603_v14, 6 }
 0x875   : > { %v3623_v45 = vshll.u32 %v4104_v50, 16  ;;  %v3609_v32 = vrot.slane %v3607_v42, 6  ;;  %v3613_v43 = vrot.slane %v3611_v56, 6  ;;  %v3637_v16 = vsel %vm5850_vm0, %v3597_v0, %v3636_v59 }
 0x876   : > { %v3617_v8 = vrot.slane %v3615_v44, 6  ;;  %v3621_v27 = vrot.slane %v3619_v19, 6  ;;  %v3640_v49 = vsel %vm5850_vm0, %v3601_v17, %v3639_v12  ;;  %v3643_v23 = vsel %vm5850_vm0, %v3605_v35, %v3642_v41  ;;  %3638 = vst [vmem:[%s5478_s11] sm:$0x4] %v3637_v16 }
 0x877   : > { %v3625_v37 = vrot.slane %v3623_v45, 6  ;;  %v3646_v40 = vsel %vm5850_vm0, %v3609_v32, %v3645_v63  ;;  %3641 = vst [vmem:[%s5478_s11 + $0x4] sm:$0x4] %v3640_v49  ;;  %3644 = vst [vmem:[%s5478_s11 + $0x8] sm:$0x4] %v3643_v23  ;;  %v3649_v5 = vsel %vm5850_vm0, %v3613_v43, %v3648_v15 }
 0x878   : > { %3647 = vst [vmem:[%s5478_s11 + $0xc] sm:$0x4] %v3646_v40  ;;  %v3652_v33 = vsel %vm5850_vm0, %v3617_v8, %v3651_v22  ;;  %v3655_v4 = vsel %vm5850_vm0, %v3621_v27, %v3654_v6  ;;  %3650 = vst [vmem:[%s5478_s11 + $0x10] sm:$0x4] %v3649_v5 }
 0x879   : > { %v3658_v39 = vsel %vm5850_vm0, %v3625_v37, %v3657_v55  ;;  %3653 = vst [vmem:[%s5478_s11 + $0x14] sm:$0x4] %v3652_v33  ;;  %3656 = vst [vmem:[%s5478_s11 + $0x18] sm:$0x4] %v3655_v4 }
 0x87a   : > { %3659 = vst [vmem:[%s5478_s11 + $0x1c] sm:$0x4] %v3658_v39 }
 0x87b PF: > { %s14_s17 = sadd.s32 1, %s4550_s17   ;;  %s6085_s15 = smov %s4546_s16 }
 0x87c   : > { %p11_p5 = scmp.ge.s32.totalorder %s14_s17, 4   ;;  %s6086_s16 = smov %s6088_s18 }
 0x87e   :  { %13 = sbr.rel (!%p11_p5) target bundleno = 2 (0x2), region = 66 }

</bundles_post_ra>
